<compile_context>
chip_gen: v7x
topology: tpu7x:2x2x1
jax: 0.10.0
libtpu: 0.0.40
codegen_flags: <defaults>
</compile_context>

<pallas_src>
import functools

import jax
import jax.numpy as jnp
from jax.experimental import pallas as pl
from jax.experimental.pallas import tpu as pltpu


# ----------------------------------------------------------------------------
# Helpers
# ----------------------------------------------------------------------------

_COMPILER_PARAMS = pltpu.CompilerParams(
    # Plenty for the toy shapes; leaves headroom on v7x (64 MiB physical VMEM)
    # while still allowing real CLIP-L weights to stay resident on v5e/v6e.
    vmem_limit_bytes=48 * 1024 * 1024,
)


def _vmem_specs(n):
    return [pl.BlockSpec(memory_space=pltpu.MemorySpace.VMEM) for _ in range(n)]


def _ln(x, g, b, eps):
    mean = jnp.mean(x, axis=-1, keepdims=True)
    var = jnp.mean((x - mean) ** 2, axis=-1, keepdims=True)
    return (x - mean) * jax.lax.rsqrt(var + eps) * g + b


# ----------------------------------------------------------------------------
# Shared CLIP encoder layer (operates on the flattened (B*S, D) activation)
# ----------------------------------------------------------------------------

def _encoder_block(x, masks, wqkv, bqkv, wo, bo, fc1w, fc1b, fc2w, fc2b,
                   ln1_g, ln1_b, ln2_g, ln2_b, *, batch, seq, num_heads, eps):
    """Pre-LN CLIP encoder layer.

    All big matmuls use M = batch*seq (batch folded into M); only the (S,S)
    attention part loops per-sample / per-head.  Per-head outputs are folded
    directly into the out-projection (partial (S,Dh)@(Dh,D) accumulation), so
    there is no cross-lane concatenate of 64-lane head slices.
    """
    _, D = x.shape
    dh = D // num_heads
    scale = dh ** -0.5

    # --- self attention ---
    h = _ln(x, ln1_g, ln1_b, eps)
    qkv = jnp.dot(h.astype(jnp.bfloat16), wqkv,
                  preferred_element_type=jnp.float32) + bqkv        # (B*S, 3D)
    q = qkv[:, :D] * scale                                          # scale folded into q
    k = qkv[:, D:2 * D]
    v = qkv[:, 2 * D:]

    attn_parts = []
    for b in range(batch):
        rows = slice(b * seq, (b + 1) * seq)
        acc = jnp.zeros((seq, D), jnp.float32)
        for hh in range(num_heads):
            cols = slice(hh * dh, (hh + 1) * dh)
            qh = q[rows, cols].astype(jnp.bfloat16)
            kh = k[rows, cols].astype(jnp.bfloat16)
            vh = v[rows, cols].astype(jnp.bfloat16)
            s = jax.lax.dot_general(qh, kh, (((1,), (1,)), ((), ())),
                                    preferred_element_type=jnp.float32)  # (S,S)
            if masks[b] is not None:
                s = s + masks[b]
            s = s - jnp.max(s, axis=-1, keepdims=True)
            p = jnp.exp(s)
            p = p * pl.reciprocal(jnp.sum(p, axis=-1, keepdims=True), approx=True)
            oh = jnp.dot(p.astype(jnp.bfloat16), vh,
                         preferred_element_type=jnp.float32)             # (S,Dh)
            # Per-head partial out-projection accumulated in f32 (no concat).
            acc = acc + jnp.dot(oh.astype(jnp.bfloat16), wo[cols, :],
                                preferred_element_type=jnp.float32)
        attn_parts.append(acc)
    attn = jnp.concatenate(attn_parts, axis=0) + bo                 # (B*S, D), 8-row aligned pieces
    x = x + attn

    # --- MLP ---
    h = _ln(x, ln2_g, ln2_b, eps)
    h = jnp.dot(h.astype(jnp.bfloat16), fc1w,
                preferred_element_type=jnp.float32) + fc1b
    h = h * jax.nn.sigmoid(1.702 * h)                               # quick_gelu
    h = jnp.dot(h.astype(jnp.bfloat16), fc2w,
                preferred_element_type=jnp.float32) + fc2b
    return x + h


# ----------------------------------------------------------------------------
# Kernel 1: fused vision tower -> normalized image_embeds (B, proj)
# ----------------------------------------------------------------------------

def _vision_tower_kernel(patches_ref, add_ref, vec_ref, bqkv_ref, fc1b_ref,
                         patchw_ref, wqkv_ref, wo_ref, fc1w_ref, fc2w_ref,
                         projw_ref, out_ref, *, batch, seq, valid_len,
                         num_heads, eps):
    # Stacked (10, D) vector table:
    #   [pre_g, pre_b, ln1_g, ln1_b, ln2_g, ln2_b, attn_out_b, fc2_b, post_g, post_b]
    vec = vec_ref[...]

    # Patch embedding (M = B*S_pad).  CLS token, positional embeddings and the
    # patch bias are pre-folded into one additive table (row 0 = cls + pos0).
    x = jnp.dot(patches_ref[...].astype(jnp.bfloat16), patchw_ref[...],
                preferred_element_type=jnp.float32) + add_ref[...]       # (B*S, D)

    # CLIP vision pre_layrnorm.
    x = _ln(x, vec[0:1], vec[1:2], eps)

    # Encoder layer; padded sequence rows (>= valid_len) are masked out as
    # attention keys with an in-kernel iota mask (no mask DMA).
    col = jax.lax.broadcasted_iota(jnp.int32, (seq, seq), 1)
    vis_mask = jnp.where(col < valid_len, 0.0, -1e9).astype(jnp.float32)
    x = _encoder_block(x, [vis_mask] * batch,
                       wqkv_ref[...], bqkv_ref[...], wo_ref[...], vec[6:7],
                       fc1w_ref[...], fc1b_ref[...], fc2w_ref[...], vec[7:8],
                       vec[2:3], vec[3:4], vec[4:5], vec[5:6],
                       batch=batch, seq=seq, num_heads=num_heads, eps=eps)

    # CLS pooling via a static one-hot selection matmul (row b*seq per sample).
    ridx = jax.lax.broadcasted_iota(jnp.int32, (batch, batch * seq), 0)
    cidx = jax.lax.broadcasted_iota(jnp.int32, (batch, batch * seq), 1)
    sel = (cidx == ridx * seq).astype(jnp.float32)                   # (B, B*S)
    pooled = jnp.dot(sel, x, preferred_element_type=jnp.float32)     # (B, D)

    # post LayerNorm -> visual projection (no bias) -> L2 normalize.
    h = _ln(pooled, vec[8:9], vec[9:10], eps)
    y = jnp.dot(h.astype(jnp.bfloat16), projw_ref[...],
                preferred_element_type=jnp.float32)
    inv = jax.lax.rsqrt(jnp.maximum(jnp.sum(y * y, axis=-1, keepdims=True),
                                    1e-12))
    out_ref[...] = y * inv


def vision_tower(pixel_values, vp, num_heads):
    B, C, himg, wimg = pixel_values.shape
    P = vp["patch_size"]
    nph, npw = himg // P, wimg // P
    n_patches = nph * npw
    proj = vp["proj_w"].shape[1]
    S = vp["pos_add"].shape[0]                    # sequence padded to a multiple of 8
    pdim = C * P * P

    # Patch extraction is pure layout work; zero rows fill the CLS slot and the
    # sublane padding (their projection is overwritten by the additive table /
    # masked out of attention).
    patches = pixel_values.reshape(B, C, nph, P, npw, P)
    patches = patches.transpose(0, 2, 4, 1, 3, 5).reshape(B, n_patches, pdim)
    patches_pad = jnp.zeros((B, S, pdim), jnp.float32)
    patches_pad = patches_pad.at[:, 1:1 + n_patches, :].set(patches)
    patches_flat = patches_pad.reshape(B * S, pdim)
    add_table = jnp.tile(vp["pos_add"], (B, 1))   # (B*S, D), parameter-derived

    kernel = functools.partial(_vision_tower_kernel, batch=B, seq=S,
                               valid_len=n_patches + 1, num_heads=num_heads,
                               eps=1e-5)
    return pl.pallas_call(
        kernel,
        out_shape=jax.ShapeDtypeStruct((B, proj), jnp.float32),
        in_specs=_vmem_specs(11),
        out_specs=pl.BlockSpec(memory_space=pltpu.MemorySpace.VMEM),
        compiler_params=_COMPILER_PARAMS,
    )(patches_flat, add_table, vp["vecD"], vp["b_qkv"], vp["fc1_b"],
      vp["patch_w"], vp["w_qkv"], vp["wo"], vp["fc1_w"], vp["fc2_w"],
      vp["proj_w"])


# ----------------------------------------------------------------------------
# Kernel 2: fused text tower + Hadamard fusion + MLP classifier
# ----------------------------------------------------------------------------

def _text_classifier_kernel(x_ref, kmask_ref, pool_ref, img_ref,
                            vec_ref, bqkv_ref, fc1b_ref,
                            wqkv_ref, wo_ref, fc1w_ref, fc2w_ref, projw_ref,
                            w1_ref, cvec1_ref, w2_ref, cvec2_ref, w3_ref,
                            b3_ref, txt_ref, fused_ref, logits_ref,
                            *, batch, seq, num_heads, eps):
    # Stacked (8, D) vector table:
    #   [ln1_g, ln1_b, ln2_g, ln2_b, attn_out_b, fc2_b, final_g, final_b]
    vec = vec_ref[...]
    x = x_ref[...].astype(jnp.float32)            # (B*S, D) token + positional embeds

    # Causal + key-padding mask built in-kernel from iota and the (B,S) mask.
    row = jax.lax.broadcasted_iota(jnp.int32, (seq, seq), 0)
    col = jax.lax.broadcasted_iota(jnp.int32, (seq, seq), 1)
    causal = col <= row
    km = kmask_ref[...]                           # (B, S) f32
    masks = [jnp.where(causal & (km[b:b + 1, :] > 0.0), 0.0, -1e9)
             .astype(jnp.float32) for b in range(batch)]

    x = _encoder_block(x, masks,
                       wqkv_ref[...], bqkv_ref[...], wo_ref[...], vec[4:5],
                       fc1w_ref[...], fc1b_ref[...], fc2w_ref[...], vec[5:6],
                       vec[0:1], vec[1:2], vec[2:3], vec[3:4],
                       batch=batch, seq=seq, num_heads=num_heads, eps=eps)

    # EOT pooling via a precomputed (B, B*S) one-hot selection matmul.
    pooled = jnp.dot(pool_ref[...], x, preferred_element_type=jnp.float32)

    # final LayerNorm -> text projection (no bias) -> L2 normalize.
    h = _ln(pooled, vec[6:7], vec[7:8], eps)
    y = jnp.dot(h.astype(jnp.bfloat16), projw_ref[...],
                preferred_element_type=jnp.float32)
    inv = jax.lax.rsqrt(jnp.maximum(jnp.sum(y * y, axis=-1, keepdims=True),
                                    1e-12))
    txt = y * inv
    txt_ref[...] = txt

    # HadamardFusion (dropout = identity in eval) + 3-layer MLP classifier.
    # BatchNorm1d (eval) is pre-folded into per-feature scale/shift.
    fused = img_ref[...] * txt
    fused_ref[...] = fused
    cv1 = cvec1_ref[...]                          # (3, 768): [bias, bn_scale, bn_shift]
    cv2 = cvec2_ref[...]                          # (3, 512)
    h = jnp.dot(fused.astype(jnp.bfloat16), w1_ref[...],
                preferred_element_type=jnp.float32) + cv1[0:1]
    h = jnp.maximum(h, 0.0) * cv1[1:2] + cv1[2:3]
    h = jnp.dot(h.astype(jnp.bfloat16), w2_ref[...],
                preferred_element_type=jnp.float32) + cv2[0:1]
    h = jnp.maximum(h, 0.0) * cv2[1:2] + cv2[2:3]
    logits_ref[...] = jnp.dot(h.astype(jnp.bfloat16), w3_ref[...],
                              preferred_element_type=jnp.float32) + b3_ref[...]


def text_tower_and_classify(input_ids, attention_mask, image_embeds, tp, cp,
                            num_heads):
    B, S = input_ids.shape
    D = tp["proj_w"].shape[0]
    proj = tp["proj_w"].shape[1]
    nl_pad = cp["w3"].shape[1]

    # TODO(synk): token-embedding gather and EOT argmax are data-dependent
    # gathers left in JAX glue (negligible at these shapes).
    x = jnp.take(tp["tok_emb"], input_ids, axis=0) + tp["pos_emb"][None]  # (B,S,D)
    x_flat = x.reshape(B * S, D)
    key_mask = attention_mask.astype(jnp.float32)                         # (B,S)
    eot = jnp.argmax(input_ids, axis=-1)              # HF CLIP EOT pooling (max id)
    flat_pos = jnp.arange(B, dtype=jnp.int32) * S + eot.astype(jnp.int32)
    pool_mat = (jax.lax.broadcasted_iota(jnp.int32, (B, B * S), 1)
                == flat_pos[:, None]).astype(jnp.float32)                 # (B, B*S)

    kernel = functools.partial(_text_classifier_kernel, batch=B, seq=S,
                               num_heads=num_heads, eps=1e-5)
    text_embeds, fused, logits_pad = pl.pallas_call(
        kernel,
        out_shape=(jax.ShapeDtypeStruct((B, proj), jnp.float32),
                   jax.ShapeDtypeStruct((B, proj), jnp.float32),
                   jax.ShapeDtypeStruct((B, nl_pad), jnp.float32)),
        in_specs=_vmem_specs(18),
        out_specs=tuple(_vmem_specs(3)),
        compiler_params=_COMPILER_PARAMS,
    )(x_flat, key_mask, pool_mat, image_embeds,
      tp["vecD"], tp["b_qkv"], tp["fc1_b"],
      tp["w_qkv"], tp["wo"], tp["fc1_w"], tp["fc2_w"], tp["proj_w"],
      cp["w1"], cp["cvec1"], cp["w2"], cp["cvec2"], cp["w3"], cp["b3"])
    return text_embeds, fused, logits_pad[:, :cp["num_labels"]]


# ----------------------------------------------------------------------------
# Forward (two pallas_calls total)
# ----------------------------------------------------------------------------

def rgcl_clip_forward(params, pixel_values, input_ids, attention_mask):
    image_embeds = vision_tower(pixel_values, params["vision"],
                                params["num_heads"])
    # TODO(synk): on v7x the two towers could run one-per-TensorCore via
    # pl.core_map; kept sequential here for simplicity.
    text_embeds, fused_embeds, logits = text_tower_and_classify(
        input_ids, attention_mask, image_embeds, params["text"],
        params["classifier"], params["num_heads"])
    return {"logits": logits, "image_embeds": image_embeds,
            "text_embeds": text_embeds, "fused_embeds": fused_embeds}


# ----------------------------------------------------------------------------
# Deterministic parameter initialization (synthetic mini-CLIP)
# ----------------------------------------------------------------------------

def init_params(key, *, channels, img_size, patch_size, vocab, seq_t, d_model,
                proj_dim, num_heads, num_labels):
    keys = iter(jax.random.split(key, 64))
    bf = jnp.bfloat16

    def nrm(shape, scale=0.05, dtype=jnp.float32):
        return (scale * jax.random.normal(next(keys), shape,
                                          jnp.float32)).astype(dtype)

    d = d_model
    ones = jnp.ones((d,), jnp.float32)
    zeros = jnp.zeros((d,), jnp.float32)

    def enc_weights():
        return dict(
            w_qkv=nrm((d, 3 * d), dtype=bf),
            b_qkv=jnp.zeros((1, 3 * d), jnp.float32),
            wo=nrm((d, d), dtype=bf),
            fc1_w=nrm((d, 4 * d), dtype=bf),
            fc1_b=jnp.zeros((1, 4 * d), jnp.float32),
            fc2_w=nrm((4 * d, d), dtype=bf),
        )

    n_patches = (img_size // patch_size) ** 2
    s_valid = n_patches + 1
    s_pad = ((s_valid + 7) // 8) * 8      # pad vision sequence to a sublane multiple

    class_emb = nrm((d,))
    pos_emb_v = nrm((s_valid, d))
    patch_b = jnp.zeros((d,), jnp.float32)
    pos_add = jnp.zeros((s_pad, d), jnp.float32)
    pos_add = pos_add.at[0].set(class_emb + pos_emb_v[0])
    pos_add = pos_add.at[1:s_valid].set(pos_emb_v[1:] + patch_b)

    vision = dict(
        patch_size=patch_size,
        patch_w=nrm((channels * patch_size * patch_size, d), dtype=bf),
        pos_add=pos_add,
        # [pre_g, pre_b, ln1_g, ln1_b, ln2_g, ln2_b, attn_out_b, fc2_b, post_g, post_b]
        vecD=jnp.stack([ones, zeros, ones, zeros, ones, zeros,
                        zeros, zeros, ones, zeros], axis=0),
        proj_w=nrm((d, proj_dim), dtype=bf),
        **enc_weights(),
    )
    text = dict(
        tok_emb=nrm((vocab, d)),
        pos_emb=nrm((seq_t, d)),
        # [ln1_g, ln1_b, ln2_g, ln2_b, attn_out_b, fc2_b, final_g, final_b]
        vecD=jnp.stack([ones, zeros, ones, zeros, zeros, zeros, ones, zeros],
                       axis=0),
        proj_w=nrm((d, proj_dim), dtype=bf),
        **enc_weights(),
    )

    # Classifier (hidden dims 768 / 512 as in the PyTorch module).  BatchNorm1d
    # (eval) folded to per-feature scale/shift; logits padded to 128 lanes for
    # unmasked stores (padded columns have zero weight/bias, sliced off in glue).
    h1, h2 = 768, 512
    bn_eps = 1e-5

    def bn_fold(g, b, m, v):
        scale = g * jax.lax.rsqrt(v + bn_eps)
        return scale, b - m * scale

    bn1_scale, bn1_shift = bn_fold(jnp.ones((h1,)), jnp.zeros((h1,)),
                                   jnp.zeros((h1,)), jnp.ones((h1,)))
    bn2_scale, bn2_shift = bn_fold(jnp.ones((h2,)), jnp.zeros((h2,)),
                                   jnp.zeros((h2,)), jnp.ones((h2,)))
    nl_pad = ((num_labels + 127) // 128) * 128
    w3 = jnp.zeros((h2, nl_pad), jnp.float32).at[:, :num_labels].set(
        0.05 * jax.random.normal(next(keys), (h2, num_labels), jnp.float32))
    classifier = dict(
        w1=nrm((proj_dim, h1), dtype=bf),
        cvec1=jnp.stack([jnp.zeros((h1,)), bn1_scale, bn1_shift], axis=0),
        w2=nrm((h1, h2), dtype=bf),
        cvec2=jnp.stack([jnp.zeros((h2,)), bn2_scale, bn2_shift], axis=0),
        w3=w3.astype(bf),
        b3=jnp.zeros((1, nl_pad), jnp.float32),
        num_labels=num_labels,
    )
    return dict(vision=vision, text=text, classifier=classifier,
                num_heads=num_heads)


# ----------------------------------------------------------------------------

if __name__ == "__main__":
    # Small shapes consistent with the module's forward signature; feature dims
    # chosen lane-dense (multiples of 128).
    B, C, IMG, PATCH = 2, 3, 32, 16
    SEQ_T, VOCAB = 8, 64
    D_MODEL, PROJ, HEADS, NUM_LABELS = 128, 128, 2, 2

    key = jax.random.PRNGKey(0)
    kp, kx, kt = jax.random.split(key, 3)

    params = init_params(kp, channels=C, img_size=IMG, patch_size=PATCH,
                         vocab=VOCAB, seq_t=SEQ_T, d_model=D_MODEL,
                         proj_dim=PROJ, num_heads=HEADS, num_labels=NUM_LABELS)

    pixel_values = jax.random.normal(kx, (B, C, IMG, IMG), jnp.float32)  # NCHW
    input_ids = jax.random.randint(kt, (B, SEQ_T), 1, VOCAB, dtype=jnp.int32)
    attention_mask = jnp.array([[1, 1, 1, 1, 1, 1, 1, 1],
                                [1, 1, 1, 1, 1, 0, 0, 0]], dtype=jnp.int32)

    # TODO(synk): dropout / BatchNorm use eval-mode (inference) semantics.
    fwd = jax.jit(functools.partial(rgcl_clip_forward, params))
    out = fwd(pixel_values, input_ids, attention_mask)
    jax.block_until_ready(out)

    assert out["logits"].shape == (B, NUM_LABELS)
    assert out["image_embeds"].shape == (B, PROJ)
    assert out["text_embeds"].shape == (B, PROJ)
    assert out["fused_embeds"].shape == (B, PROJ)
    assert bool(jnp.all(jnp.isfinite(out["logits"])))
    assert bool(jnp.all(jnp.isfinite(out["image_embeds"])))
    assert bool(jnp.all(jnp.isfinite(out["text_embeds"])))
    print("KERNEL_OK")
</pallas_src>

<mosaic_0001>
module attributes {stable_mosaic.version = 11 : i64} {
  func.func @_vision_tower_kernel(%arg0: memref<16x768xf32, #tpu.memory_space<vmem>>, %arg1: memref<16x128xf32, #tpu.memory_space<vmem>>, %arg2: memref<10x128xf32, #tpu.memory_space<vmem>>, %arg3: memref<1x384xf32, #tpu.memory_space<vmem>>, %arg4: memref<1x512xf32, #tpu.memory_space<vmem>>, %arg5: memref<768x128xbf16, #tpu.memory_space<vmem>>, %arg6: memref<128x384xbf16, #tpu.memory_space<vmem>>, %arg7: memref<128x128xbf16, #tpu.memory_space<vmem>>, %arg8: memref<128x512xbf16, #tpu.memory_space<vmem>>, %arg9: memref<512x128xbf16, #tpu.memory_space<vmem>>, %arg10: memref<128x128xbf16, #tpu.memory_space<vmem>>, %arg11: memref<2x128xf32, #tpu.memory_space<vmem>>) attributes {dimension_semantics = [], scalar_prefetch = 0 : i64, scratch_operands = 0 : i64, tpu.core_type = #tpu.core_type<tc>} {
    %c0 = arith.constant 0 : index
    %c0_0 = arith.constant 0 : index
    %0 = vector.load %arg2[%c0, %c0_0] : memref<10x128xf32, #tpu.memory_space<vmem>>, vector<10x128xf32>
    %c0_1 = arith.constant 0 : index
    %c0_2 = arith.constant 0 : index
    %1 = vector.load %arg0[%c0_1, %c0_2] : memref<16x768xf32, #tpu.memory_space<vmem>>, vector<16x768xf32>
    %2 = arith.truncf %1 : vector<16x768xf32> to vector<16x768xbf16>
    %c0_3 = arith.constant 0 : index
    %c0_4 = arith.constant 0 : index
    %3 = vector.load %arg5[%c0_3, %c0_4] : memref<768x128xbf16, #tpu.memory_space<vmem>>, vector<768x128xbf16>
    %cst = arith.constant dense<0.000000e+00> : vector<16x128xf32>
    %4 = tpu.matmul %2, %3, %cst {dimension_numbers = #tpu.dot_dimension_numbers<[1], [0], [0], [1], [0, 0, 1, 1], [], []>} : vector<16x768xbf16>, vector<768x128xbf16>, vector<16x128xf32> -> vector<16x128xf32>
    %c0_5 = arith.constant 0 : index
    %c0_6 = arith.constant 0 : index
    %5 = vector.load %arg1[%c0_5, %c0_6] : memref<16x128xf32, #tpu.memory_space<vmem>>, vector<16x128xf32>
    %6 = arith.addf %4, %5 : vector<16x128xf32>
    %7 = vector.extract_strided_slice %0 {offsets = [0, 0], sizes = [1, 128], strides = [1, 1]} : vector<10x128xf32> to vector<1x128xf32>
    %8 = vector.extract_strided_slice %0 {offsets = [1, 0], sizes = [1, 128], strides = [1, 1]} : vector<10x128xf32> to vector<1x128xf32>
    %cst_7 = arith.constant dense<0.000000e+00> : vector<16xf32>
    %9 = vector.multi_reduction <add>, %6, %cst_7 [1] : vector<16x128xf32> to vector<16xf32>
    %10 = vector.shape_cast %9 : vector<16xf32> to vector<16x1xf32>
    %cst_8 = arith.constant 1.280000e+02 : f32
    %11 = vector.broadcast %cst_8 : f32 to vector<16x1xf32>
    %12 = arith.divf %10, %11 : vector<16x1xf32>
    %13 = vector.broadcast %12 : vector<16x1xf32> to vector<16x128xf32>
    %14 = arith.subf %6, %13 : vector<16x128xf32>
    %15 = arith.mulf %14, %14 : vector<16x128xf32>
    %cst_9 = arith.constant dense<0.000000e+00> : vector<16xf32>
    %16 = vector.multi_reduction <add>, %15, %cst_9 [1] : vector<16x128xf32> to vector<16xf32>
    %17 = vector.shape_cast %16 : vector<16xf32> to vector<16x1xf32>
    %cst_10 = arith.constant 1.280000e+02 : f32
    %18 = vector.broadcast %cst_10 : f32 to vector<16x1xf32>
    %19 = arith.divf %17, %18 : vector<16x1xf32>
    %20 = vector.broadcast %12 : vector<16x1xf32> to vector<16x128xf32>
    %21 = arith.subf %6, %20 : vector<16x128xf32>
    %cst_11 = arith.constant 9.99999974E-6 : f32
    %22 = vector.broadcast %cst_11 : f32 to vector<16x1xf32>
    %23 = arith.addf %19, %22 : vector<16x1xf32>
    %24 = math.rsqrt %23 : vector<16x1xf32>
    %25 = vector.broadcast %24 : vector<16x1xf32> to vector<16x128xf32>
    %26 = arith.mulf %21, %25 : vector<16x128xf32>
    %27 = vector.broadcast %7 : vector<1x128xf32> to vector<16x128xf32>
    %28 = arith.mulf %26, %27 : vector<16x128xf32>
    %29 = vector.broadcast %8 : vector<1x128xf32> to vector<16x128xf32>
    %30 = arith.addf %28, %29 : vector<16x128xf32>
    %31 = tpu.iota {dimensions = array<i32: 1>} : vector<8x8xi32>
    %c5_i32 = arith.constant 5 : i32
    %32 = vector.broadcast %c5_i32 : i32 to vector<8x8xi32>
    %33 = arith.cmpi slt, %31, %32 : vector<8x8xi32>
    %cst_12 = arith.constant 0.000000e+00 : f32
    %cst_13 = arith.constant -1.000000e+09 : f32
    %34 = vector.broadcast %cst_12 : f32 to vector<8x8xf32>
    %35 = vector.broadcast %cst_13 : f32 to vector<8x8xf32>
    %36 = arith.select %33, %34, %35 : vector<8x8xi1>, vector<8x8xf32>
    %c0_14 = arith.constant 0 : index
    %c0_15 = arith.constant 0 : index
    %37 = vector.load %arg6[%c0_14, %c0_15] : memref<128x384xbf16, #tpu.memory_space<vmem>>, vector<128x384xbf16>
    %c0_16 = arith.constant 0 : index
    %c0_17 = arith.constant 0 : index
    %38 = vector.load %arg3[%c0_16, %c0_17] : memref<1x384xf32, #tpu.memory_space<vmem>>, vector<1x384xf32>
    %c0_18 = arith.constant 0 : index
    %c0_19 = arith.constant 0 : index
    %39 = vector.load %arg7[%c0_18, %c0_19] : memref<128x128xbf16, #tpu.memory_space<vmem>>, vector<128x128xbf16>
    %40 = vector.extract_strided_slice %0 {offsets = [6, 0], sizes = [1, 128], strides = [1, 1]} : vector<10x128xf32> to vector<1x128xf32>
    %c0_20 = arith.constant 0 : index
    %c0_21 = arith.constant 0 : index
    %41 = vector.load %arg8[%c0_20, %c0_21] : memref<128x512xbf16, #tpu.memory_space<vmem>>, vector<128x512xbf16>
    %c0_22 = arith.constant 0 : index
    %c0_23 = arith.constant 0 : index
    %42 = vector.load %arg4[%c0_22, %c0_23] : memref<1x512xf32, #tpu.memory_space<vmem>>, vector<1x512xf32>
    %c0_24 = arith.constant 0 : index
    %c0_25 = arith.constant 0 : index
    %43 = vector.load %arg9[%c0_24, %c0_25] : memref<512x128xbf16, #tpu.memory_space<vmem>>, vector<512x128xbf16>
    %44 = vector.extract_strided_slice %0 {offsets = [7, 0], sizes = [1, 128], strides = [1, 1]} : vector<10x128xf32> to vector<1x128xf32>
    %45 = vector.extract_strided_slice %0 {offsets = [2, 0], sizes = [1, 128], strides = [1, 1]} : vector<10x128xf32> to vector<1x128xf32>
    %46 = vector.extract_strided_slice %0 {offsets = [3, 0], sizes = [1, 128], strides = [1, 1]} : vector<10x128xf32> to vector<1x128xf32>
    %47 = vector.extract_strided_slice %0 {offsets = [4, 0], sizes = [1, 128], strides = [1, 1]} : vector<10x128xf32> to vector<1x128xf32>
    %48 = vector.extract_strided_slice %0 {offsets = [5, 0], sizes = [1, 128], strides = [1, 1]} : vector<10x128xf32> to vector<1x128xf32>
    %cst_26 = arith.constant dense<0.000000e+00> : vector<16xf32>
    %49 = vector.multi_reduction <add>, %30, %cst_26 [1] : vector<16x128xf32> to vector<16xf32>
    %50 = vector.shape_cast %49 : vector<16xf32> to vector<16x1xf32>
    %cst_27 = arith.constant 1.280000e+02 : f32
    %51 = vector.broadcast %cst_27 : f32 to vector<16x1xf32>
    %52 = arith.divf %50, %51 : vector<16x1xf32>
    %53 = vector.broadcast %52 : vector<16x1xf32> to vector<16x128xf32>
    %54 = arith.subf %30, %53 : vector<16x128xf32>
    %55 = arith.mulf %54, %54 : vector<16x128xf32>
    %cst_28 = arith.constant dense<0.000000e+00> : vector<16xf32>
    %56 = vector.multi_reduction <add>, %55, %cst_28 [1] : vector<16x128xf32> to vector<16xf32>
    %57 = vector.shape_cast %56 : vector<16xf32> to vector<16x1xf32>
    %cst_29 = arith.constant 1.280000e+02 : f32
    %58 = vector.broadcast %cst_29 : f32 to vector<16x1xf32>
    %59 = arith.divf %57, %58 : vector<16x1xf32>
    %60 = vector.broadcast %52 : vector<16x1xf32> to vector<16x128xf32>
    %61 = arith.subf %30, %60 : vector<16x128xf32>
    %cst_30 = arith.constant 9.99999974E-6 : f32
    %62 = vector.broadcast %cst_30 : f32 to vector<16x1xf32>
    %63 = arith.addf %59, %62 : vector<16x1xf32>
    %64 = math.rsqrt %63 : vector<16x1xf32>
    %65 = vector.broadcast %64 : vector<16x1xf32> to vector<16x128xf32>
    %66 = arith.mulf %61, %65 : vector<16x128xf32>
    %67 = vector.broadcast %45 : vector<1x128xf32> to vector<16x128xf32>
    %68 = arith.mulf %66, %67 : vector<16x128xf32>
    %69 = vector.broadcast %46 : vector<1x128xf32> to vector<16x128xf32>
    %70 = arith.addf %68, %69 : vector<16x128xf32>
    %71 = arith.truncf %70 : vector<16x128xf32> to vector<16x128xbf16>
    %cst_31 = arith.constant dense<0.000000e+00> : vector<16x384xf32>
    %72 = tpu.matmul %71, %37, %cst_31 {dimension_numbers = #tpu.dot_dimension_numbers<[1], [0], [0], [1], [0, 0, 1, 1], [], []>} : vector<16x128xbf16>, vector<128x384xbf16>, vector<16x384xf32> -> vector<16x384xf32>
    %73 = vector.broadcast %38 : vector<1x384xf32> to vector<16x384xf32>
    %74 = arith.addf %72, %73 : vector<16x384xf32>
    %75 = vector.extract_strided_slice %74 {offsets = [0, 0], sizes = [16, 128], strides = [1, 1]} : vector<16x384xf32> to vector<16x128xf32>
    %cst_32 = arith.constant 1.250000e-01 : f32
    %76 = vector.broadcast %cst_32 : f32 to vector<16x128xf32>
    %77 = arith.mulf %75, %76 : vector<16x128xf32>
    %78 = vector.extract_strided_slice %74 {offsets = [0, 128], sizes = [16, 128], strides = [1, 1]} : vector<16x384xf32> to vector<16x128xf32>
    %79 = vector.extract_strided_slice %74 {offsets = [0, 256], sizes = [16, 128], strides = [1, 1]} : vector<16x384xf32> to vector<16x128xf32>
    %cst_33 = arith.constant 0.000000e+00 : f32
    %80 = vector.broadcast %cst_33 : f32 to vector<8x128xf32>
    %81 = vector.extract_strided_slice %77 {offsets = [0, 0], sizes = [8, 64], strides = [1, 1]} : vector<16x128xf32> to vector<8x64xf32>
    %82 = arith.truncf %81 : vector<8x64xf32> to vector<8x64xbf16>
    %83 = vector.extract_strided_slice %78 {offsets = [0, 0], sizes = [8, 64], strides = [1, 1]} : vector<16x128xf32> to vector<8x64xf32>
    %84 = arith.truncf %83 : vector<8x64xf32> to vector<8x64xbf16>
    %85 = vector.extract_strided_slice %79 {offsets = [0, 0], sizes = [8, 64], strides = [1, 1]} : vector<16x128xf32> to vector<8x64xf32>
    %86 = arith.truncf %85 : vector<8x64xf32> to vector<8x64xbf16>
    %cst_34 = arith.constant dense<0.000000e+00> : vector<8x8xf32>
    %87 = tpu.matmul %82, %84, %cst_34 {dimension_numbers = #tpu.dot_dimension_numbers<[1], [1], [0], [0], [0, 0, 1, 0], [], []>} : vector<8x64xbf16>, vector<8x64xbf16>, vector<8x8xf32> -> vector<8x8xf32>
    %88 = arith.addf %87, %36 : vector<8x8xf32>
    %cst_35 = arith.constant dense<0xFF800000> : vector<8xf32>
    %89 = vector.multi_reduction <maximumf>, %88, %cst_35 [1] : vector<8x8xf32> to vector<8xf32>
    %90 = vector.shape_cast %89 : vector<8xf32> to vector<8x1xf32>
    %91 = vector.broadcast %90 : vector<8x1xf32> to vector<8x8xf32>
    %92 = arith.subf %88, %91 : vector<8x8xf32>
    %93 = math.exp %92 : vector<8x8xf32>
    %cst_36 = arith.constant dense<0.000000e+00> : vector<8xf32>
    %94 = vector.multi_reduction <add>, %93, %cst_36 [1] : vector<8x8xf32> to vector<8xf32>
    %95 = vector.shape_cast %94 : vector<8xf32> to vector<8x1xf32>
    %96 = tpu.reciprocal %95 {approx = true} : vector<8x1xf32> -> vector<8x1xf32>
    %97 = vector.broadcast %96 : vector<8x1xf32> to vector<8x8xf32>
    %98 = arith.mulf %93, %97 : vector<8x8xf32>
    %99 = arith.truncf %98 : vector<8x8xf32> to vector<8x8xbf16>
    %cst_37 = arith.constant dense<0.000000e+00> : vector<8x64xf32>
    %100 = tpu.matmul %99, %86, %cst_37 {dimension_numbers = #tpu.dot_dimension_numbers<[1], [0], [0], [1], [0, 0, 1, 1], [], []>} : vector<8x8xbf16>, vector<8x64xbf16>, vector<8x64xf32> -> vector<8x64xf32>
    %101 = arith.truncf %100 : vector<8x64xf32> to vector<8x64xbf16>
    %102 = vector.extract_strided_slice %39 {offsets = [0, 0], sizes = [64, 128], strides = [1, 1]} : vector<128x128xbf16> to vector<64x128xbf16>
    %cst_38 = arith.constant dense<0.000000e+00> : vector<8x128xf32>
    %103 = tpu.matmul %101, %102, %cst_38 {dimension_numbers = #tpu.dot_dimension_numbers<[1], [0], [0], [1], [0, 0, 1, 1], [], []>} : vector<8x64xbf16>, vector<64x128xbf16>, vector<8x128xf32> -> vector<8x128xf32>
    %104 = arith.addf %80, %103 : vector<8x128xf32>
    %105 = vector.extract_strided_slice %77 {offsets = [0, 64], sizes = [8, 64], strides = [1, 1]} : vector<16x128xf32> to vector<8x64xf32>
    %106 = arith.truncf %105 : vector<8x64xf32> to vector<8x64xbf16>
    %107 = vector.extract_strided_slice %78 {offsets = [0, 64], sizes = [8, 64], strides = [1, 1]} : vector<16x128xf32> to vector<8x64xf32>
    %108 = arith.truncf %107 : vector<8x64xf32> to vector<8x64xbf16>
    %109 = vector.extract_strided_slice %79 {offsets = [0, 64], sizes = [8, 64], strides = [1, 1]} : vector<16x128xf32> to vector<8x64xf32>
    %110 = arith.truncf %109 : vector<8x64xf32> to vector<8x64xbf16>
    %cst_39 = arith.constant dense<0.000000e+00> : vector<8x8xf32>
    %111 = tpu.matmul %106, %108, %cst_39 {dimension_numbers = #tpu.dot_dimension_numbers<[1], [1], [0], [0], [0, 0, 1, 0], [], []>} : vector<8x64xbf16>, vector<8x64xbf16>, vector<8x8xf32> -> vector<8x8xf32>
    %112 = arith.addf %111, %36 : vector<8x8xf32>
    %cst_40 = arith.constant dense<0xFF800000> : vector<8xf32>
    %113 = vector.multi_reduction <maximumf>, %112, %cst_40 [1] : vector<8x8xf32> to vector<8xf32>
    %114 = vector.shape_cast %113 : vector<8xf32> to vector<8x1xf32>
    %115 = vector.broadcast %114 : vector<8x1xf32> to vector<8x8xf32>
    %116 = arith.subf %112, %115 : vector<8x8xf32>
    %117 = math.exp %116 : vector<8x8xf32>
    %cst_41 = arith.constant dense<0.000000e+00> : vector<8xf32>
    %118 = vector.multi_reduction <add>, %117, %cst_41 [1] : vector<8x8xf32> to vector<8xf32>
    %119 = vector.shape_cast %118 : vector<8xf32> to vector<8x1xf32>
    %120 = tpu.reciprocal %119 {approx = true} : vector<8x1xf32> -> vector<8x1xf32>
    %121 = vector.broadcast %120 : vector<8x1xf32> to vector<8x8xf32>
    %122 = arith.mulf %117, %121 : vector<8x8xf32>
    %123 = arith.truncf %122 : vector<8x8xf32> to vector<8x8xbf16>
    %cst_42 = arith.constant dense<0.000000e+00> : vector<8x64xf32>
    %124 = tpu.matmul %123, %110, %cst_42 {dimension_numbers = #tpu.dot_dimension_numbers<[1], [0], [0], [1], [0, 0, 1, 1], [], []>} : vector<8x8xbf16>, vector<8x64xbf16>, vector<8x64xf32> -> vector<8x64xf32>
    %125 = arith.truncf %124 : vector<8x64xf32> to vector<8x64xbf16>
    %126 = vector.extract_strided_slice %39 {offsets = [64, 0], sizes = [64, 128], strides = [1, 1]} : vector<128x128xbf16> to vector<64x128xbf16>
    %cst_43 = arith.constant dense<0.000000e+00> : vector<8x128xf32>
    %127 = tpu.matmul %125, %126, %cst_43 {dimension_numbers = #tpu.dot_dimension_numbers<[1], [0], [0], [1], [0, 0, 1, 1], [], []>} : vector<8x64xbf16>, vector<64x128xbf16>, vector<8x128xf32> -> vector<8x128xf32>
    %128 = arith.addf %104, %127 : vector<8x128xf32>
    %cst_44 = arith.constant 0.000000e+00 : f32
    %129 = vector.broadcast %cst_44 : f32 to vector<8x128xf32>
    %130 = vector.extract_strided_slice %77 {offsets = [8, 0], sizes = [8, 64], strides = [1, 1]} : vector<16x128xf32> to vector<8x64xf32>
    %131 = arith.truncf %130 : vector<8x64xf32> to vector<8x64xbf16>
    %132 = vector.extract_strided_slice %78 {offsets = [8, 0], sizes = [8, 64], strides = [1, 1]} : vector<16x128xf32> to vector<8x64xf32>
    %133 = arith.truncf %132 : vector<8x64xf32> to vector<8x64xbf16>
    %134 = vector.extract_strided_slice %79 {offsets = [8, 0], sizes = [8, 64], strides = [1, 1]} : vector<16x128xf32> to vector<8x64xf32>
    %135 = arith.truncf %134 : vector<8x64xf32> to vector<8x64xbf16>
    %cst_45 = arith.constant dense<0.000000e+00> : vector<8x8xf32>
    %136 = tpu.matmul %131, %133, %cst_45 {dimension_numbers = #tpu.dot_dimension_numbers<[1], [1], [0], [0], [0, 0, 1, 0], [], []>} : vector<8x64xbf16>, vector<8x64xbf16>, vector<8x8xf32> -> vector<8x8xf32>
    %137 = arith.addf %136, %36 : vector<8x8xf32>
    %cst_46 = arith.constant dense<0xFF800000> : vector<8xf32>
    %138 = vector.multi_reduction <maximumf>, %137, %cst_46 [1] : vector<8x8xf32> to vector<8xf32>
    %139 = vector.shape_cast %138 : vector<8xf32> to vector<8x1xf32>
    %140 = vector.broadcast %139 : vector<8x1xf32> to vector<8x8xf32>
    %141 = arith.subf %137, %140 : vector<8x8xf32>
    %142 = math.exp %141 : vector<8x8xf32>
    %cst_47 = arith.constant dense<0.000000e+00> : vector<8xf32>
    %143 = vector.multi_reduction <add>, %142, %cst_47 [1] : vector<8x8xf32> to vector<8xf32>
    %144 = vector.shape_cast %143 : vector<8xf32> to vector<8x1xf32>
    %145 = tpu.reciprocal %144 {approx = true} : vector<8x1xf32> -> vector<8x1xf32>
    %146 = vector.broadcast %145 : vector<8x1xf32> to vector<8x8xf32>
    %147 = arith.mulf %142, %146 : vector<8x8xf32>
    %148 = arith.truncf %147 : vector<8x8xf32> to vector<8x8xbf16>
    %cst_48 = arith.constant dense<0.000000e+00> : vector<8x64xf32>
    %149 = tpu.matmul %148, %135, %cst_48 {dimension_numbers = #tpu.dot_dimension_numbers<[1], [0], [0], [1], [0, 0, 1, 1], [], []>} : vector<8x8xbf16>, vector<8x64xbf16>, vector<8x64xf32> -> vector<8x64xf32>
    %150 = arith.truncf %149 : vector<8x64xf32> to vector<8x64xbf16>
    %151 = vector.extract_strided_slice %39 {offsets = [0, 0], sizes = [64, 128], strides = [1, 1]} : vector<128x128xbf16> to vector<64x128xbf16>
    %cst_49 = arith.constant dense<0.000000e+00> : vector<8x128xf32>
    %152 = tpu.matmul %150, %151, %cst_49 {dimension_numbers = #tpu.dot_dimension_numbers<[1], [0], [0], [1], [0, 0, 1, 1], [], []>} : vector<8x64xbf16>, vector<64x128xbf16>, vector<8x128xf32> -> vector<8x128xf32>
    %153 = arith.addf %129, %152 : vector<8x128xf32>
    %154 = vector.extract_strided_slice %77 {offsets = [8, 64], sizes = [8, 64], strides = [1, 1]} : vector<16x128xf32> to vector<8x64xf32>
    %155 = arith.truncf %154 : vector<8x64xf32> to vector<8x64xbf16>
    %156 = vector.extract_strided_slice %78 {offsets = [8, 64], sizes = [8, 64], strides = [1, 1]} : vector<16x128xf32> to vector<8x64xf32>
    %157 = arith.truncf %156 : vector<8x64xf32> to vector<8x64xbf16>
    %158 = vector.extract_strided_slice %79 {offsets = [8, 64], sizes = [8, 64], strides = [1, 1]} : vector<16x128xf32> to vector<8x64xf32>
    %159 = arith.truncf %158 : vector<8x64xf32> to vector<8x64xbf16>
    %cst_50 = arith.constant dense<0.000000e+00> : vector<8x8xf32>
    %160 = tpu.matmul %155, %157, %cst_50 {dimension_numbers = #tpu.dot_dimension_numbers<[1], [1], [0], [0], [0, 0, 1, 0], [], []>} : vector<8x64xbf16>, vector<8x64xbf16>, vector<8x8xf32> -> vector<8x8xf32>
    %161 = arith.addf %160, %36 : vector<8x8xf32>
    %cst_51 = arith.constant dense<0xFF800000> : vector<8xf32>
    %162 = vector.multi_reduction <maximumf>, %161, %cst_51 [1] : vector<8x8xf32> to vector<8xf32>
    %163 = vector.shape_cast %162 : vector<8xf32> to vector<8x1xf32>
    %164 = vector.broadcast %163 : vector<8x1xf32> to vector<8x8xf32>
    %165 = arith.subf %161, %164 : vector<8x8xf32>
    %166 = math.exp %165 : vector<8x8xf32>
    %cst_52 = arith.constant dense<0.000000e+00> : vector<8xf32>
    %167 = vector.multi_reduction <add>, %166, %cst_52 [1] : vector<8x8xf32> to vector<8xf32>
    %168 = vector.shape_cast %167 : vector<8xf32> to vector<8x1xf32>
    %169 = tpu.reciprocal %168 {approx = true} : vector<8x1xf32> -> vector<8x1xf32>
    %170 = vector.broadcast %169 : vector<8x1xf32> to vector<8x8xf32>
    %171 = arith.mulf %166, %170 : vector<8x8xf32>
    %172 = arith.truncf %171 : vector<8x8xf32> to vector<8x8xbf16>
    %cst_53 = arith.constant dense<0.000000e+00> : vector<8x64xf32>
    %173 = tpu.matmul %172, %159, %cst_53 {dimension_numbers = #tpu.dot_dimension_numbers<[1], [0], [0], [1], [0, 0, 1, 1], [], []>} : vector<8x8xbf16>, vector<8x64xbf16>, vector<8x64xf32> -> vector<8x64xf32>
    %174 = arith.truncf %173 : vector<8x64xf32> to vector<8x64xbf16>
    %175 = vector.extract_strided_slice %39 {offsets = [64, 0], sizes = [64, 128], strides = [1, 1]} : vector<128x128xbf16> to vector<64x128xbf16>
    %cst_54 = arith.constant dense<0.000000e+00> : vector<8x128xf32>
    %176 = tpu.matmul %174, %175, %cst_54 {dimension_numbers = #tpu.dot_dimension_numbers<[1], [0], [0], [1], [0, 0, 1, 1], [], []>} : vector<8x64xbf16>, vector<64x128xbf16>, vector<8x128xf32> -> vector<8x128xf32>
    %177 = arith.addf %153, %176 : vector<8x128xf32>
    %178 = tpu.concatenate %128, %177 in 0 : vector<8x128xf32>, vector<8x128xf32> -> vector<16x128xf32>
    %179 = vector.broadcast %40 : vector<1x128xf32> to vector<16x128xf32>
    %180 = arith.addf %178, %179 : vector<16x128xf32>
    %181 = arith.addf %30, %180 : vector<16x128xf32>
    %cst_55 = arith.constant dense<0.000000e+00> : vector<16xf32>
    %182 = vector.multi_reduction <add>, %181, %cst_55 [1] : vector<16x128xf32> to vector<16xf32>
    %183 = vector.shape_cast %182 : vector<16xf32> to vector<16x1xf32>
    %cst_56 = arith.constant 1.280000e+02 : f32
    %184 = vector.broadcast %cst_56 : f32 to vector<16x1xf32>
    %185 = arith.divf %183, %184 : vector<16x1xf32>
    %186 = vector.broadcast %185 : vector<16x1xf32> to vector<16x128xf32>
    %187 = arith.subf %181, %186 : vector<16x128xf32>
    %188 = arith.mulf %187, %187 : vector<16x128xf32>
    %cst_57 = arith.constant dense<0.000000e+00> : vector<16xf32>
    %189 = vector.multi_reduction <add>, %188, %cst_57 [1] : vector<16x128xf32> to vector<16xf32>
    %190 = vector.shape_cast %189 : vector<16xf32> to vector<16x1xf32>
    %cst_58 = arith.constant 1.280000e+02 : f32
    %191 = vector.broadcast %cst_58 : f32 to vector<16x1xf32>
    %192 = arith.divf %190, %191 : vector<16x1xf32>
    %193 = vector.broadcast %185 : vector<16x1xf32> to vector<16x128xf32>
    %194 = arith.subf %181, %193 : vector<16x128xf32>
    %cst_59 = arith.constant 9.99999974E-6 : f32
    %195 = vector.broadcast %cst_59 : f32 to vector<16x1xf32>
    %196 = arith.addf %192, %195 : vector<16x1xf32>
    %197 = math.rsqrt %196 : vector<16x1xf32>
    %198 = vector.broadcast %197 : vector<16x1xf32> to vector<16x128xf32>
    %199 = arith.mulf %194, %198 : vector<16x128xf32>
    %200 = vector.broadcast %47 : vector<1x128xf32> to vector<16x128xf32>
    %201 = arith.mulf %199, %200 : vector<16x128xf32>
    %202 = vector.broadcast %48 : vector<1x128xf32> to vector<16x128xf32>
    %203 = arith.addf %201, %202 : vector<16x128xf32>
    %204 = arith.truncf %203 : vector<16x128xf32> to vector<16x128xbf16>
    %cst_60 = arith.constant dense<0.000000e+00> : vector<16x512xf32>
    %205 = tpu.matmul %204, %41, %cst_60 {dimension_numbers = #tpu.dot_dimension_numbers<[1], [0], [0], [1], [0, 0, 1, 1], [], []>} : vector<16x128xbf16>, vector<128x512xbf16>, vector<16x512xf32> -> vector<16x512xf32>
    %206 = vector.broadcast %42 : vector<1x512xf32> to vector<16x512xf32>
    %207 = arith.addf %205, %206 : vector<16x512xf32>
    %cst_61 = arith.constant 1.702000e+00 : f32
    %208 = vector.broadcast %cst_61 : f32 to vector<16x512xf32>
    %209 = arith.mulf %208, %207 : vector<16x512xf32>
    %210 = arith.negf %209 : vector<16x512xf32>
    %211 = math.exp %210 : vector<16x512xf32>
    %cst_62 = arith.constant 1.000000e+00 : f32
    %212 = vector.broadcast %cst_62 : f32 to vector<16x512xf32>
    %213 = arith.addf %212, %211 : vector<16x512xf32>
    %214 = arith.divf %212, %213 : vector<16x512xf32>
    %215 = arith.mulf %207, %214 : vector<16x512xf32>
    %216 = arith.truncf %215 : vector<16x512xf32> to vector<16x512xbf16>
    %cst_63 = arith.constant dense<0.000000e+00> : vector<16x128xf32>
    %217 = tpu.matmul %216, %43, %cst_63 {dimension_numbers = #tpu.dot_dimension_numbers<[1], [0], [0], [1], [0, 0, 1, 1], [], []>} : vector<16x512xbf16>, vector<512x128xbf16>, vector<16x128xf32> -> vector<16x128xf32>
    %218 = vector.broadcast %44 : vector<1x128xf32> to vector<16x128xf32>
    %219 = arith.addf %217, %218 : vector<16x128xf32>
    %220 = arith.addf %181, %219 : vector<16x128xf32>
    %221 = tpu.iota {dimensions = array<i32: 0>} : vector<2x16xi32>
    %222 = tpu.iota {dimensions = array<i32: 1>} : vector<2x16xi32>
    %c8_i32 = arith.constant 8 : i32
    %223 = vector.broadcast %c8_i32 : i32 to vector<2x16xi32>
    %224 = arith.muli %221, %223 : vector<2x16xi32>
    %225 = arith.cmpi eq, %222, %224 : vector<2x16xi32>
    %226 = arith.extui %225 : vector<2x16xi1> to vector<2x16xi32>
    %227 = arith.sitofp %226 : vector<2x16xi32> to vector<2x16xf32>
    %cst_64 = arith.constant dense<0.000000e+00> : vector<2x128xf32>
    %228 = tpu.matmul %227, %220, %cst_64 {dimension_numbers = #tpu.dot_dimension_numbers<[1], [0], [0], [1], [0, 0, 1, 1], [], []>} : vector<2x16xf32>, vector<16x128xf32>, vector<2x128xf32> -> vector<2x128xf32>
    %229 = vector.extract_strided_slice %0 {offsets = [8, 0], sizes = [1, 128], strides = [1, 1]} : vector<10x128xf32> to vector<1x128xf32>
    %230 = vector.extract_strided_slice %0 {offsets = [9, 0], sizes = [1, 128], strides = [1, 1]} : vector<10x128xf32> to vector<1x128xf32>
    %cst_65 = arith.constant dense<0.000000e+00> : vector<2xf32>
    %231 = vector.multi_reduction <add>, %228, %cst_65 [1] : vector<2x128xf32> to vector<2xf32>
    %232 = vector.shape_cast %231 : vector<2xf32> to vector<2x1xf32>
    %cst_66 = arith.constant 1.280000e+02 : f32
    %233 = vector.broadcast %cst_66 : f32 to vector<2x1xf32>
    %234 = arith.divf %232, %233 : vector<2x1xf32>
    %235 = vector.broadcast %234 : vector<2x1xf32> to vector<2x128xf32>
    %236 = arith.subf %228, %235 : vector<2x128xf32>
    %237 = arith.mulf %236, %236 : vector<2x128xf32>
    %cst_67 = arith.constant dense<0.000000e+00> : vector<2xf32>
    %238 = vector.multi_reduction <add>, %237, %cst_67 [1] : vector<2x128xf32> to vector<2xf32>
    %239 = vector.shape_cast %238 : vector<2xf32> to vector<2x1xf32>
    %cst_68 = arith.constant 1.280000e+02 : f32
    %240 = vector.broadcast %cst_68 : f32 to vector<2x1xf32>
    %241 = arith.divf %239, %240 : vector<2x1xf32>
    %242 = vector.broadcast %234 : vector<2x1xf32> to vector<2x128xf32>
    %243 = arith.subf %228, %242 : vector<2x128xf32>
    %cst_69 = arith.constant 9.99999974E-6 : f32
    %244 = vector.broadcast %cst_69 : f32 to vector<2x1xf32>
    %245 = arith.addf %241, %244 : vector<2x1xf32>
    %246 = math.rsqrt %245 : vector<2x1xf32>
    %247 = vector.broadcast %246 : vector<2x1xf32> to vector<2x128xf32>
    %248 = arith.mulf %243, %247 : vector<2x128xf32>
    %249 = vector.broadcast %229 : vector<1x128xf32> to vector<2x128xf32>
    %250 = arith.mulf %248, %249 : vector<2x128xf32>
    %251 = vector.broadcast %230 : vector<1x128xf32> to vector<2x128xf32>
    %252 = arith.addf %250, %251 : vector<2x128xf32>
    %253 = arith.truncf %252 : vector<2x128xf32> to vector<2x128xbf16>
    %c0_70 = arith.constant 0 : index
    %c0_71 = arith.constant 0 : index
    %254 = vector.load %arg10[%c0_70, %c0_71] : memref<128x128xbf16, #tpu.memory_space<vmem>>, vector<128x128xbf16>
    %cst_72 = arith.constant dense<0.000000e+00> : vector<2x128xf32>
    %255 = tpu.matmul %253, %254, %cst_72 {dimension_numbers = #tpu.dot_dimension_numbers<[1], [0], [0], [1], [0, 0, 1, 1], [], []>} : vector<2x128xbf16>, vector<128x128xbf16>, vector<2x128xf32> -> vector<2x128xf32>
    %256 = arith.mulf %255, %255 : vector<2x128xf32>
    %cst_73 = arith.constant dense<0.000000e+00> : vector<2xf32>
    %257 = vector.multi_reduction <add>, %256, %cst_73 [1] : vector<2x128xf32> to vector<2xf32>
    %258 = vector.shape_cast %257 : vector<2xf32> to vector<2x1xf32>
    %cst_74 = arith.constant 9.99999996E-13 : f32
    %259 = vector.broadcast %cst_74 : f32 to vector<2x1xf32>
    %260 = arith.maximumf %258, %259 : vector<2x1xf32>
    %261 = math.rsqrt %260 : vector<2x1xf32>
    %262 = vector.broadcast %261 : vector<2x1xf32> to vector<2x128xf32>
    %263 = arith.mulf %255, %262 : vector<2x128xf32>
    %c0_75 = arith.constant 0 : index
    %c0_76 = arith.constant 0 : index
    %264 = vector.load %arg11[%c0_75, %c0_76] : memref<2x128xf32, #tpu.memory_space<vmem>>, vector<2x128xf32>
    tpu.vector_store %arg11[%c0_75, %c0_76], %263 {strides = array<i32>} : memref<2x128xf32, #tpu.memory_space<vmem>>, vector<2x128xf32>,
    return
  }
}

module attributes {stable_mosaic.version = 11 : i64} {
  func.func @_text_classifier_kernel(%arg0: memref<16x128xf32, #tpu.memory_space<vmem>>, %arg1: memref<2x8xf32, #tpu.memory_space<vmem>>, %arg2: memref<2x16xf32, #tpu.memory_space<vmem>>, %arg3: memref<2x128xf32, #tpu.memory_space<vmem>>, %arg4: memref<8x128xf32, #tpu.memory_space<vmem>>, %arg5: memref<1x384xf32, #tpu.memory_space<vmem>>, %arg6: memref<1x512xf32, #tpu.memory_space<vmem>>, %arg7: memref<128x384xbf16, #tpu.memory_space<vmem>>, %arg8: memref<128x128xbf16, #tpu.memory_space<vmem>>, %arg9: memref<128x512xbf16, #tpu.memory_space<vmem>>, %arg10: memref<512x128xbf16, #tpu.memory_space<vmem>>, %arg11: memref<128x128xbf16, #tpu.memory_space<vmem>>, %arg12: memref<128x768xbf16, #tpu.memory_space<vmem>>, %arg13: memref<3x768xf32, #tpu.memory_space<vmem>>, %arg14: memref<768x512xbf16, #tpu.memory_space<vmem>>, %arg15: memref<3x512xf32, #tpu.memory_space<vmem>>, %arg16: memref<512x128xbf16, #tpu.memory_space<vmem>>, %arg17: memref<1x128xf32, #tpu.memory_space<vmem>>, %arg18: memref<2x128xf32, #tpu.memory_space<vmem>>, %arg19: memref<2x128xf32, #tpu.memory_space<vmem>>, %arg20: memref<2x128xf32, #tpu.memory_space<vmem>>) attributes {dimension_semantics = [], scalar_prefetch = 0 : i64, scratch_operands = 0 : i64, tpu.core_type = #tpu.core_type<tc>} {
    %c0 = arith.constant 0 : index
    %c0_0 = arith.constant 0 : index
    %0 = vector.load %arg4[%c0, %c0_0] : memref<8x128xf32, #tpu.memory_space<vmem>>, vector<8x128xf32>
    %c0_1 = arith.constant 0 : index
    %c0_2 = arith.constant 0 : index
    %1 = vector.load %arg0[%c0_1, %c0_2] : memref<16x128xf32, #tpu.memory_space<vmem>>, vector<16x128xf32>
    %2 = tpu.iota {dimensions = array<i32: 0>} : vector<8x8xi32>
    %3 = tpu.iota {dimensions = array<i32: 1>} : vector<8x8xi32>
    %4 = arith.cmpi sle, %3, %2 : vector<8x8xi32>
    %c0_3 = arith.constant 0 : index
    %c0_4 = arith.constant 0 : index
    %5 = vector.load %arg1[%c0_3, %c0_4] : memref<2x8xf32, #tpu.memory_space<vmem>>, vector<2x8xf32>
    %6 = vector.extract_strided_slice %5 {offsets = [0, 0], sizes = [1, 8], strides = [1, 1]} : vector<2x8xf32> to vector<1x8xf32>
    %cst = arith.constant 0.000000e+00 : f32
    %7 = vector.broadcast %cst : f32 to vector<1x8xf32>
    %8 = arith.cmpf ogt, %6, %7 : vector<1x8xf32>
    %9 = vector.broadcast %8 : vector<1x8xi1> to vector<8x8xi1>
    %10 = arith.andi %4, %9 : vector<8x8xi1>
    %cst_5 = arith.constant 0.000000e+00 : f32
    %cst_6 = arith.constant -1.000000e+09 : f32
    %11 = vector.broadcast %cst_5 : f32 to vector<8x8xf32>
    %12 = vector.broadcast %cst_6 : f32 to vector<8x8xf32>
    %13 = arith.select %10, %11, %12 : vector<8x8xi1>, vector<8x8xf32>
    %14 = vector.extract_strided_slice %5 {offsets = [1, 0], sizes = [1, 8], strides = [1, 1]} : vector<2x8xf32> to vector<1x8xf32>
    %cst_7 = arith.constant 0.000000e+00 : f32
    %15 = vector.broadcast %cst_7 : f32 to vector<1x8xf32>
    %16 = arith.cmpf ogt, %14, %15 : vector<1x8xf32>
    %17 = vector.broadcast %16 : vector<1x8xi1> to vector<8x8xi1>
    %18 = arith.andi %4, %17 : vector<8x8xi1>
    %cst_8 = arith.constant 0.000000e+00 : f32
    %cst_9 = arith.constant -1.000000e+09 : f32
    %19 = vector.broadcast %cst_8 : f32 to vector<8x8xf32>
    %20 = vector.broadcast %cst_9 : f32 to vector<8x8xf32>
    %21 = arith.select %18, %19, %20 : vector<8x8xi1>, vector<8x8xf32>
    %c0_10 = arith.constant 0 : index
    %c0_11 = arith.constant 0 : index
    %22 = vector.load %arg7[%c0_10, %c0_11] : memref<128x384xbf16, #tpu.memory_space<vmem>>, vector<128x384xbf16>
    %c0_12 = arith.constant 0 : index
    %c0_13 = arith.constant 0 : index
    %23 = vector.load %arg5[%c0_12, %c0_13] : memref<1x384xf32, #tpu.memory_space<vmem>>, vector<1x384xf32>
    %c0_14 = arith.constant 0 : index
    %c0_15 = arith.constant 0 : index
    %24 = vector.load %arg8[%c0_14, %c0_15] : memref<128x128xbf16, #tpu.memory_space<vmem>>, vector<128x128xbf16>
    %25 = vector.extract_strided_slice %0 {offsets = [4, 0], sizes = [1, 128], strides = [1, 1]} : vector<8x128xf32> to vector<1x128xf32>
    %c0_16 = arith.constant 0 : index
    %c0_17 = arith.constant 0 : index
    %26 = vector.load %arg9[%c0_16, %c0_17] : memref<128x512xbf16, #tpu.memory_space<vmem>>, vector<128x512xbf16>
    %c0_18 = arith.constant 0 : index
    %c0_19 = arith.constant 0 : index
    %27 = vector.load %arg6[%c0_18, %c0_19] : memref<1x512xf32, #tpu.memory_space<vmem>>, vector<1x512xf32>
    %c0_20 = arith.constant 0 : index
    %c0_21 = arith.constant 0 : index
    %28 = vector.load %arg10[%c0_20, %c0_21] : memref<512x128xbf16, #tpu.memory_space<vmem>>, vector<512x128xbf16>
    %29 = vector.extract_strided_slice %0 {offsets = [5, 0], sizes = [1, 128], strides = [1, 1]} : vector<8x128xf32> to vector<1x128xf32>
    %30 = vector.extract_strided_slice %0 {offsets = [0, 0], sizes = [1, 128], strides = [1, 1]} : vector<8x128xf32> to vector<1x128xf32>
    %31 = vector.extract_strided_slice %0 {offsets = [1, 0], sizes = [1, 128], strides = [1, 1]} : vector<8x128xf32> to vector<1x128xf32>
    %32 = vector.extract_strided_slice %0 {offsets = [2, 0], sizes = [1, 128], strides = [1, 1]} : vector<8x128xf32> to vector<1x128xf32>
    %33 = vector.extract_strided_slice %0 {offsets = [3, 0], sizes = [1, 128], strides = [1, 1]} : vector<8x128xf32> to vector<1x128xf32>
    %cst_22 = arith.constant dense<0.000000e+00> : vector<16xf32>
    %34 = vector.multi_reduction <add>, %1, %cst_22 [1] : vector<16x128xf32> to vector<16xf32>
    %35 = vector.shape_cast %34 : vector<16xf32> to vector<16x1xf32>
    %cst_23 = arith.constant 1.280000e+02 : f32
    %36 = vector.broadcast %cst_23 : f32 to vector<16x1xf32>
    %37 = arith.divf %35, %36 : vector<16x1xf32>
    %38 = vector.broadcast %37 : vector<16x1xf32> to vector<16x128xf32>
    %39 = arith.subf %1, %38 : vector<16x128xf32>
    %40 = arith.mulf %39, %39 : vector<16x128xf32>
    %cst_24 = arith.constant dense<0.000000e+00> : vector<16xf32>
    %41 = vector.multi_reduction <add>, %40, %cst_24 [1] : vector<16x128xf32> to vector<16xf32>
    %42 = vector.shape_cast %41 : vector<16xf32> to vector<16x1xf32>
    %cst_25 = arith.constant 1.280000e+02 : f32
    %43 = vector.broadcast %cst_25 : f32 to vector<16x1xf32>
    %44 = arith.divf %42, %43 : vector<16x1xf32>
    %45 = vector.broadcast %37 : vector<16x1xf32> to vector<16x128xf32>
    %46 = arith.subf %1, %45 : vector<16x128xf32>
    %cst_26 = arith.constant 9.99999974E-6 : f32
    %47 = vector.broadcast %cst_26 : f32 to vector<16x1xf32>
    %48 = arith.addf %44, %47 : vector<16x1xf32>
    %49 = math.rsqrt %48 : vector<16x1xf32>
    %50 = vector.broadcast %49 : vector<16x1xf32> to vector<16x128xf32>
    %51 = arith.mulf %46, %50 : vector<16x128xf32>
    %52 = vector.broadcast %30 : vector<1x128xf32> to vector<16x128xf32>
    %53 = arith.mulf %51, %52 : vector<16x128xf32>
    %54 = vector.broadcast %31 : vector<1x128xf32> to vector<16x128xf32>
    %55 = arith.addf %53, %54 : vector<16x128xf32>
    %56 = arith.truncf %55 : vector<16x128xf32> to vector<16x128xbf16>
    %cst_27 = arith.constant dense<0.000000e+00> : vector<16x384xf32>
    %57 = tpu.matmul %56, %22, %cst_27 {dimension_numbers = #tpu.dot_dimension_numbers<[1], [0], [0], [1], [0, 0, 1, 1], [], []>} : vector<16x128xbf16>, vector<128x384xbf16>, vector<16x384xf32> -> vector<16x384xf32>
    %58 = vector.broadcast %23 : vector<1x384xf32> to vector<16x384xf32>
    %59 = arith.addf %57, %58 : vector<16x384xf32>
    %60 = vector.extract_strided_slice %59 {offsets = [0, 0], sizes = [16, 128], strides = [1, 1]} : vector<16x384xf32> to vector<16x128xf32>
    %cst_28 = arith.constant 1.250000e-01 : f32
    %61 = vector.broadcast %cst_28 : f32 to vector<16x128xf32>
    %62 = arith.mulf %60, %61 : vector<16x128xf32>
    %63 = vector.extract_strided_slice %59 {offsets = [0, 128], sizes = [16, 128], strides = [1, 1]} : vector<16x384xf32> to vector<16x128xf32>
    %64 = vector.extract_strided_slice %59 {offsets = [0, 256], sizes = [16, 128], strides = [1, 1]} : vector<16x384xf32> to vector<16x128xf32>
    %cst_29 = arith.constant 0.000000e+00 : f32
    %65 = vector.broadcast %cst_29 : f32 to vector<8x128xf32>
    %66 = vector.extract_strided_slice %62 {offsets = [0, 0], sizes = [8, 64], strides = [1, 1]} : vector<16x128xf32> to vector<8x64xf32>
    %67 = arith.truncf %66 : vector<8x64xf32> to vector<8x64xbf16>
    %68 = vector.extract_strided_slice %63 {offsets = [0, 0], sizes = [8, 64], strides = [1, 1]} : vector<16x128xf32> to vector<8x64xf32>
    %69 = arith.truncf %68 : vector<8x64xf32> to vector<8x64xbf16>
    %70 = vector.extract_strided_slice %64 {offsets = [0, 0], sizes = [8, 64], strides = [1, 1]} : vector<16x128xf32> to vector<8x64xf32>
    %71 = arith.truncf %70 : vector<8x64xf32> to vector<8x64xbf16>
    %cst_30 = arith.constant dense<0.000000e+00> : vector<8x8xf32>
    %72 = tpu.matmul %67, %69, %cst_30 {dimension_numbers = #tpu.dot_dimension_numbers<[1], [1], [0], [0], [0, 0, 1, 0], [], []>} : vector<8x64xbf16>, vector<8x64xbf16>, vector<8x8xf32> -> vector<8x8xf32>
    %73 = arith.addf %72, %13 : vector<8x8xf32>
    %cst_31 = arith.constant dense<0xFF800000> : vector<8xf32>
    %74 = vector.multi_reduction <maximumf>, %73, %cst_31 [1] : vector<8x8xf32> to vector<8xf32>
    %75 = vector.shape_cast %74 : vector<8xf32> to vector<8x1xf32>
    %76 = vector.broadcast %75 : vector<8x1xf32> to vector<8x8xf32>
    %77 = arith.subf %73, %76 : vector<8x8xf32>
    %78 = math.exp %77 : vector<8x8xf32>
    %cst_32 = arith.constant dense<0.000000e+00> : vector<8xf32>
    %79 = vector.multi_reduction <add>, %78, %cst_32 [1] : vector<8x8xf32> to vector<8xf32>
    %80 = vector.shape_cast %79 : vector<8xf32> to vector<8x1xf32>
    %81 = tpu.reciprocal %80 {approx = true} : vector<8x1xf32> -> vector<8x1xf32>
    %82 = vector.broadcast %81 : vector<8x1xf32> to vector<8x8xf32>
    %83 = arith.mulf %78, %82 : vector<8x8xf32>
    %84 = arith.truncf %83 : vector<8x8xf32> to vector<8x8xbf16>
    %cst_33 = arith.constant dense<0.000000e+00> : vector<8x64xf32>
    %85 = tpu.matmul %84, %71, %cst_33 {dimension_numbers = #tpu.dot_dimension_numbers<[1], [0], [0], [1], [0, 0, 1, 1], [], []>} : vector<8x8xbf16>, vector<8x64xbf16>, vector<8x64xf32> -> vector<8x64xf32>
    %86 = arith.truncf %85 : vector<8x64xf32> to vector<8x64xbf16>
    %87 = vector.extract_strided_slice %24 {offsets = [0, 0], sizes = [64, 128], strides = [1, 1]} : vector<128x128xbf16> to vector<64x128xbf16>
    %cst_34 = arith.constant dense<0.000000e+00> : vector<8x128xf32>
    %88 = tpu.matmul %86, %87, %cst_34 {dimension_numbers = #tpu.dot_dimension_numbers<[1], [0], [0], [1], [0, 0, 1, 1], [], []>} : vector<8x64xbf16>, vector<64x128xbf16>, vector<8x128xf32> -> vector<8x128xf32>
    %89 = arith.addf %65, %88 : vector<8x128xf32>
    %90 = vector.extract_strided_slice %62 {offsets = [0, 64], sizes = [8, 64], strides = [1, 1]} : vector<16x128xf32> to vector<8x64xf32>
    %91 = arith.truncf %90 : vector<8x64xf32> to vector<8x64xbf16>
    %92 = vector.extract_strided_slice %63 {offsets = [0, 64], sizes = [8, 64], strides = [1, 1]} : vector<16x128xf32> to vector<8x64xf32>
    %93 = arith.truncf %92 : vector<8x64xf32> to vector<8x64xbf16>
    %94 = vector.extract_strided_slice %64 {offsets = [0, 64], sizes = [8, 64], strides = [1, 1]} : vector<16x128xf32> to vector<8x64xf32>
    %95 = arith.truncf %94 : vector<8x64xf32> to vector<8x64xbf16>
    %cst_35 = arith.constant dense<0.000000e+00> : vector<8x8xf32>
    %96 = tpu.matmul %91, %93, %cst_35 {dimension_numbers = #tpu.dot_dimension_numbers<[1], [1], [0], [0], [0, 0, 1, 0], [], []>} : vector<8x64xbf16>, vector<8x64xbf16>, vector<8x8xf32> -> vector<8x8xf32>
    %97 = arith.addf %96, %13 : vector<8x8xf32>
    %cst_36 = arith.constant dense<0xFF800000> : vector<8xf32>
    %98 = vector.multi_reduction <maximumf>, %97, %cst_36 [1] : vector<8x8xf32> to vector<8xf32>
    %99 = vector.shape_cast %98 : vector<8xf32> to vector<8x1xf32>
    %100 = vector.broadcast %99 : vector<8x1xf32> to vector<8x8xf32>
    %101 = arith.subf %97, %100 : vector<8x8xf32>
    %102 = math.exp %101 : vector<8x8xf32>
    %cst_37 = arith.constant dense<0.000000e+00> : vector<8xf32>
    %103 = vector.multi_reduction <add>, %102, %cst_37 [1] : vector<8x8xf32> to vector<8xf32>
    %104 = vector.shape_cast %103 : vector<8xf32> to vector<8x1xf32>
    %105 = tpu.reciprocal %104 {approx = true} : vector<8x1xf32> -> vector<8x1xf32>
    %106 = vector.broadcast %105 : vector<8x1xf32> to vector<8x8xf32>
    %107 = arith.mulf %102, %106 : vector<8x8xf32>
    %108 = arith.truncf %107 : vector<8x8xf32> to vector<8x8xbf16>
    %cst_38 = arith.constant dense<0.000000e+00> : vector<8x64xf32>
    %109 = tpu.matmul %108, %95, %cst_38 {dimension_numbers = #tpu.dot_dimension_numbers<[1], [0], [0], [1], [0, 0, 1, 1], [], []>} : vector<8x8xbf16>, vector<8x64xbf16>, vector<8x64xf32> -> vector<8x64xf32>
    %110 = arith.truncf %109 : vector<8x64xf32> to vector<8x64xbf16>
    %111 = vector.extract_strided_slice %24 {offsets = [64, 0], sizes = [64, 128], strides = [1, 1]} : vector<128x128xbf16> to vector<64x128xbf16>
    %cst_39 = arith.constant dense<0.000000e+00> : vector<8x128xf32>
    %112 = tpu.matmul %110, %111, %cst_39 {dimension_numbers = #tpu.dot_dimension_numbers<[1], [0], [0], [1], [0, 0, 1, 1], [], []>} : vector<8x64xbf16>, vector<64x128xbf16>, vector<8x128xf32> -> vector<8x128xf32>
    %113 = arith.addf %89, %112 : vector<8x128xf32>
    %cst_40 = arith.constant 0.000000e+00 : f32
    %114 = vector.broadcast %cst_40 : f32 to vector<8x128xf32>
    %115 = vector.extract_strided_slice %62 {offsets = [8, 0], sizes = [8, 64], strides = [1, 1]} : vector<16x128xf32> to vector<8x64xf32>
    %116 = arith.truncf %115 : vector<8x64xf32> to vector<8x64xbf16>
    %117 = vector.extract_strided_slice %63 {offsets = [8, 0], sizes = [8, 64], strides = [1, 1]} : vector<16x128xf32> to vector<8x64xf32>
    %118 = arith.truncf %117 : vector<8x64xf32> to vector<8x64xbf16>
    %119 = vector.extract_strided_slice %64 {offsets = [8, 0], sizes = [8, 64], strides = [1, 1]} : vector<16x128xf32> to vector<8x64xf32>
    %120 = arith.truncf %119 : vector<8x64xf32> to vector<8x64xbf16>
    %cst_41 = arith.constant dense<0.000000e+00> : vector<8x8xf32>
    %121 = tpu.matmul %116, %118, %cst_41 {dimension_numbers = #tpu.dot_dimension_numbers<[1], [1], [0], [0], [0, 0, 1, 0], [], []>} : vector<8x64xbf16>, vector<8x64xbf16>, vector<8x8xf32> -> vector<8x8xf32>
    %122 = arith.addf %121, %21 : vector<8x8xf32>
    %cst_42 = arith.constant dense<0xFF800000> : vector<8xf32>
    %123 = vector.multi_reduction <maximumf>, %122, %cst_42 [1] : vector<8x8xf32> to vector<8xf32>
    %124 = vector.shape_cast %123 : vector<8xf32> to vector<8x1xf32>
    %125 = vector.broadcast %124 : vector<8x1xf32> to vector<8x8xf32>
    %126 = arith.subf %122, %125 : vector<8x8xf32>
    %127 = math.exp %126 : vector<8x8xf32>
    %cst_43 = arith.constant dense<0.000000e+00> : vector<8xf32>
    %128 = vector.multi_reduction <add>, %127, %cst_43 [1] : vector<8x8xf32> to vector<8xf32>
    %129 = vector.shape_cast %128 : vector<8xf32> to vector<8x1xf32>
    %130 = tpu.reciprocal %129 {approx = true} : vector<8x1xf32> -> vector<8x1xf32>
    %131 = vector.broadcast %130 : vector<8x1xf32> to vector<8x8xf32>
    %132 = arith.mulf %127, %131 : vector<8x8xf32>
    %133 = arith.truncf %132 : vector<8x8xf32> to vector<8x8xbf16>
    %cst_44 = arith.constant dense<0.000000e+00> : vector<8x64xf32>
    %134 = tpu.matmul %133, %120, %cst_44 {dimension_numbers = #tpu.dot_dimension_numbers<[1], [0], [0], [1], [0, 0, 1, 1], [], []>} : vector<8x8xbf16>, vector<8x64xbf16>, vector<8x64xf32> -> vector<8x64xf32>
    %135 = arith.truncf %134 : vector<8x64xf32> to vector<8x64xbf16>
    %136 = vector.extract_strided_slice %24 {offsets = [0, 0], sizes = [64, 128], strides = [1, 1]} : vector<128x128xbf16> to vector<64x128xbf16>
    %cst_45 = arith.constant dense<0.000000e+00> : vector<8x128xf32>
    %137 = tpu.matmul %135, %136, %cst_45 {dimension_numbers = #tpu.dot_dimension_numbers<[1], [0], [0], [1], [0, 0, 1, 1], [], []>} : vector<8x64xbf16>, vector<64x128xbf16>, vector<8x128xf32> -> vector<8x128xf32>
    %138 = arith.addf %114, %137 : vector<8x128xf32>
    %139 = vector.extract_strided_slice %62 {offsets = [8, 64], sizes = [8, 64], strides = [1, 1]} : vector<16x128xf32> to vector<8x64xf32>
    %140 = arith.truncf %139 : vector<8x64xf32> to vector<8x64xbf16>
    %141 = vector.extract_strided_slice %63 {offsets = [8, 64], sizes = [8, 64], strides = [1, 1]} : vector<16x128xf32> to vector<8x64xf32>
    %142 = arith.truncf %141 : vector<8x64xf32> to vector<8x64xbf16>
    %143 = vector.extract_strided_slice %64 {offsets = [8, 64], sizes = [8, 64], strides = [1, 1]} : vector<16x128xf32> to vector<8x64xf32>
    %144 = arith.truncf %143 : vector<8x64xf32> to vector<8x64xbf16>
    %cst_46 = arith.constant dense<0.000000e+00> : vector<8x8xf32>
    %145 = tpu.matmul %140, %142, %cst_46 {dimension_numbers = #tpu.dot_dimension_numbers<[1], [1], [0], [0], [0, 0, 1, 0], [], []>} : vector<8x64xbf16>, vector<8x64xbf16>, vector<8x8xf32> -> vector<8x8xf32>
    %146 = arith.addf %145, %21 : vector<8x8xf32>
    %cst_47 = arith.constant dense<0xFF800000> : vector<8xf32>
    %147 = vector.multi_reduction <maximumf>, %146, %cst_47 [1] : vector<8x8xf32> to vector<8xf32>
    %148 = vector.shape_cast %147 : vector<8xf32> to vector<8x1xf32>
    %149 = vector.broadcast %148 : vector<8x1xf32> to vector<8x8xf32>
    %150 = arith.subf %146, %149 : vector<8x8xf32>
    %151 = math.exp %150 : vector<8x8xf32>
    %cst_48 = arith.constant dense<0.000000e+00> : vector<8xf32>
    %152 = vector.multi_reduction <add>, %151, %cst_48 [1] : vector<8x8xf32> to vector<8xf32>
    %153 = vector.shape_cast %152 : vector<8xf32> to vector<8x1xf32>
    %154 = tpu.reciprocal %153 {approx = true} : vector<8x1xf32> -> vector<8x1xf32>
    %155 = vector.broadcast %154 : vector<8x1xf32> to vector<8x8xf32>
    %156 = arith.mulf %151, %155 : vector<8x8xf32>
    %157 = arith.truncf %156 : vector<8x8xf32> to vector<8x8xbf16>
    %cst_49 = arith.constant dense<0.000000e+00> : vector<8x64xf32>
    %158 = tpu.matmul %157, %144, %cst_49 {dimension_numbers = #tpu.dot_dimension_numbers<[1], [0], [0], [1], [0, 0, 1, 1], [], []>} : vector<8x8xbf16>, vector<8x64xbf16>, vector<8x64xf32> -> vector<8x64xf32>
    %159 = arith.truncf %158 : vector<8x64xf32> to vector<8x64xbf16>
    %160 = vector.extract_strided_slice %24 {offsets = [64, 0], sizes = [64, 128], strides = [1, 1]} : vector<128x128xbf16> to vector<64x128xbf16>
    %cst_50 = arith.constant dense<0.000000e+00> : vector<8x128xf32>
    %161 = tpu.matmul %159, %160, %cst_50 {dimension_numbers = #tpu.dot_dimension_numbers<[1], [0], [0], [1], [0, 0, 1, 1], [], []>} : vector<8x64xbf16>, vector<64x128xbf16>, vector<8x128xf32> -> vector<8x128xf32>
    %162 = arith.addf %138, %161 : vector<8x128xf32>
    %163 = tpu.concatenate %113, %162 in 0 : vector<8x128xf32>, vector<8x128xf32> -> vector<16x128xf32>
    %164 = vector.broadcast %25 : vector<1x128xf32> to vector<16x128xf32>
    %165 = arith.addf %163, %164 : vector<16x128xf32>
    %166 = arith.addf %1, %165 : vector<16x128xf32>
    %cst_51 = arith.constant dense<0.000000e+00> : vector<16xf32>
    %167 = vector.multi_reduction <add>, %166, %cst_51 [1] : vector<16x128xf32> to vector<16xf32>
    %168 = vector.shape_cast %167 : vector<16xf32> to vector<16x1xf32>
    %cst_52 = arith.constant 1.280000e+02 : f32
    %169 = vector.broadcast %cst_52 : f32 to vector<16x1xf32>
    %170 = arith.divf %168, %169 : vector<16x1xf32>
    %171 = vector.broadcast %170 : vector<16x1xf32> to vector<16x128xf32>
    %172 = arith.subf %166, %171 : vector<16x128xf32>
    %173 = arith.mulf %172, %172 : vector<16x128xf32>
    %cst_53 = arith.constant dense<0.000000e+00> : vector<16xf32>
    %174 = vector.multi_reduction <add>, %173, %cst_53 [1] : vector<16x128xf32> to vector<16xf32>
    %175 = vector.shape_cast %174 : vector<16xf32> to vector<16x1xf32>
    %cst_54 = arith.constant 1.280000e+02 : f32
    %176 = vector.broadcast %cst_54 : f32 to vector<16x1xf32>
    %177 = arith.divf %175, %176 : vector<16x1xf32>
    %178 = vector.broadcast %170 : vector<16x1xf32> to vector<16x128xf32>
    %179 = arith.subf %166, %178 : vector<16x128xf32>
    %cst_55 = arith.constant 9.99999974E-6 : f32
    %180 = vector.broadcast %cst_55 : f32 to vector<16x1xf32>
    %181 = arith.addf %177, %180 : vector<16x1xf32>
    %182 = math.rsqrt %181 : vector<16x1xf32>
    %183 = vector.broadcast %182 : vector<16x1xf32> to vector<16x128xf32>
    %184 = arith.mulf %179, %183 : vector<16x128xf32>
    %185 = vector.broadcast %32 : vector<1x128xf32> to vector<16x128xf32>
    %186 = arith.mulf %184, %185 : vector<16x128xf32>
    %187 = vector.broadcast %33 : vector<1x128xf32> to vector<16x128xf32>
    %188 = arith.addf %186, %187 : vector<16x128xf32>
    %189 = arith.truncf %188 : vector<16x128xf32> to vector<16x128xbf16>
    %cst_56 = arith.constant dense<0.000000e+00> : vector<16x512xf32>
    %190 = tpu.matmul %189, %26, %cst_56 {dimension_numbers = #tpu.dot_dimension_numbers<[1], [0], [0], [1], [0, 0, 1, 1], [], []>} : vector<16x128xbf16>, vector<128x512xbf16>, vector<16x512xf32> -> vector<16x512xf32>
    %191 = vector.broadcast %27 : vector<1x512xf32> to vector<16x512xf32>
    %192 = arith.addf %190, %191 : vector<16x512xf32>
    %cst_57 = arith.constant 1.702000e+00 : f32
    %193 = vector.broadcast %cst_57 : f32 to vector<16x512xf32>
    %194 = arith.mulf %193, %192 : vector<16x512xf32>
    %195 = arith.negf %194 : vector<16x512xf32>
    %196 = math.exp %195 : vector<16x512xf32>
    %cst_58 = arith.constant 1.000000e+00 : f32
    %197 = vector.broadcast %cst_58 : f32 to vector<16x512xf32>
    %198 = arith.addf %197, %196 : vector<16x512xf32>
    %199 = arith.divf %197, %198 : vector<16x512xf32>
    %200 = arith.mulf %192, %199 : vector<16x512xf32>
    %201 = arith.truncf %200 : vector<16x512xf32> to vector<16x512xbf16>
    %cst_59 = arith.constant dense<0.000000e+00> : vector<16x128xf32>
    %202 = tpu.matmul %201, %28, %cst_59 {dimension_numbers = #tpu.dot_dimension_numbers<[1], [0], [0], [1], [0, 0, 1, 1], [], []>} : vector<16x512xbf16>, vector<512x128xbf16>, vector<16x128xf32> -> vector<16x128xf32>
    %203 = vector.broadcast %29 : vector<1x128xf32> to vector<16x128xf32>
    %204 = arith.addf %202, %203 : vector<16x128xf32>
    %205 = arith.addf %166, %204 : vector<16x128xf32>
    %c0_60 = arith.constant 0 : index
    %c0_61 = arith.constant 0 : index
    %206 = vector.load %arg2[%c0_60, %c0_61] : memref<2x16xf32, #tpu.memory_space<vmem>>, vector<2x16xf32>
    %cst_62 = arith.constant dense<0.000000e+00> : vector<2x128xf32>
    %207 = tpu.matmul %206, %205, %cst_62 {dimension_numbers = #tpu.dot_dimension_numbers<[1], [0], [0], [1], [0, 0, 1, 1], [], []>} : vector<2x16xf32>, vector<16x128xf32>, vector<2x128xf32> -> vector<2x128xf32>
    %208 = vector.extract_strided_slice %0 {offsets = [6, 0], sizes = [1, 128], strides = [1, 1]} : vector<8x128xf32> to vector<1x128xf32>
    %209 = vector.extract_strided_slice %0 {offsets = [7, 0], sizes = [1, 128], strides = [1, 1]} : vector<8x128xf32> to vector<1x128xf32>
    %cst_63 = arith.constant dense<0.000000e+00> : vector<2xf32>
    %210 = vector.multi_reduction <add>, %207, %cst_63 [1] : vector<2x128xf32> to vector<2xf32>
    %211 = vector.shape_cast %210 : vector<2xf32> to vector<2x1xf32>
    %cst_64 = arith.constant 1.280000e+02 : f32
    %212 = vector.broadcast %cst_64 : f32 to vector<2x1xf32>
    %213 = arith.divf %211, %212 : vector<2x1xf32>
    %214 = vector.broadcast %213 : vector<2x1xf32> to vector<2x128xf32>
    %215 = arith.subf %207, %214 : vector<2x128xf32>
    %216 = arith.mulf %215, %215 : vector<2x128xf32>
    %cst_65 = arith.constant dense<0.000000e+00> : vector<2xf32>
    %217 = vector.multi_reduction <add>, %216, %cst_65 [1] : vector<2x128xf32> to vector<2xf32>
    %218 = vector.shape_cast %217 : vector<2xf32> to vector<2x1xf32>
    %cst_66 = arith.constant 1.280000e+02 : f32
    %219 = vector.broadcast %cst_66 : f32 to vector<2x1xf32>
    %220 = arith.divf %218, %219 : vector<2x1xf32>
    %221 = vector.broadcast %213 : vector<2x1xf32> to vector<2x128xf32>
    %222 = arith.subf %207, %221 : vector<2x128xf32>
    %cst_67 = arith.constant 9.99999974E-6 : f32
    %223 = vector.broadcast %cst_67 : f32 to vector<2x1xf32>
    %224 = arith.addf %220, %223 : vector<2x1xf32>
    %225 = math.rsqrt %224 : vector<2x1xf32>
    %226 = vector.broadcast %225 : vector<2x1xf32> to vector<2x128xf32>
    %227 = arith.mulf %222, %226 : vector<2x128xf32>
    %228 = vector.broadcast %208 : vector<1x128xf32> to vector<2x128xf32>
    %229 = arith.mulf %227, %228 : vector<2x128xf32>
    %230 = vector.broadcast %209 : vector<1x128xf32> to vector<2x128xf32>
    %231 = arith.addf %229, %230 : vector<2x128xf32>
    %232 = arith.truncf %231 : vector<2x128xf32> to vector<2x128xbf16>
    %c0_68 = arith.constant 0 : index
    %c0_69 = arith.constant 0 : index
    %233 = vector.load %arg11[%c0_68, %c0_69] : memref<128x128xbf16, #tpu.memory_space<vmem>>, vector<128x128xbf16>
    %cst_70 = arith.constant dense<0.000000e+00> : vector<2x128xf32>
    %234 = tpu.matmul %232, %233, %cst_70 {dimension_numbers = #tpu.dot_dimension_numbers<[1], [0], [0], [1], [0, 0, 1, 1], [], []>} : vector<2x128xbf16>, vector<128x128xbf16>, vector<2x128xf32> -> vector<2x128xf32>
    %235 = arith.mulf %234, %234 : vector<2x128xf32>
    %cst_71 = arith.constant dense<0.000000e+00> : vector<2xf32>
    %236 = vector.multi_reduction <add>, %235, %cst_71 [1] : vector<2x128xf32> to vector<2xf32>
    %237 = vector.shape_cast %236 : vector<2xf32> to vector<2x1xf32>
    %cst_72 = arith.constant 9.99999996E-13 : f32
    %238 = vector.broadcast %cst_72 : f32 to vector<2x1xf32>
    %239 = arith.maximumf %237, %238 : vector<2x1xf32>
    %240 = math.rsqrt %239 : vector<2x1xf32>
    %241 = vector.broadcast %240 : vector<2x1xf32> to vector<2x128xf32>
    %242 = arith.mulf %234, %241 : vector<2x128xf32>
    %c0_73 = arith.constant 0 : index
    %c0_74 = arith.constant 0 : index
    %243 = vector.load %arg18[%c0_73, %c0_74] : memref<2x128xf32, #tpu.memory_space<vmem>>, vector<2x128xf32>
    tpu.vector_store %arg18[%c0_73, %c0_74], %242 {strides = array<i32>} : memref<2x128xf32, #tpu.memory_space<vmem>>, vector<2x128xf32>,
    %c0_75 = arith.constant 0 : index
    %c0_76 = arith.constant 0 : index
    %244 = vector.load %arg3[%c0_75, %c0_76] : memref<2x128xf32, #tpu.memory_space<vmem>>, vector<2x128xf32>
    %245 = arith.mulf %244, %242 : vector<2x128xf32>
    %c0_77 = arith.constant 0 : index
    %c0_78 = arith.constant 0 : index
    %246 = vector.load %arg19[%c0_77, %c0_78] : memref<2x128xf32, #tpu.memory_space<vmem>>, vector<2x128xf32>
    tpu.vector_store %arg19[%c0_77, %c0_78], %245 {strides = array<i32>} : memref<2x128xf32, #tpu.memory_space<vmem>>, vector<2x128xf32>,
    %c0_79 = arith.constant 0 : index
    %c0_80 = arith.constant 0 : index
    %247 = vector.load %arg13[%c0_79, %c0_80] : memref<3x768xf32, #tpu.memory_space<vmem>>, vector<3x768xf32>
    %c0_81 = arith.constant 0 : index
    %c0_82 = arith.constant 0 : index
    %248 = vector.load %arg15[%c0_81, %c0_82] : memref<3x512xf32, #tpu.memory_space<vmem>>, vector<3x512xf32>
    %249 = arith.truncf %245 : vector<2x128xf32> to vector<2x128xbf16>
    %c0_83 = arith.constant 0 : index
    %c0_84 = arith.constant 0 : index
    %250 = vector.load %arg12[%c0_83, %c0_84] : memref<128x768xbf16, #tpu.memory_space<vmem>>, vector<128x768xbf16>
    %cst_85 = arith.constant dense<0.000000e+00> : vector<2x768xf32>
    %251 = tpu.matmul %249, %250, %cst_85 {dimension_numbers = #tpu.dot_dimension_numbers<[1], [0], [0], [1], [0, 0, 1, 1], [], []>} : vector<2x128xbf16>, vector<128x768xbf16>, vector<2x768xf32> -> vector<2x768xf32>
    %252 = vector.extract_strided_slice %247 {offsets = [0, 0], sizes = [1, 768], strides = [1, 1]} : vector<3x768xf32> to vector<1x768xf32>
    %253 = vector.broadcast %252 : vector<1x768xf32> to vector<2x768xf32>
    %254 = arith.addf %251, %253 : vector<2x768xf32>
    %cst_86 = arith.constant 0.000000e+00 : f32
    %255 = vector.broadcast %cst_86 : f32 to vector<2x768xf32>
    %256 = arith.maximumf %254, %255 : vector<2x768xf32>
    %257 = vector.extract_strided_slice %247 {offsets = [1, 0], sizes = [1, 768], strides = [1, 1]} : vector<3x768xf32> to vector<1x768xf32>
    %258 = vector.broadcast %257 : vector<1x768xf32> to vector<2x768xf32>
    %259 = arith.mulf %256, %258 : vector<2x768xf32>
    %260 = vector.extract_strided_slice %247 {offsets = [2, 0], sizes = [1, 768], strides = [1, 1]} : vector<3x768xf32> to vector<1x768xf32>
    %261 = vector.broadcast %260 : vector<1x768xf32> to vector<2x768xf32>
    %262 = arith.addf %259, %261 : vector<2x768xf32>
    %263 = arith.truncf %262 : vector<2x768xf32> to vector<2x768xbf16>
    %c0_87 = arith.constant 0 : index
    %c0_88 = arith.constant 0 : index
    %264 = vector.load %arg14[%c0_87, %c0_88] : memref<768x512xbf16, #tpu.memory_space<vmem>>, vector<768x512xbf16>
    %cst_89 = arith.constant dense<0.000000e+00> : vector<2x512xf32>
    %265 = tpu.matmul %263, %264, %cst_89 {dimension_numbers = #tpu.dot_dimension_numbers<[1], [0], [0], [1], [0, 0, 1, 1], [], []>} : vector<2x768xbf16>, vector<768x512xbf16>, vector<2x512xf32> -> vector<2x512xf32>
    %266 = vector.extract_strided_slice %248 {offsets = [0, 0], sizes = [1, 512], strides = [1, 1]} : vector<3x512xf32> to vector<1x512xf32>
    %267 = vector.broadcast %266 : vector<1x512xf32> to vector<2x512xf32>
    %268 = arith.addf %265, %267 : vector<2x512xf32>
    %cst_90 = arith.constant 0.000000e+00 : f32
    %269 = vector.broadcast %cst_90 : f32 to vector<2x512xf32>
    %270 = arith.maximumf %268, %269 : vector<2x512xf32>
    %271 = vector.extract_strided_slice %248 {offsets = [1, 0], sizes = [1, 512], strides = [1, 1]} : vector<3x512xf32> to vector<1x512xf32>
    %272 = vector.broadcast %271 : vector<1x512xf32> to vector<2x512xf32>
    %273 = arith.mulf %270, %272 : vector<2x512xf32>
    %274 = vector.extract_strided_slice %248 {offsets = [2, 0], sizes = [1, 512], strides = [1, 1]} : vector<3x512xf32> to vector<1x512xf32>
    %275 = vector.broadcast %274 : vector<1x512xf32> to vector<2x512xf32>
    %276 = arith.addf %273, %275 : vector<2x512xf32>
    %277 = arith.truncf %276 : vector<2x512xf32> to vector<2x512xbf16>
    %c0_91 = arith.constant 0 : index
    %c0_92 = arith.constant 0 : index
    %278 = vector.load %arg16[%c0_91, %c0_92] : memref<512x128xbf16, #tpu.memory_space<vmem>>, vector<512x128xbf16>
    %cst_93 = arith.constant dense<0.000000e+00> : vector<2x128xf32>
    %279 = tpu.matmul %277, %278, %cst_93 {dimension_numbers = #tpu.dot_dimension_numbers<[1], [0], [0], [1], [0, 0, 1, 1], [], []>} : vector<2x512xbf16>, vector<512x128xbf16>, vector<2x128xf32> -> vector<2x128xf32>
    %c0_94 = arith.constant 0 : index
    %c0_95 = arith.constant 0 : index
    %280 = vector.load %arg17[%c0_94, %c0_95] : memref<1x128xf32, #tpu.memory_space<vmem>>, vector<1x128xf32>
    %281 = vector.broadcast %280 : vector<1x128xf32> to vector<2x128xf32>
    %282 = arith.addf %279, %281 : vector<2x128xf32>
    %c0_96 = arith.constant 0 : index
    %c0_97 = arith.constant 0 : index
    %283 = vector.load %arg20[%c0_96, %c0_97] : memref<2x128xf32, #tpu.memory_space<vmem>>, vector<2x128xf32>
    tpu.vector_store %arg20[%c0_96, %c0_97], %282 {strides = array<i32>} : memref<2x128xf32, #tpu.memory_space<vmem>>, vector<2x128xf32>,
    return
  }
}

</mosaic_0001>

<bundles_post_ra>
// kernel: rgcl_clip_forward.2
= control target key start
LH: loop header
LB: loop body
LE: loop exit
PB: predicated region body
PF: predicated region fallthrough
CT: control target
= control target key end

     0   :  { %vm3300_vm0 = vmmov 0   ;;  %vm1021_vm1 = vcmask 523264   ;;  %vm1084_vm2 = vcmask 1043456   ;;  %vm1068_vm4 = vcmask 64512   ;;  %s4137_s5 = inlined_call_operand.vmem [shape: bf16[768,128], index: 5, kind: input, shape index: {}]   ;;  %s4138_s0 = inlined_call_operand.vmem [shape: f32[16,768], index: 0, kind: input, shape index: {}]   ;;  %s4139_s1 = inlined_call_operand.vmem [shape: f32[16,128], index: 1, kind: input, shape index: {}]   ;;  %s4140_s2 = inlined_call_operand.vmem [shape: f32[10,128], index: 2, kind: input, shape index: {}]   ;;  %s4141_s6 = inlined_call_operand.vmem [shape: bf16[128,384], index: 6, kind: input, shape index: {}]   ;;  %s4142_s3 = inlined_call_operand.vmem [shape: f32[1,384], index: 3, kind: input, shape index: {}]   ;;  %s4143_s7 = inlined_call_operand.vmem [shape: bf16[128,128], index: 7, kind: input, shape index: {}]   ;;  %s4144_s8 = inlined_call_operand.vmem [shape: bf16[128,512], index: 8, kind: input, shape index: {}]   ;;  %s4145_s9 = inlined_call_operand.vmem [shape: bf16[512,128], index: 9, kind: input, shape index: {}]   ;;  %s4146_s4 = inlined_call_operand.vmem [shape: f32[1,512], index: 4, kind: input, shape index: {}]   ;;  %s4147_s10 = inlined_call_operand.vmem [shape: bf16[128,128], index: 10, kind: input, shape index: {}]   ;;  %s4148_s11 = inlined_call_operand.vmem [shape: f32[2,128], index: 11, kind: output, shape index: {}]  }
   0x1   :  { %v3057_v0 = vld [vmem:[%s4137_s5 + $0x40] sm:$0xff]   ;;  %v3061_v4 = vld [vmem:[%s4137_s5 + $0x48] sm:$0xff]   ;;  %v3065_v8 = vld [vmem:[%s4137_s5 + $0x50] sm:$0xff]   ;;  %vm2349_vm6 = vcmask 130048   ;;  %vm2423_vm7 = vcmask 1041408  }
   0x2   :  { %v3058_v1 = vld [vmem:[%s4137_s5] sm:$0xff]   ;;  %2738 = vmatprep.subr.bf16.mxu0 %v3057_v0  ;;  %v3062_v5 = vld [vmem:[%s4137_s5 + $0x8] sm:$0xff]   ;;  %v3066_v9 = vld [vmem:[%s4137_s5 + $0x10] sm:$0xff]  }
   0x3   :  { %v3059_v2 = vld [vmem:[%s4137_s5 + $0xc0] sm:$0xff]   ;;  %2739 = vmatpush3.bf16.msra.mxu0 %v3058_v1  ;;  %v3063_v6 = vld [vmem:[%s4137_s5 + $0xc8] sm:$0xff]   ;;  %v3067_v10 = vld [vmem:[%s4137_s5 + $0xd0] sm:$0xff]  }
   0x4   :  { %v3060_v3 = vld [vmem:[%s4137_s5 + $0x80] sm:$0xff]   ;;  %2760 = vmatprep.subr.bf16.mxu1 %v3059_v2  ;;  %2740 = vmatprep.subr.bf16.mxu0 %v3061_v4  ;;  %v3064_v7 = vld [vmem:[%s4137_s5 + $0x88] sm:$0xff]   ;;  %v3068_v11 = vld [vmem:[%s4137_s5 + $0x90] sm:$0xff]  }
   0x5   :  { %2761 = vmatpush3.bf16.msra.mxu1 %v3060_v3  ;;  %v3069_v12 = vld [vmem:[%s4137_s5 + $0x58] sm:$0xff]   ;;  %v3073_v16 = vld [vmem:[%s4137_s5 + $0x60] sm:$0xff]   ;;  %v3077_v20 = vld [vmem:[%s4137_s5 + $0x68] sm:$0xff]  }
   0x6   :  { %2762 = vmatprep.subr.bf16.mxu1 %v3063_v6  ;;  %v3070_v13 = vld [vmem:[%s4137_s5 + $0x18] sm:$0xff]   ;;  %v3074_v17 = vld [vmem:[%s4137_s5 + $0x20] sm:$0xff]   ;;  %v3078_v21 = vld [vmem:[%s4137_s5 + $0x28] sm:$0xff]  }
   0x7   :  { %2741 = vmatpush3.bf16.msra.mxu0 %v3062_v5  ;;  %v3071_v14 = vld [vmem:[%s4137_s5 + $0xd8] sm:$0xff]   ;;  %v3075_v18 = vld [vmem:[%s4137_s5 + $0xe0] sm:$0xff]   ;;  %v3079_v22 = vld [vmem:[%s4137_s5 + $0xe8] sm:$0xff]  }
   0x8   :  { %2742 = vmatprep.subr.bf16.mxu0 %v3065_v8  ;;  %v3072_v15 = vld [vmem:[%s4137_s5 + $0x98] sm:$0xff]   ;;  %v3076_v19 = vld [vmem:[%s4137_s5 + $0xa0] sm:$0xff]   ;;  %v3080_v23 = vld [vmem:[%s4137_s5 + $0xa8] sm:$0xff]  }
   0x9   :  { %2763 = vmatpush3.bf16.msra.mxu1 %v3064_v7  ;;  %v3081_v24 = vld [vmem:[%s4137_s5 + $0x70] sm:$0xff]   ;;  %v3085_v28 = vld [vmem:[%s4137_s5 + $0x78] sm:$0xff]   ;;  %v42_v31 = vld [vmem:[%s4138_s0 + $0x8] sm:$0xff] }
   0xa   :  { %2764 = vmatprep.subr.bf16.mxu1 %v3067_v10  ;;  %v3082_v25 = vld [vmem:[%s4137_s5 + $0x30] sm:$0xff]   ;;  %v3086_v29 = vld [vmem:[%s4137_s5 + $0x38] sm:$0xff]   ;;  %v41_v35 = vld [vmem:[%s4138_s0] sm:$0xff] }
   0xb   :  { %2743 = vmatpush3.bf16.msra.mxu0 %v3066_v9  ;;  %v3083_v26 = vld [vmem:[%s4137_s5 + $0xf0] sm:$0xff]   ;;  %v3087_v30 = vld [vmem:[%s4137_s5 + $0xf8] sm:$0xff]   ;;  %v3089_v38 = vld [vmem:[%s4137_s5 + $0x140] sm:$0xff]  }
   0xc   :  { %2744 = vmatprep.subr.bf16.mxu0 %v3069_v12  ;;  %v3084_v27 = vld [vmem:[%s4137_s5 + $0xb0] sm:$0xff]   ;;  %v48_v32 = vld [vmem:[%s4138_s0 + $0x38] sm:$0xff]  ;;  %v50_v40 = vld [vmem:[%s4138_s0 + $0x48] sm:$0xff] }
   0xd   :  { %2765 = vmatpush3.bf16.msra.mxu1 %v3068_v11  ;;  %v54_v33 = vpack.c.bf16 %v48_v32, %v42_v31  ;;  %v3088_v34 = vld [vmem:[%s4137_s5 + $0xb8] sm:$0xff]   ;;  %v47_v36 = vld [vmem:[%s4138_s0 + $0x30] sm:$0xff]  ;;  %v3090_v42 = vld [vmem:[%s4137_s5 + $0x100] sm:$0xff]  }
   0xe   :  { %2766 = vmatprep.subr.bf16.mxu1 %v3071_v14  ;;  %v53_v37 = vpack.c.bf16 %v47_v36, %v41_v35  ;;  %v44_v39 = vld [vmem:[%s4138_s0 + $0x18] sm:$0xff]  ;;  %v43_v43 = vld [vmem:[%s4138_s0 + $0x10] sm:$0xff]  ;;  %v49_v44 = vld [vmem:[%s4138_s0 + $0x40] sm:$0xff] }
   0xf   :  { %2745 = vmatpush3.bf16.msra.mxu0 %v3070_v13  ;;  %477 = vmatprep.mubr.bf16.mxu0 %v54_v33  ;;  %v56_v41 = vpack.c.bf16 %v50_v40, %v44_v39  ;;  %v55_v45 = vpack.c.bf16 %v49_v44, %v43_v43  ;;  %v3091_v46 = vld [vmem:[%s4137_s5 + $0x148] sm:$0xff]   ;;  %v3093_v48 = vld [vmem:[%s4137_s5 + $0x150] sm:$0xff]   ;;  %v3095_v50 = vld [vmem:[%s4137_s5 + $0x158] sm:$0xff]  }
  0x10   :  { %2746 = vmatprep.subr.bf16.mxu0 %v3073_v16  ;;  %v3092_v47 = vld [vmem:[%s4137_s5 + $0x108] sm:$0xff]   ;;  %v3094_v49 = vld [vmem:[%s4137_s5 + $0x110] sm:$0xff]   ;;  %v3096_v51 = vld [vmem:[%s4137_s5 + $0x118] sm:$0xff]  }
  0x11   :  { %2767 = vmatpush3.bf16.msra.mxu1 %v3072_v15  ;;  %518 = vmatprep.mubr.bf16.mxu1 %v56_v41  ;;  %v3097_v52 = vld [vmem:[%s4137_s5 + $0x160] sm:$0xff]   ;;  %v3099_v54 = vld [vmem:[%s4137_s5 + $0x168] sm:$0xff]   ;;  %v52_v56 = vld [vmem:[%s4138_s0 + $0x58] sm:$0xff] }
  0x12   :  { %2768 = vmatprep.subr.bf16.mxu1 %v3075_v18  ;;  %v3098_v53 = vld [vmem:[%s4137_s5 + $0x120] sm:$0xff]   ;;  %v46_v55 = vld [vmem:[%s4138_s0 + $0x28] sm:$0xff]  ;;  %v3101_v59 = vld [vmem:[%s4137_s5 + $0x170] sm:$0xff]  }
  0x13   :  { %2747 = vmatpush3.bf16.msra.mxu0 %v3074_v17  ;;  %v58_v57 = vpack.c.bf16 %v52_v56, %v46_v55  ;;  %v3100_v58 = vld [vmem:[%s4137_s5 + $0x128] sm:$0xff]   ;;  %v3102_v60 = vld [vmem:[%s4137_s5 + $0x130] sm:$0xff]   ;;  %v3103_v61 = vld [vmem:[%s4137_s5 + $0x178] sm:$0xff]  }
  0x14   :  { %2748 = vmatprep.subr.bf16.mxu0 %v3077_v20  ;;  %v3104_v62 = vld [vmem:[%s4137_s5 + $0x138] sm:$0xff]   ;;  %v45_v63 = vld [vmem:[%s4138_s0 + $0x20] sm:$0xff]  ;;  %v51_v0 = vld [vmem:[%s4138_s0 + $0x50] sm:$0xff] }
  0x15   :  { %2769 = vmatpush3.bf16.msra.mxu1 %v3076_v19  ;;  %v57_v1 = vpack.c.bf16 %v51_v0, %v45_v63  ;;  %v155_v3 = vld [vmem:[%s4139_s1] sm:$0xff]  ;;  %v156_v8 = vld [vmem:[%s4139_s1 + $0x8] sm:$0xff] }
  0x16   :  { %2770 = vmatprep.subr.bf16.mxu1 %v3079_v22 }
  0x17   :  { %2749 = vmatpush3.bf16.msra.mxu0 %v3078_v21 }
  0x18   :  { %2750 = vmatprep.subr.bf16.mxu0 %v3081_v24 }
  0x19   :  { %2771 = vmatpush3.bf16.msra.mxu1 %v3080_v23 }
  0x1a   :  { %2772 = vmatprep.subr.bf16.mxu1 %v3083_v26 }
  0x1b   :  { %2751 = vmatpush3.bf16.msra.mxu0 %v3082_v25 }
  0x1c   :  { %2752 = vmatprep.subr.bf16.mxu0 %v3085_v28 }
  0x1d   :  { %2773 = vmatpush3.bf16.msra.mxu1 %v3084_v27 }
  0x1e   :  { %2774 = vmatprep.subr.bf16.mxu1 %v3087_v30 }
  0x1f   :  { %2753 = vmatpush3.bf16.msra.mxu0 %v3086_v29 }
  0x20   :  { %2782 = vmatprep.subr.bf16.mxu0 %v3089_v38  ;;  %v591_v38 = vlaneseq }
  0x21   :  { %2775 = vmatpush3.bf16.msra.mxu1 %v3088_v34 }
  0x22   :  { %478 = vmatmul.mubr.bf16.vlgmr.msra.gmra.mrb[0].mxu0 %v53_v37 }
  0x23   :  { %2783 = vmatpush3.bf16.msra.mxu0 %v3090_v42  ;;  %559 = vmatprep.mubr.bf16.mxu0 %v58_v57  ;;  %v3551_v42 = vshrl.u32 %v591_v38, 7  ;;  %v3105_v57 = vld [vmem:[%s4141_s6] ss:$12 sps:$4 sm:$0xff]  }
  0x24   :  { %519 = vmatmul.mubr.bf16.vlgmr.msra.gmra.mrb[0].mxu1 %v55_v45  ;;  %2784 = vmatprep.subr.bf16.mxu0 %v3091_v46  ;;  %v3559_v45 = vld [vmem:[%s4140_s2] sm:$0xff] }
  0x25   :  { %v3554_v44 = vsub.s32 0, %v3551_v42  ;;  %v3562_v46 = vsub.s32 1, %v3551_v42 }
  0x27   :  { %2785 = vmatpush3.bf16.msra.mxu0 %v3092_v47  ;;  %v594_v47 = vrot.slane %v3559_v45, %v3554_v44 }
  0x28   :  { %2786 = vmatprep.subr.bf16.mxu0 %v3093_v48 }
  0x2b   :  { %2787 = vmatpush3.bf16.msra.mxu0 %v3094_v49 }
  0x2c   :  { %2788 = vmatprep.subr.bf16.mxu0 %v3095_v50  ;;  %v600_v50 = vrot.slane %v3559_v45, %v3562_v46 }
  0x2f   :  { %2789 = vmatpush3.bf16.msra.mxu0 %v3096_v51 }
  0x30   :  { %2790 = vmatprep.subr.bf16.mxu0 %v3097_v52 }
  0x33   :  { %2791 = vmatpush3.bf16.msra.mxu0 %v3098_v53 }
  0x34   :  { %2792 = vmatprep.subr.bf16.mxu0 %v3099_v54 }
  0x37   :  { %2793 = vmatpush3.bf16.msra.mxu0 %v3100_v58  ;;  %v3298_v58 = vmov 0.0  }
  0x38   :  { %2794 = vmatprep.subr.bf16.mxu0 %v3101_v59  ;;  %v3107_v59 = vld [vmem:[%s4141_s6 + $0x4] ss:$12 sps:$4 sm:$0xff]  }
  0x39   :  { %932 = vmatprep.subr.bf16.mxu1 %v3107_v59 }
  0x3a   :  { %933 = vmatpush1.bf16.msra.mxu1 %v3105_v57 }
  0x3b   :  { %2795 = vmatpush3.bf16.msra.mxu0 %v3102_v60  ;;  %v3108_v60 = vld [vmem:[%s4141_s6 + $0x8] ss:$12 sps:$4 sm:$0xff]  }
  0x3c   :  { %2796 = vmatprep.subr.bf16.mxu0 %v3103_v61  ;;  %v3109_v61 = vld [vmem:[%s4141_s6 + $0x18] ss:$12 sps:$4 sm:$0xff]  }
  0x3f   :  { %2797 = vmatpush3.bf16.msra.mxu0 %v3104_v62  ;;  %v3111_v62 = vld [vmem:[%s4141_s6 + $0x1c] ss:$12 sps:$4 sm:$0xff]  }
  0x40   :  { %2905 = vmatprep.subr.bf16.mxu0 %v3298_v58  ;;  %934 = vmatprep.subr.bf16.mxu1 %v3111_v62 }
  0x41   :  { %935 = vmatpush1.bf16.msra.mxu1 %v3109_v61 }
  0x42   :  { %560 = vmatmul.mubr.bf16.vlgmr.msra.gmra.mrb[4].mxu0 %v57_v1 }
  0x43   :  { %2906 = vmatpush3.bf16.msra.mxu0 %v3108_v60  ;;  %2921 = vmatprep.mubr.msk.bf16.mxu0 %vm3300_vm0, %v3298_v58 }
  0x44   :  { %2907 = vmatprep.subr.bf16.mxu0 %v3298_v58 }
  0xf5   :  { %v2754_v2 = vpop.f32.mrb[0].mxu0 }
  0xf6   :  { %v2755_v4 = vpop.f32.mrb[1].mxu0 }
  0xf7   :  { %v2756_v5 = vadd.f32 %v2755_v4, %v2754_v2  ;;  %v2757_v6 = vpop.f32.mrb[2].mxu0  ;;  %v2776_v7 = vpop.f32.mrb[0].mxu1 }
  0xf8   :  { %v2758_v9 = vpop.f32.mrb[3].mxu0  ;;  %v2777_v12 = vpop.f32.mrb[1].mxu1 }
  0xf9   :  { %v480_v10 = vadd.f32 %v2756_v5, %v155_v3  ;;  %v2759_v11 = vadd.f32 %v2758_v9, %v2757_v6  ;;  %v2778_v13 = vadd.f32 %v2777_v12, %v2776_v7  ;;  %v2779_v14 = vpop.f32.mrb[2].mxu1  ;;  %v3112_v7 = vld [vmem:[%s4141_s6 + $0x20] ss:$12 sps:$4 sm:$0xff]   ;;  %v3113_v9 = vld [vmem:[%s4141_s6 + $0x30] ss:$12 sps:$4 sm:$0xff]  }
  0xfa   :  { %v2780_v16 = vpop.f32.mrb[3].mxu1  ;;  %2908 = vmatpush3.bf16.msra.mxu0 %v3112_v7  ;;  %v3117_v12 = vld [vmem:[%s4141_s6 + $0x48] ss:$12 sps:$4 sm:$0xff]  }
  0xfb   :  { %v483_v15 = vadd.f32 %v2759_v11, %v156_v8  ;;  %v521_v17 = vadd.f32 %v2778_v13, %v480_v10  ;;  %v2781_v18 = vadd.f32 %v2780_v16, %v2779_v14  ;;  %v3115_v8 = vld [vmem:[%s4141_s6 + $0x34] ss:$12 sps:$4 sm:$0xff]   ;;  %2909 = vmatprep.subr.bf16.mxu0 %v3298_v58  ;;  %v3116_v10 = vld [vmem:[%s4141_s6 + $0x38] ss:$12 sps:$4 sm:$0xff]   ;;  %v3120_v13 = vld [vmem:[%s4141_s6 + $0x50] ss:$12 sps:$4 sm:$0xff]  }
  0xfc   :  { %936 = vmatprep.subr.bf16.mxu1 %v3115_v8  ;;  %v3119_v11 = vld [vmem:[%s4141_s6 + $0x4c] ss:$12 sps:$4 sm:$0xff]   ;;  %v3123_v14 = vld [vmem:[%s4141_s6 + $0x64] ss:$12 sps:$4 sm:$0xff]   ;;  %v3124_v16 = vld [vmem:[%s4141_s6 + $0x68] ss:$12 sps:$4 sm:$0xff]  }
  0xfd   :  { %v524_v19 = vadd.f32 %v2781_v18, %v483_v15  ;;  %937 = vmatpush1.bf16.msra.mxu1 %v3113_v9  ;;  %v3121_v15 = vld [vmem:[%s4141_s6 + $0x60] ss:$12 sps:$4 sm:$0xff]   ;;  %v3125_v18 = vld [vmem:[%s4141_s6 + $0x78] ss:$12 sps:$4 sm:$0xff]  }
  0xfe   :  { %2910 = vmatpush3.bf16.msra.mxu0 %v3116_v10  ;;  %938 = vmatprep.subr.bf16.mxu1 %v3119_v11 }
  0xff   :  { %2911 = vmatprep.subr.bf16.mxu0 %v3298_v58 }
 0x101   :  { %939 = vmatpush1.bf16.msra.mxu1 %v3117_v12 }
 0x102   :  { %2912 = vmatpush3.bf16.msra.mxu0 %v3120_v13  ;;  %940 = vmatprep.subr.bf16.mxu1 %v3123_v14  ;;  %v3705_v14 = vand.u32 127, %v591_v38 }
 0x103   :  { %2913 = vmatprep.subr.bf16.mxu0 %v3298_v58 }
 0x104   :  { %vm605_vm3 = vcmp.lt.s32.totalorder %v3705_v14, 5 }
 0x105   :  { %941 = vmatpush1.bf16.msra.mxu1 %v3121_v15  ;;  %v3301_v15 = vmov -1e+09  }
 0x106   :  { %2914 = vmatpush3.bf16.msra.mxu0 %v3124_v16  ;;  %v3708_v16 = vsel %vm605_vm3, 0.0, %v3301_v15 }
 0x107   :  { %2915 = vmatprep.subr.bf16.mxu0 %v3298_v58 }
 0x115   :  { %v2798_v20 = vpop.f32.mrb[4].mxu0 }
 0x116   :  { %v2799_v21 = vpop.f32.mrb[5].mxu0 }
 0x117   :  { %v2800_v22 = vadd.f32 %v2799_v21, %v2798_v20  ;;  %v2801_v23 = vpop.f32.mrb[6].mxu0  ;;  %v3131_v20 = vld [vmem:[%s4141_s6 + $0x94] ss:$12 sps:$4 sm:$0xff]   ;;  %v3129_v21 = vld [vmem:[%s4141_s6 + $0x90] ss:$12 sps:$4 sm:$0xff]  }
 0x118   :  { %v2802_v24 = vpop.f32.mrb[7].mxu0 }
 0x119   :  { %v2803_v25 = vadd.f32 %v2802_v24, %v2801_v23  ;;  %v562_v26 = vadd.f32 %v2800_v22, %v521_v17  ;;  %v3127_v17 = vld [vmem:[%s4141_s6 + $0x7c] ss:$12 sps:$4 sm:$0xff]   ;;  %v3132_v22 = vld [vmem:[%s4141_s6 + $0x98] ss:$12 sps:$4 sm:$0xff]  }
 0x11a   :  { %942 = vmatprep.subr.bf16.mxu1 %v3127_v17  ;;  %v3135_v23 = vld [vmem:[%s4141_s6 + $0xac] ss:$12 sps:$4 sm:$0xff]   ;;  %v3133_v24 = vld [vmem:[%s4141_s6 + $0xa8] ss:$12 sps:$4 sm:$0xff]  }
 0x11b   :  { %568 = vadd.xlane.f32.xlu0 %v562_v26  ;;  %v565_v27 = vadd.f32 %v2803_v25, %v524_v19  ;;  %v3128_v19 = vld [vmem:[%s4141_s6 + $0x80] ss:$12 sps:$4 sm:$0xff]   ;;  %943 = vmatpush1.bf16.msra.mxu1 %v3125_v18  ;;  %v3136_v25 = vld [vmem:[%s4141_s6 + $0xb0] ss:$12 sps:$4 sm:$0xff]  }
 0x11c   :  { %2916 = vmatpush3.bf16.msra.mxu0 %v3128_v19  ;;  %944 = vmatprep.subr.bf16.mxu1 %v3131_v20 }
 0x11d   :  { %2917 = vmatprep.subr.bf16.mxu0 %v3298_v58 }
 0x11f   :  { %570 = vadd.xlane.f32.xlu0 %v565_v27  ;;  %945 = vmatpush1.bf16.msra.mxu1 %v3129_v21 }
 0x120   :  { %2918 = vmatpush3.bf16.msra.mxu0 %v3132_v22  ;;  %946 = vmatprep.subr.bf16.mxu1 %v3135_v23 }
 0x121   :  { %2919 = vmatprep.subr.bf16.mxu0 %v3298_v58 }
 0x123   :  { %947 = vmatpush1.bf16.msra.mxu1 %v3133_v24 }
 0x124   :  { %2920 = vmatpush3.bf16.msra.mxu0 %v3136_v25  ;;  %2925 = vmatprep.subr.bf16.mxu1 %v3298_v58 }
 0x125   :  { %2949 = vmatprep.subr.bf16.mxu0 %v3298_v58 }
 0x1a8   :  { %v569_v28 = vpop.xlane.xlu0 %568 }
 0x1a9   :  { %v573_v29 = vmul.f32 0.0078125, %v569_v28 }
 0x1ab   :  { %v575_v30 = vsub.f32 %v562_v26, %v573_v29  ;;  %v3299_v26 = vmov 0  }
 0x1ac   :  { %v571_v31 = vpop.xlane.xlu0 %570  ;;  %964 = vmatprep.mubr.bf16.mxu1 %v3299_v26 }
 0x1ad   :  { %v574_v32 = vmul.f32 0.0078125, %v571_v31  ;;  %v577_v33 = vmul.f32 %v575_v30, %v575_v30 }
 0x1af   :  { %v576_v34 = vsub.f32 %v565_v27, %v574_v32  ;;  %579 = vadd.xlane.f32.xlu1 %v577_v33  ;;  %v3670_v33 = vsub.s32 2, %v3551_v42 }
 0x1b1   :  { %v578_v35 = vmul.f32 %v576_v34, %v576_v34 }
 0x1b3   :  { %581 = vadd.xlane.f32.xlu1 %v578_v35 }
 0x23c   :  { %v580_v36 = vpop.xlane.xlu1 %579 }
 0x23d   :  { %v583_v37 = vmul.f32 0.0078125, %v580_v36  ;;  %v778_v36 = vrot.slane %v3559_v45, %v3670_v33 }
 0x23f   :  { %v585_v39 = vadd.f32 1e-05, %v583_v37  ;;  %v783_v37 = vsub.s32 3, %v3551_v42 }
 0x240   :  { %v582_v40 = vpop.xlane.xlu1 %581 }
 0x241   :  { %3233 = vrsqrt.f32 %v585_v39  ;;  %v584_v41 = vmul.f32 0.0078125, %v582_v40 }
 0x243   :  { %v586_v43 = vadd.f32 1e-05, %v584_v41 }
 0x245   :  { %3235 = vrsqrt.f32 %v586_v43  ;;  %v784_v43 = vrot.slane %v3559_v45, %v783_v37 }
 0x24b   :  { %v3234_v48 = vpop.eup %3233 }
 0x24c   :  { %v589_v49 = vmul.f32 %v3234_v48, %v575_v30 }
 0x24e   :  { %v595_v51 = vmul.f32 %v594_v47, %v589_v49 }
 0x24f   :  { %v3236_v52 = vpop.eup %3235 }
 0x250   :  { %v3568_v53 = vadd.f32 %v600_v50, %v595_v51  ;;  %v590_v54 = vmul.f32 %v3236_v52, %v576_v34  ;;  %v639_v51 = vld [vmem:[%s4142_s3] sm:$0x7]  ;;  %s3302_s3 = smov 64  }
 0x251   :  { %v796_v52 = vrot.slane %v639_v51, %v3562_v46  ;;  %v800_v59 = vrot.slane %v639_v51, %v3670_v33 }
 0x252   :  { %753 = vadd.xlane.f32.xlu0 %v3568_v53  ;;  %v596_v55 = vmul.f32 %v594_v47, %v590_v54  ;;  %v792_v54 = vrot.slane %v639_v51, %v3554_v44 }
 0x254   :  { %v3571_v56 = vadd.f32 %v600_v50, %v596_v55 }
 0x256   :  { %755 = vadd.xlane.f32.xlu1 %v3571_v56 }
 0x2df   :  { %v754_v63 = vpop.xlane.xlu0 %753 }
 0x2e0   :  { %v757_v0 = vmul.f32 0.0078125, %v754_v63 }
 0x2e2   :  { %v3592_v1 = vsub.f32 %v3568_v53, %v757_v0 }
 0x2e3   :  { %v756_v2 = vpop.xlane.xlu1 %755 }
 0x2e4   :  { %v758_v3 = vmul.f32 0.0078125, %v756_v2  ;;  %v761_v4 = vmul.f32 %v3592_v1, %v3592_v1 }
 0x2e6   :  { %v3597_v5 = vsub.f32 %v3571_v56, %v758_v3  ;;  %763 = vadd.xlane.f32.xlu0 %v761_v4 }
 0x2e8   :  { %v762_v6 = vmul.f32 %v3597_v5, %v3597_v5 }
 0x2ea   :  { %765 = vadd.xlane.f32.xlu1 %v762_v6 }
 0x373   :  { %v764_v27 = vpop.xlane.xlu0 %763 }
 0x374   :  { %v767_v28 = vmul.f32 0.0078125, %v764_v27 }
 0x376   :  { %v769_v29 = vadd.f32 1e-05, %v767_v28 }
 0x377   :  { %v766_v30 = vpop.xlane.xlu1 %765 }
 0x378   :  { %3237 = vrsqrt.f32 %v769_v29  ;;  %v768_v31 = vmul.f32 0.0078125, %v766_v30 }
 0x37a   :  { %v770_v32 = vadd.f32 1e-05, %v768_v31 }
 0x37c   :  { %3239 = vrsqrt.f32 %v770_v32 }
 0x382   :  { %v3238_v34 = vpop.eup %3237 }
 0x383   :  { %v773_v35 = vmul.f32 %v3238_v34, %v3592_v1 }
 0x385   :  { %v779_v41 = vmul.f32 %v778_v36, %v773_v35 }
 0x386   :  { %v3240_v39 = vpop.eup %3239 }
 0x387   :  { %v774_v40 = vmul.f32 %v3240_v39, %v3597_v5  ;;  %v785_v48 = vadd.f32 %v784_v43, %v779_v41 }
 0x389   :  { %v780_v47 = vmul.f32 %v778_v36, %v774_v40 }
 0x38b   :  { %v786_v49 = vadd.f32 %v784_v43, %v780_v47 }
 0x38d   :  { %v787_v50 = vpack.c.bf16 %v786_v49, %v785_v48 }
 0x38f   :  { %965 = vmatmul.mubr.bf16.vlgmr.msra.gmra.mrb[4].mxu1 %v787_v50  ;;  %2922 = vmatmul.mubr.bf16.vlgmr.msra.gmra.mrb[8].mxu0 %v787_v50 }
 0x390   :  { %2927 = vmatprep.mubr.msk.bf16.mxu1 %vm3300_vm0, %v3298_v58  ;;  %2957 = vmatprep.mubr.msk.bf16.mxu0 %vm3300_vm0, %v3298_v58 }
 0x462   :  { %v966_v55 = vpop.f32.mrb[4].mxu1  ;;  %v1009_v57 = vpop.f32.mrb[8].mxu0 }
 0x463   :  { %v968_v60 = vpop.f32.mrb[5].mxu1  ;;  %v2923_v61 = vpop.f32.mrb[9].mxu0  ;;  %v967_v5 = vadd.f32 %v966_v55, %v792_v54  ;;  %v1010_v8 = vadd.f32 %v1009_v57, %v800_v59 }
 0x464   :  { %v969_v62 = vadd.f32 %v968_v60, %v796_v52  ;;  %v970_v63 = vpop.f32.mrb[6].mxu1  ;;  %v1012_v0 = vpop.f32.mrb[10].mxu0 }
 0x465   :  { %v3690_v1 = vadd.f32 %v970_v63, %v792_v54  ;;  %v3692_v2 = vadd.f32 %v1012_v0, %v800_v59  ;;  %v972_v3 = vpop.f32.mrb[7].mxu1  ;;  %v2924_v4 = vpop.f32.mrb[11].mxu0  ;;  %v1016_v10 = vmul.f32 0.125, %v967_v5  ;;  %v3696_v11 = vpack.c.bf16 %v1010_v8, %v1010_v8  ;;  %v3137_v63 = vld [vmem:[%s4143_s7 + $0x20] sm:$0xff]   ;;  %v3138_v0 = vld [vmem:[%s4143_s7 + $0x28] sm:$0xff]  }
 0x466   :  { %v1019_v6 = vpack.c.bf16 %v969_v62, %v969_v62  ;;  %v973_v7 = vadd.f32 %v972_v3, %v796_v52  ;;  %2950 = vmatpush3.bf16.msra.mxu0 %v3137_v63  ;;  %v3140_v3 = vld [vmem:[%s4143_s7 + $0x38] sm:$0xff]  }
 0x467   :  { %v1018_v12 = vpack.c.bf16 %v1016_v10, %v1016_v10  ;;  %v1086_v13 = vsel %vm1084_vm2, %v3696_v11, 0  ;;  %v1017_v52 = vmul.f32 0.125, %v3690_v1  ;;  %2951 = vmatprep.subr.bf16.mxu0 %v3298_v58  ;;  %v3139_v1 = vld [vmem:[%s4143_s7 + $0x30] sm:$0xff]   ;;  %v3756_v8 = vpack.c.bf16 %v3692_v2, %v3692_v2 }
 0x468   :  { %v1026_v9 = vsel %vm1021_vm1, %v1019_v6, 0  ;;  %v1378_v54 = vpack.c.bf16 %v973_v7, %v973_v7 }
 0x469   :  { %2926 = vmatpush3.bf16.xpose.msra.mxu1 %v1026_v9  ;;  %v3729_v55 = vpack.c.bf16 %v1017_v52, %v1017_v52 }
 0x46a   :  { %2931 = vmatprep.subr.bf16.mxu1 %v3298_v58  ;;  %2952 = vmatpush3.bf16.msra.mxu0 %v3138_v0 }
 0x46b   :  { %2953 = vmatprep.subr.bf16.mxu0 %v3298_v58 }
 0x46e   :  { %2954 = vmatpush3.bf16.msra.mxu0 %v3139_v1 }
 0x46f   :  { %2955 = vmatprep.subr.bf16.mxu0 %v3298_v58 }
 0x470   :  { %2928 = vmatmul.mubr.msk.bf16.vlgmr.msra.gmra.mrb[8].mxu1 %vm1021_vm1, %v1018_v12 }
 0x471   :  { %2932 = vmatpush3.bf16.msra.mxu1 %v1086_v13  ;;  %2933 = vmatprep.mubr.msk.bf16.mxu1 %vm3300_vm0, %v3298_v58  ;;  %v3767_v13 = vld [vmem:[%s4143_s7] sm:$0xff]  }
 0x472   :  { %2937 = vmatprep.subr.bf16.mxu1 %v3298_v58  ;;  %2956 = vmatpush3.bf16.msra.mxu0 %v3140_v3 }
 0x473   :  { %2961 = vmatprep.subr.bf16.mxu0 %v3298_v58 }
 0x543   :  { %v1062_v17 = vpop.f32.mrb[8].mxu1 }
 0x544   :  { %v1063_v18 = vadd.f32 %v1062_v17, %v3708_v16  ;;  %v2929_v19 = vpop.f32.mrb[9].mxu1 }
 0x545   :  { %v1065_v20 = vpop.f32.mrb[10].mxu1  ;;  %v3774_v19 = vld [vmem:[%s4143_s7 + $0x8] sm:$0xff]  }
 0x546   :  { %v2930_v21 = vpop.f32.mrb[11].mxu1  ;;  %v1069_v22 = vsel %vm1068_vm4, %v1063_v18, -inf  ;;  %v3783_v20 = vld [vmem:[%s4143_s7 + $0x10] sm:$0xff]  }
 0x547   :  { %1070 = vmax.xlane.f32.xlu0 %v1069_v22  ;;  %v3790_v21 = vld [vmem:[%s4143_s7 + $0x18] sm:$0xff]  }
 0x55d   :  { %1133 = vrot.lane.b32.xlu0 %v1019_v6, %s3302_s3 }
 0x5d4   :  { %v1071_v38 = vpop.xlane.xlu0 %1070 }
 0x5d5   :  { %v1072_v23 = vsub.f32 %v1063_v18, %v1071_v38  ;;  %v1384_v38 = vsel %vm1021_vm1, %v1378_v54, 0 }
 0x5d7   :  { %v1073_v24 = vmul.f32 1.442695, %v1072_v23 }
 0x5d8   :  { %v1134_v31 = vpop.permute.xlu0 %1133 }
 0x5d9   :  { %3241 = vpow2.f32 %v1073_v24  ;;  %v1139_v34 = vsel %vm1021_vm1, %v1134_v31, 0 }
 0x5e3   :  { %v3242_v25 = vpop.eup %3241 }
 0x5e4   :  { %v1075_v27 = vsel %vm1068_vm4, %v3242_v25, 0.0 }
 0x5e5   :  { %1076 = vadd.xlane.f32.xlu1 %v1075_v27 }
 0x5f6   :  { %1130 = vrot.lane.b32.xlu1 %v1018_v12, %s3302_s3 }
 0x672   :  { %v1077_v28 = vpop.xlane.xlu1 %1076 }
 0x673   :  { %3243 = vrcp.f32 %v1077_v28 }
 0x676   :  { %v1131_v35 = vpop.permute.xlu1 %1130 }
 0x67d   :  { %v3244_v29 = vpop.eup %3243 }
 0x67e   :  { %v1079_v30 = vmul.f32 %v3244_v29, %v3242_v25 }
 0x680   :  { %v1080_v32 = vpack.c.bf16 %v1079_v30, %v1079_v30 }
 0x682   :  { %2934 = vmatmul.mubr.msk.bf16.vlgmr.msra.gmra.mrb[12].mxu1 %vm1068_vm4, %v1080_v32 }
 0x683   :  { %2938 = vmatpush3.bf16.xpose.msra.mxu1 %v1139_v34  ;;  %2939 = vmatprep.mubr.msk.bf16.mxu1 %vm3300_vm0, %v3298_v58 }
 0x684   :  { %2943 = vmatprep.subr.bf16.mxu1 %v3298_v58 }
 0x68a   :  { %2940 = vmatmul.mubr.msk.bf16.vlgmr.msra.gmra.mrb[16].mxu1 %vm1021_vm1, %v1131_v35 }
 0x68b   :  { %2945 = vmatprep.mubr.msk.bf16.mxu1 %vm3300_vm0, %v3298_v58 }
 0x755   :  { %v3723_v36 = vpop.f32.mrb[12].mxu1 }
 0x756   :  { %v2935_v39 = vpop.f32.mrb[13].mxu1  ;;  %v1128_v22 = vpack.c.bf16 %v3723_v36, %v3723_v36 }
 0x757   :  { %v1125_v40 = vpop.f32.mrb[14].mxu1 }
 0x758   :  { %v2936_v41 = vpop.f32.mrb[15].mxu1 }
 0x75d   :  { %v1175_v43 = vpop.f32.mrb[16].mxu1 }
 0x75e   :  { %v1176_v47 = vadd.f32 %v1175_v43, %v3708_v16  ;;  %v2941_v48 = vpop.f32.mrb[17].mxu1 }
 0x75f   :  { %v1178_v49 = vpop.f32.mrb[18].mxu1 }
 0x760   :  { %v2942_v50 = vpop.f32.mrb[19].mxu1  ;;  %v1181_v51 = vsel %vm1068_vm4, %v1176_v47, -inf }
 0x761   :  { %1182 = vmax.xlane.f32.xlu1 %v1181_v51 }
 0x772   :  { %1489 = vrot.lane.b32.xlu1 %v1378_v54, %s3302_s3 }
 0x776   :  { %1486 = vrot.lane.b32.xlu1 %v3729_v55, %s3302_s3 }
 0x7ee   :  { %v1183_v57 = vpop.xlane.xlu1 %1182 }
 0x7ef   :  { %v1184_v59 = vsub.f32 %v1176_v47, %v1183_v57 }
 0x7f1   :  { %v1185_v60 = vmul.f32 1.442695, %v1184_v59 }
 0x7f2   :  { %v1490_v23 = vpop.permute.xlu1 %1489 }
 0x7f3   :  { %3245 = vpow2.f32 %v1185_v60  ;;  %v1495_v24 = vsel %vm1021_vm1, %v1490_v23, 0 }
 0x7f6   :  { %v1487_v25 = vpop.permute.xlu1 %1486 }
 0x7fd   :  { %v3246_v61 = vpop.eup %3245 }
 0x7fe   :  { %v1187_v62 = vsel %vm1068_vm4, %v3246_v61, 0.0 }
 0x7ff   :  { %1188 = vadd.xlane.f32.xlu0 %v1187_v62 }
 0x815   :  { %1194 = vrot.lane.b32.xlu0 %v3696_v11, %s3302_s3  ;;  %v1442_v11 = vsel %vm1084_vm2, %v3756_v8, 0 }
 0x88c   :  { %v1189_v4 = vpop.xlane.xlu0 %1188 }
 0x88d   :  { %3247 = vrcp.f32 %v1189_v4 }
 0x890   :  { %v1195_v5 = vpop.permute.xlu0 %1194 }
 0x891   :  { %v1200_v6 = vsel %vm1084_vm2, %v1195_v5, 0 }
 0x892   :  { %2944 = vmatpush3.bf16.msra.mxu1 %v1200_v6 }
 0x893   :  { %2979 = vmatprep.subr.bf16.mxu1 %v3298_v58 }
 0x897   :  { %v3248_v7 = vpop.eup %3247 }
 0x898   :  { %v1191_v9 = vmul.f32 %v3248_v7, %v3246_v61 }
 0x89a   :  { %v1192_v10 = vpack.c.bf16 %v1191_v9, %v1191_v9 }
 0x89c   :  { %2946 = vmatmul.mubr.msk.bf16.vlgmr.msra.gmra.mrb[20].mxu1 %vm1068_vm4, %v1192_v10 }
 0x89d   :  { %2980 = vmatpush3.bf16.msra.mxu1 %v1442_v11  ;;  %2981 = vmatprep.mubr.msk.bf16.mxu1 %vm3300_vm0, %v3298_v58 }
 0x89e   :  { %2991 = vmatprep.subr.bf16.mxu1 %v3298_v58 }
 0x96f   :  { %v1236_v12 = vpop.f32.mrb[20].mxu1 }
 0x970   :  { %v1242_v2 = vpack.c.bf16 %v1236_v12, %v1236_v12  ;;  %v2947_v15 = vpop.f32.mrb[21].mxu1 }
 0x971   :  { %v1239_v17 = vpop.f32.mrb[22].mxu1 }
 0x972   :  { %v2948_v18 = vpop.f32.mrb[23].mxu1  ;;  %2958 = vmatmul.mubr.msk.bf16.vlgmr.msra.gmra.mrb[12].mxu0 %vm1021_vm1, %v1242_v2 }
 0x973   :  { %2962 = vmatpush3.bf16.msra.mxu0 %v3767_v13  ;;  %2969 = vmatprep.mubr.msk.bf16.mxu0 %vm3300_vm0, %v3298_v58 }
 0x974   :  { %2963 = vmatprep.subr.bf16.mxu0 %v3298_v58 }
 0x977   :  { %2964 = vmatpush3.bf16.msra.mxu0 %v3774_v19 }
 0x978   :  { %2965 = vmatprep.subr.bf16.mxu0 %v3298_v58 }
 0x97b   :  { %2966 = vmatpush3.bf16.msra.mxu0 %v3783_v20 }
 0x97c   :  { %2967 = vmatprep.subr.bf16.mxu0 %v3298_v58 }
 0x97f   :  { %2968 = vmatpush3.bf16.msra.mxu0 %v3790_v21 }
 0x980   :  { %2973 = vmatprep.subr.bf16.mxu0 %v3298_v58 }
 0x982   :  { %2970 = vmatmul.mubr.msk.bf16.vlgmr.msra.gmra.mrb[16].mxu0 %vm1021_vm1, %v1128_v22 }
 0x983   :  { %2975 = vmatprep.mubr.msk.bf16.mxu0 %vm3300_vm0, %v3298_v58 }
 0x988   :  { %2974 = vmatpush3.bf16.xpose.msra.mxu0 %v1384_v38 }
 0x989   :  { %2985 = vmatprep.subr.bf16.mxu0 %v3298_v58 }
 0x98f   :  { %2976 = vmatmul.mubr.msk.bf16.vlgmr.msra.gmra.mrb[20].mxu0 %vm1021_vm1, %v3729_v55 }
 0x990   :  { %2986 = vmatpush3.bf16.xpose.msra.mxu0 %v1495_v24  ;;  %2987 = vmatprep.mubr.msk.bf16.mxu0 %vm3300_vm0, %v3298_v58 }
 0x991   :  { %2997 = vmatprep.subr.bf16.mxu0 %v3298_v58 }
 0x997   :  { %2988 = vmatmul.mubr.msk.bf16.vlgmr.msra.gmra.mrb[24].mxu0 %vm1021_vm1, %v1487_v25 }
 0x998   :  { %2998 = vmatpush3.bf16.msra.mxu0 %v3137_v63  ;;  %3005 = vmatprep.mubr.msk.bf16.mxu0 %vm3300_vm0, %v3298_v58 }
 0x999   :  { %2999 = vmatprep.subr.bf16.mxu0 %v3298_v58 }
 0x99c   :  { %3000 = vmatpush3.bf16.msra.mxu0 %v3138_v0 }
 0x99d   :  { %3001 = vmatprep.subr.bf16.mxu0 %v3298_v58 }
 0x9a0   :  { %3002 = vmatpush3.bf16.msra.mxu0 %v3139_v1 }
 0x9a1   :  { %3003 = vmatprep.subr.bf16.mxu0 %v3298_v58 }
 0x9a4   :  { %3004 = vmatpush3.bf16.msra.mxu0 %v3140_v3 }
 0xa45   :  { %v1304_v27 = vpop.f32.mrb[12].mxu0 }
 0xa46   :  { %v2959_v28 = vpop.f32.mrb[13].mxu0 }
 0xa47   :  { %v1307_v29 = vpop.f32.mrb[14].mxu0 }
 0xa48   :  { %v2960_v30 = vpop.f32.mrb[15].mxu0 }
 0xa55   :  { %v1371_v31 = vpop.f32.mrb[16].mxu0 }
 0xa56   :  { %v1372_v32 = vadd.f32 %v1371_v31, %v1304_v27  ;;  %v2971_v34 = vpop.f32.mrb[17].mxu0 }
 0xa57   :  { %v1374_v35 = vpop.f32.mrb[18].mxu0 }
 0xa58   :  { %v2972_v36 = vpop.f32.mrb[19].mxu0 }
 0xa62   :  { %v1420_v39 = vpop.f32.mrb[20].mxu0 }
 0xa63   :  { %v1421_v40 = vadd.f32 %v1420_v39, %v3708_v16  ;;  %v2977_v41 = vpop.f32.mrb[21].mxu0 }
 0xa64   :  { %v1423_v43 = vpop.f32.mrb[22].mxu0 }
 0xa65   :  { %v2978_v47 = vpop.f32.mrb[23].mxu0  ;;  %v1426_v48 = vsel %vm1068_vm4, %v1421_v40, -inf }
 0xa66   :  { %1427 = vmax.xlane.f32.xlu1 %v1426_v48  ;;  %v3145_v48 = vld [vmem:[%s4144_s8] ss:$16 sps:$4 sm:$0xff]  }
 0xa6a   :  { %v1531_v49 = vpop.f32.mrb[24].mxu0 }
 0xa6b   :  { %v1532_v50 = vadd.f32 %v1531_v49, %v3708_v16  ;;  %v2989_v51 = vpop.f32.mrb[25].mxu0  ;;  %v1687_v16 = vsub.s32 6, %v3551_v42  ;;  %v3147_v49 = vld [vmem:[%s4144_s8 + $0x4] ss:$16 sps:$4 sm:$0xff]  }
 0xa6c   :  { %v1534_v52 = vpop.f32.mrb[26].mxu0  ;;  %1909 = vmatprep.subr.bf16.mxu0 %v3147_v49  ;;  %v3151_v51 = vld [vmem:[%s4144_s8 + $0x20] ss:$16 sps:$4 sm:$0xff]  }
 0xa6d   :  { %v2990_v54 = vpop.f32.mrb[27].mxu0  ;;  %v1537_v55 = vsel %vm1068_vm4, %v1532_v50, -inf  ;;  %v1688_v3 = vrot.slane %v3559_v45, %v1687_v16  ;;  %v3153_v52 = vld [vmem:[%s4144_s8 + $0x24] ss:$16 sps:$4 sm:$0xff]  }
 0xa6e   :  { %1538 = vmax.xlane.f32.xlu0 %v1537_v55  ;;  %v3154_v54 = vld [vmem:[%s4144_s8 + $0x28] ss:$16 sps:$4 sm:$0xff]   ;;  %v3156_v55 = vld [vmem:[%s4144_s8 + $0x2c] ss:$16 sps:$4 sm:$0xff]  }
 0xa6f   :  { %v1689_v5 = vadd.f32 %v1688_v3, %v1372_v32 }
 0xa71   :  { %v3825_v7 = vadd.f32 %v1689_v5, %v3568_v53  ;;  %v3166_v5 = vld [vmem:[%s4144_s8 + $0x68] ss:$16 sps:$4 sm:$0xff]  }
 0xa77   :  { %1550 = vrot.lane.b32.xlu1 %v3756_v8, %s3302_s3 }
 0xaf3   :  { %v1428_v57 = vpop.xlane.xlu1 %1427 }
 0xaf4   :  { %v1429_v59 = vsub.f32 %v1421_v40, %v1428_v57  ;;  %v3157_v57 = vld [vmem:[%s4144_s8 + $0x40] ss:$16 sps:$4 sm:$0xff]  }
 0xaf6   :  { %v1430_v60 = vmul.f32 1.442695, %v1429_v59  ;;  %v3159_v59 = vld [vmem:[%s4144_s8 + $0x44] ss:$16 sps:$4 sm:$0xff]  }
 0xaf7   :  { %v1551_v12 = vpop.permute.xlu1 %1550 }
 0xaf8   :  { %3249 = vpow2.f32 %v1430_v60  ;;  %v1556_v45 = vsel %vm1084_vm2, %v1551_v12, 0  ;;  %v3160_v60 = vld [vmem:[%s4144_s8 + $0x48] ss:$16 sps:$4 sm:$0xff]   ;;  %v3180_v12 = vld [vmem:[%s4144_s8 + $0xac] ss:$16 sps:$4 sm:$0xff]  }
 0xafb   :  { %v1539_v61 = vpop.xlane.xlu0 %1538 }
 0xafc   :  { %v1540_v62 = vsub.f32 %v1532_v50, %v1539_v61  ;;  %v3148_v50 = vld [vmem:[%s4144_s8 + $0x8] ss:$16 sps:$4 sm:$0xff]   ;;  %v3162_v61 = vld [vmem:[%s4144_s8 + $0x4c] ss:$16 sps:$4 sm:$0xff]  }
 0xafe   :  { %v1541_v63 = vmul.f32 1.442695, %v1540_v62 }
 0xb00   :  { %3251 = vpow2.f32 %v1541_v63 }
 0xb02   :  { %v3250_v0 = vpop.eup %3249 }
 0xb03   :  { %v1432_v1 = vsel %vm1068_vm4, %v3250_v0, 0.0 }
 0xb04   :  { %1433 = vadd.xlane.f32.xlu0 %v1432_v1  ;;  %v3165_v1 = vld [vmem:[%s4144_s8 + $0x64] ss:$16 sps:$4 sm:$0xff]  }
 0xb0a   :  { %v3252_v4 = vpop.eup %3251 }
 0xb0b   :  { %v1543_v6 = vsel %vm1068_vm4, %v3252_v4, 0.0 }
 0xb0c   :  { %1544 = vadd.xlane.f32.xlu0 %v1543_v6  ;;  %v3171_v6 = vld [vmem:[%s4144_s8 + $0x84] ss:$16 sps:$4 sm:$0xff]  }
 0xb10   :  { %1693 = vadd.xlane.f32.xlu0 %v3825_v7 }
 0xb91   :  { %v1434_v8 = vpop.xlane.xlu0 %1433 }
 0xb92   :  { %3253 = vrcp.f32 %v1434_v8  ;;  %v3174_v8 = vld [vmem:[%s4144_s8 + $0x8c] ss:$16 sps:$4 sm:$0xff]  }
 0xb99   :  { %v1545_v9 = vpop.xlane.xlu0 %1544 }
 0xb9a   :  { %3255 = vrcp.f32 %v1545_v9  ;;  %v3169_v9 = vld [vmem:[%s4144_s8 + $0x80] ss:$16 sps:$4 sm:$0xff]  }
 0xb9c   :  { %v3254_v10 = vpop.eup %3253 }
 0xb9d   :  { %v1436_v11 = vmul.f32 %v3254_v10, %v3250_v0  ;;  %v1694_v31 = vpop.xlane.xlu0 %1693  ;;  %v3172_v10 = vld [vmem:[%s4144_s8 + $0x88] ss:$16 sps:$4 sm:$0xff]  }
 0xb9e   :  { %v1697_v34 = vmul.f32 0.0078125, %v1694_v31  ;;  %v3958_v31 = vld [vmem:[%s4140_s2] sm:$0xff] }
 0xb9f   :  { %v1437_v2 = vpack.c.bf16 %v1436_v11, %v1436_v11  ;;  %v3177_v11 = vld [vmem:[%s4144_s8 + $0xa4] ss:$16 sps:$4 sm:$0xff]  }
 0xba0   :  { %v3848_v43 = vsub.f32 %v3825_v7, %v1697_v34  ;;  %v1723_v34 = vsub.s32 5, %v3551_v42 }
 0xba1   :  { %2982 = vmatmul.mubr.msk.bf16.vlgmr.msra.gmra.mrb[24].mxu1 %vm1068_vm4, %v1437_v2  ;;  %v3175_v2 = vld [vmem:[%s4144_s8 + $0xa0] ss:$16 sps:$4 sm:$0xff]  }
 0xba2   :  { %2992 = vmatpush3.bf16.msra.mxu1 %v1556_v45  ;;  %2993 = vmatprep.mubr.msk.bf16.mxu1 %vm3300_vm0, %v3298_v58  ;;  %v3178_v45 = vld [vmem:[%s4144_s8 + $0xa8] ss:$16 sps:$4 sm:$0xff]  }
 0xba3   :  { %3009 = vmatprep.subr.bf16.mxu1 %v3298_v58 }
 0xba4   :  { %v3256_v53 = vpop.eup %3255 }
 0xba5   :  { %v1547_v15 = vmul.f32 %v3256_v53, %v3252_v4  ;;  %v3163_v4 = vld [vmem:[%s4144_s8 + $0x60] ss:$16 sps:$4 sm:$0xff]   ;;  %v3183_v53 = vld [vmem:[%s4144_s8 + $0xc4] ss:$16 sps:$4 sm:$0xff]  }
 0xba7   :  { %v1548_v17 = vpack.c.bf16 %v1547_v15, %v1547_v15  ;;  %v3186_v15 = vld [vmem:[%s4144_s8 + $0xcc] ss:$16 sps:$4 sm:$0xff]  }
 0xba9   :  { %2994 = vmatmul.mubr.msk.bf16.vlgmr.msra.gmra.mrb[28].mxu1 %vm1068_vm4, %v1548_v17  ;;  %v3181_v17 = vld [vmem:[%s4144_s8 + $0xc0] ss:$16 sps:$4 sm:$0xff]  }
 0xbaa   :  { %3010 = vmatpush3.bf16.msra.mxu1 %v3767_v13  ;;  %3017 = vmatprep.mubr.msk.bf16.mxu1 %vm3300_vm0, %v3298_v58 }
 0xbab   :  { %3011 = vmatprep.subr.bf16.mxu1 %v3298_v58 }
 0xbae   :  { %3012 = vmatpush3.bf16.msra.mxu1 %v3774_v19 }
 0xbaf   :  { %3013 = vmatprep.subr.bf16.mxu1 %v3298_v58 }
 0xbb2   :  { %3014 = vmatpush3.bf16.msra.mxu1 %v3783_v20 }
 0xbb3   :  { %3015 = vmatprep.subr.bf16.mxu1 %v3298_v58 }
 0xbb6   :  { %3016 = vmatpush3.bf16.msra.mxu1 %v3790_v21 }
 0xc74   :  { %v1478_v18 = vpop.f32.mrb[24].mxu1 }
 0xc75   :  { %v1484_v22 = vpack.c.bf16 %v1478_v18, %v1478_v18  ;;  %v2983_v38 = vpop.f32.mrb[25].mxu1  ;;  %v3184_v18 = vld [vmem:[%s4144_s8 + $0xc8] ss:$16 sps:$4 sm:$0xff]  }
 0xc76   :  { %v1481_v23 = vpop.f32.mrb[26].mxu1  ;;  %v3192_v38 = vld [vmem:[%s4144_s8 + $0xec] ss:$16 sps:$4 sm:$0xff]  }
 0xc77   :  { %v2984_v13 = vpop.f32.mrb[27].mxu1  ;;  %3018 = vmatmul.mubr.msk.bf16.vlgmr.msra.gmra.mrb[32].mxu1 %vm1021_vm1, %v1484_v22  ;;  %v3189_v22 = vld [vmem:[%s4144_s8 + $0xe4] ss:$16 sps:$4 sm:$0xff]   ;;  %v3187_v23 = vld [vmem:[%s4144_s8 + $0xe0] ss:$16 sps:$4 sm:$0xff]  }
 0xc78   :  { %1984 = vmatprep.mubr.bf16.mxu1 %v3299_v26  ;;  %v3190_v13 = vld [vmem:[%s4144_s8 + $0xe8] ss:$16 sps:$4 sm:$0xff]  }
 0xc7c   :  { %v1592_v24 = vpop.f32.mrb[28].mxu1 }
 0xc7d   :  { %v1598_v25 = vpack.c.bf16 %v1592_v24, %v1592_v24  ;;  %v2995_v19 = vpop.f32.mrb[29].mxu1 }
 0xc7e   :  { %v1595_v27 = vpop.f32.mrb[30].mxu1 }
 0xc7f   :  { %v2996_v28 = vpop.f32.mrb[31].mxu1  ;;  %3006 = vmatmul.mubr.msk.bf16.vlgmr.msra.gmra.mrb[28].mxu0 %vm1021_vm1, %v1598_v25 }
 0xc80   :  { %1941 = vmatprep.mubr.bf16.mxu0 %v3299_v26  ;;  %v1701_v26 = vmul.f32 %v3848_v43, %v3848_v43  ;;  %1910 = vmatpush1.bf16.msra.mxu0 %v3145_v48 }
 0xc81   :  { %1911 = vmatprep.subr.bf16.mxu0 %v3153_v52  ;;  %v3197_v52 = vld [vmem:[%s4145_s9 + $0x48] sm:$0xff]  }
 0xc84   :  { %1912 = vmatpush1.bf16.msra.mxu0 %v3151_v51  ;;  %v3196_v51 = vld [vmem:[%s4145_s9 + $0x80] sm:$0xff]  }
 0xc85   :  { %1913 = vmatprep.subr.bf16.mxu0 %v3159_v59  ;;  %v3201_v59 = vld [vmem:[%s4145_s9 + $0x50] sm:$0xff]  }
 0xc88   :  { %1914 = vmatpush1.bf16.msra.mxu0 %v3157_v57  ;;  %v3200_v57 = vld [vmem:[%s4145_s9 + $0x88] sm:$0xff]  }
 0xc89   :  { %1915 = vmatprep.subr.bf16.mxu0 %v3165_v1  ;;  %v3208_v1 = vld [vmem:[%s4145_s9 + $0x98] sm:$0xff]  }
 0xc8c   :  { %1916 = vmatpush1.bf16.msra.mxu0 %v3163_v4  ;;  %v3210_v4 = vld [vmem:[%s4145_s9 + $0xe0] sm:$0xff]  }
 0xc8d   :  { %1917 = vmatprep.subr.bf16.mxu0 %v3171_v6  ;;  %v3212_v6 = vld [vmem:[%s4145_s9 + $0xa0] sm:$0xff]  }
 0xc90   :  { %1918 = vmatpush1.bf16.msra.mxu0 %v3169_v9  ;;  %v3214_v9 = vld [vmem:[%s4145_s9 + $0xe8] sm:$0xff]  }
 0xc91   :  { %1919 = vmatprep.subr.bf16.mxu0 %v3177_v11  ;;  %v3216_v11 = vld [vmem:[%s4145_s9 + $0xa8] sm:$0xff]  }
 0xc94   :  { %1920 = vmatpush1.bf16.msra.mxu0 %v3175_v2  ;;  %v3218_v2 = vld [vmem:[%s4145_s9 + $0xf0] sm:$0xff]  }
 0xc95   :  { %1921 = vmatprep.subr.bf16.mxu0 %v3183_v53  ;;  %v3220_v53 = vld [vmem:[%s4145_s9 + $0xb0] sm:$0xff]  }
 0xc98   :  { %1922 = vmatpush1.bf16.msra.mxu0 %v3181_v17  ;;  %v3222_v17 = vld [vmem:[%s4145_s9 + $0xf8] sm:$0xff]  }
 0xc99   :  { %1923 = vmatprep.subr.bf16.mxu0 %v3189_v22  ;;  %v3224_v22 = vld [vmem:[%s4145_s9 + $0xb8] sm:$0xff]  }
 0xc9c   :  { %1924 = vmatpush1.bf16.msra.mxu0 %v3187_v23 }
 0xd4a   :  { %v1679_v20 = vpop.f32.mrb[32].mxu1 }
 0xd4b   :  { %v3019_v21 = vpop.f32.mrb[33].mxu1 }
 0xd4c   :  { %v1682_v29 = vpop.f32.mrb[34].mxu1  ;;  %v1717_v21 = vsub.s32 4, %v3551_v42 }
 0xd4d   :  { %v3020_v30 = vpop.f32.mrb[35].mxu1 }
 0xd52   :  { %v1636_v32 = vpop.f32.mrb[28].mxu0 }
 0xd53   :  { %v1680_v35 = vadd.f32 %v1679_v20, %v1636_v32  ;;  %v3007_v36 = vpop.f32.mrb[29].mxu0  ;;  %v1718_v32 = vrot.slane %v3958_v31, %v1717_v21 }
 0xd54   :  { %v1639_v39 = vpop.f32.mrb[30].mxu0 }
 0xd55   :  { %v1690_v40 = vadd.f32 %v1688_v3, %v1680_v35  ;;  %v3008_v41 = vpop.f32.mrb[31].mxu0  ;;  %v3168_v3 = vld [vmem:[%s4144_s8 + $0x6c] ss:$16 sps:$4 sm:$0xff]  }
 0xd57   :  { %v3851_v47 = vadd.f32 %v1690_v40, %v3571_v56  ;;  %v3150_v56 = vld [vmem:[%s4144_s8 + $0xc] ss:$16 sps:$4 sm:$0xff]   ;;  %v1724_v40 = vrot.slane %v3958_v31, %v1723_v34 }
 0xd58   :  { %1952 = vmatprep.subr.bf16.mxu1 %v3150_v56  ;;  %v3195_v56 = vld [vmem:[%s4145_s9] sm:$0xff]  }
 0xd59   :  { %1695 = vadd.xlane.f32.xlu0 %v3851_v47  ;;  %1953 = vmatpush1.bf16.msra.mxu1 %v3148_v50  ;;  %v3194_v50 = vld [vmem:[%s4145_s9 + $0xc0] sm:$0xff]  }
 0xd5a   :  { %1954 = vmatprep.subr.bf16.mxu1 %v3156_v55  ;;  %v3199_v55 = vld [vmem:[%s4145_s9 + $0x8] sm:$0xff]  }
 0xd5d   :  { %1703 = vadd.xlane.f32.xlu0 %v1701_v26  ;;  %1955 = vmatpush1.bf16.msra.mxu1 %v3154_v54  ;;  %v3198_v54 = vld [vmem:[%s4145_s9 + $0xc8] sm:$0xff]  }
 0xd5e   :  { %1956 = vmatprep.subr.bf16.mxu1 %v3162_v61  ;;  %v3203_v61 = vld [vmem:[%s4145_s9 + $0x10] sm:$0xff]  }
 0xd61   :  { %1957 = vmatpush1.bf16.msra.mxu1 %v3160_v60  ;;  %v3202_v60 = vld [vmem:[%s4145_s9 + $0xd0] sm:$0xff]  }
 0xd62   :  { %1958 = vmatprep.subr.bf16.mxu1 %v3168_v3  ;;  %v3209_v3 = vld [vmem:[%s4145_s9 + $0x60] sm:$0xff]  }
 0xd65   :  { %1959 = vmatpush1.bf16.msra.mxu1 %v3166_v5  ;;  %v3211_v5 = vld [vmem:[%s4145_s9 + $0x20] sm:$0xff]  }
 0xd66   :  { %1960 = vmatprep.subr.bf16.mxu1 %v3174_v8  ;;  %v3213_v8 = vld [vmem:[%s4145_s9 + $0x68] sm:$0xff]  }
 0xd69   :  { %1961 = vmatpush1.bf16.msra.mxu1 %v3172_v10  ;;  %v3215_v10 = vld [vmem:[%s4145_s9 + $0x28] sm:$0xff]  }
 0xd6a   :  { %1962 = vmatprep.subr.bf16.mxu1 %v3180_v12  ;;  %v3217_v12 = vld [vmem:[%s4145_s9 + $0x70] sm:$0xff]  }
 0xd6d   :  { %1963 = vmatpush1.bf16.msra.mxu1 %v3178_v45  ;;  %v3219_v45 = vld [vmem:[%s4145_s9 + $0x30] sm:$0xff]  }
 0xd6e   :  { %1964 = vmatprep.subr.bf16.mxu1 %v3186_v15  ;;  %v3221_v15 = vld [vmem:[%s4145_s9 + $0x78] sm:$0xff]  }
 0xd71   :  { %1965 = vmatpush1.bf16.msra.mxu1 %v3184_v18  ;;  %v3223_v18 = vld [vmem:[%s4145_s9 + $0x38] sm:$0xff]  }
 0xd72   :  { %1966 = vmatprep.subr.bf16.mxu1 %v3192_v38  ;;  %v688_v38 = vld [vmem:[%s4146_s4] sm:$0xf] }
 0xd73   :  { %v1732_v23 = vrot.slane %v688_v38, %v3554_v44 }
 0xd75   :  { %1967 = vmatpush1.bf16.msra.mxu1 %v3190_v13  ;;  %v1740_v13 = vrot.slane %v688_v38, %v3670_v33 }
 0xd76   :  { %2871 = vmatprep.subr.bf16.mxu1 %v3194_v50 }
 0xde6   :  { %v1696_v62 = vpop.xlane.xlu0 %1695 }
 0xde7   :  { %v1698_v63 = vmul.f32 0.0078125, %v1696_v62  ;;  %v3204_v62 = vld [vmem:[%s4145_s9 + $0x90] sm:$0xff]  }
 0xde9   :  { %v1700_v0 = vsub.f32 %v3851_v47, %v1698_v63  ;;  %v3205_v63 = vld [vmem:[%s4145_s9 + $0x58] sm:$0xff]  }
 0xdea   :  { %v1704_v24 = vpop.xlane.xlu0 %1703 }
 0xdeb   :  { %v1702_v16 = vmul.f32 %v1700_v0, %v1700_v0  ;;  %v1707_v25 = vmul.f32 0.0078125, %v1704_v24  ;;  %v1736_v24 = vrot.slane %v688_v38, %v3562_v46 }
 0xded   :  { %1705 = vadd.xlane.f32.xlu0 %v1702_v16  ;;  %v1709_v19 = vadd.f32 1e-05, %v1707_v25  ;;  %v3207_v16 = vld [vmem:[%s4145_s9 + $0x18] sm:$0xff]   ;;  %v1744_v25 = vrot.slane %v688_v38, %v783_v37 }
 0xdef   :  { %3257 = vrsqrt.f32 %v1709_v19 }
 0xdf9   :  { %v3258_v29 = vpop.eup %3257 }
 0xdfa   :  { %v1713_v30 = vmul.f32 %v3258_v29, %v3848_v43  ;;  %v3193_v43 = vld [vmem:[%s4145_s9 + $0x40] sm:$0xff]  }
 0xdfb   :  { %2849 = vmatprep.subr.bf16.mxu0 %v3193_v43 }
 0xdfc   :  { %v1719_v39 = vmul.f32 %v1718_v32, %v1713_v30 }
 0xdfe   :  { %v1725_v26 = vadd.f32 %v1724_v40, %v1719_v39 }
 0xe7a   :  { %v1706_v27 = vpop.xlane.xlu0 %1705 }
 0xe7b   :  { %v1708_v28 = vmul.f32 0.0078125, %v1706_v27 }
 0xe7d   :  { %v1710_v20 = vadd.f32 1e-05, %v1708_v28 }
 0xe7f   :  { %3259 = vrsqrt.f32 %v1710_v20 }
 0xe89   :  { %v3260_v35 = vpop.eup %3259 }
 0xe8a   :  { %v1714_v36 = vmul.f32 %v3260_v35, %v1700_v0  ;;  %v3206_v0 = vld [vmem:[%s4145_s9 + $0xd8] sm:$0xff]  }
 0xe8c   :  { %v1720_v41 = vmul.f32 %v1718_v32, %v1714_v36 }
 0xe8e   :  { %v1726_v48 = vadd.f32 %v1724_v40, %v1720_v41 }
 0xe90   :  { %v1727_v49 = vpack.c.bf16 %v1726_v48, %v1725_v26 }
 0xe92   :  { %1942 = vmatmul.mubr.bf16.vlgmr.msra.gmra.mrb[32].mxu0 %v1727_v49  ;;  %1985 = vmatmul.mubr.bf16.vlgmr.msra.gmra.mrb[36].mxu1 %v1727_v49 }
 0xe93   :  { %2850 = vmatpush3.bf16.msra.mxu0 %v3195_v56  ;;  %2872 = vmatpush3.bf16.msra.mxu1 %v3196_v51 }
 0xe94   :  { %2851 = vmatprep.subr.bf16.mxu0 %v3197_v52  ;;  %2873 = vmatprep.subr.bf16.mxu1 %v3198_v54 }
 0xe97   :  { %2852 = vmatpush3.bf16.msra.mxu0 %v3199_v55  ;;  %2874 = vmatpush3.bf16.msra.mxu1 %v3200_v57 }
 0xe98   :  { %2853 = vmatprep.subr.bf16.mxu0 %v3201_v59  ;;  %2875 = vmatprep.subr.bf16.mxu1 %v3202_v60 }
 0xe9b   :  { %2854 = vmatpush3.bf16.msra.mxu0 %v3203_v61  ;;  %2876 = vmatpush3.bf16.msra.mxu1 %v3204_v62 }
 0xe9c   :  { %2855 = vmatprep.subr.bf16.mxu0 %v3205_v63  ;;  %2877 = vmatprep.subr.bf16.mxu1 %v3206_v0 }
 0xe9f   :  { %2856 = vmatpush3.bf16.msra.mxu0 %v3207_v16  ;;  %2878 = vmatpush3.bf16.msra.mxu1 %v3208_v1 }
 0xea0   :  { %2857 = vmatprep.subr.bf16.mxu0 %v3209_v3  ;;  %2879 = vmatprep.subr.bf16.mxu1 %v3210_v4 }
 0xea3   :  { %2858 = vmatpush3.bf16.msra.mxu0 %v3211_v5  ;;  %2880 = vmatpush3.bf16.msra.mxu1 %v3212_v6 }
 0xea4   :  { %2859 = vmatprep.subr.bf16.mxu0 %v3213_v8  ;;  %2881 = vmatprep.subr.bf16.mxu1 %v3214_v9 }
 0xea7   :  { %2860 = vmatpush3.bf16.msra.mxu0 %v3215_v10  ;;  %2882 = vmatpush3.bf16.msra.mxu1 %v3216_v11 }
 0xea8   :  { %2861 = vmatprep.subr.bf16.mxu0 %v3217_v12  ;;  %2883 = vmatprep.subr.bf16.mxu1 %v3218_v2 }
 0xeab   :  { %2862 = vmatpush3.bf16.msra.mxu0 %v3219_v45  ;;  %2884 = vmatpush3.bf16.msra.mxu1 %v3220_v53 }
 0xeac   :  { %2863 = vmatprep.subr.bf16.mxu0 %v3221_v15  ;;  %2885 = vmatprep.subr.bf16.mxu1 %v3222_v17 }
 0xeaf   :  { %2864 = vmatpush3.bf16.msra.mxu0 %v3223_v18  ;;  %2886 = vmatpush3.bf16.msra.mxu1 %v3224_v22 }
 0xeb0   :  { %3028 = vmatprep.subr.bf16.mxu1 %v3298_v58 }
 0xf65   :  { %v1943_v19 = vpop.f32.mrb[32].mxu0  ;;  %v1986_v27 = vpop.f32.mrb[36].mxu1 }
 0xf66   :  { %v4068_v28 = vadd.f32 %v1943_v19, %v1732_v23  ;;  %v4070_v20 = vadd.f32 %v1986_v27, %v1740_v13  ;;  %v1945_v21 = vpop.f32.mrb[33].mxu0  ;;  %v1988_v29 = vpop.f32.mrb[37].mxu1 }
 0xf67   :  { %v4072_v30 = vadd.f32 %v1945_v21, %v1736_v24  ;;  %v4074_v32 = vadd.f32 %v1988_v29, %v1744_v25  ;;  %v1947_v34 = vpop.f32.mrb[34].mxu0  ;;  %v1990_v35 = vpop.f32.mrb[38].mxu1 }
 0xf68   :  { %v2688_v33 = vmul.f32 -1.702, %v4068_v28  ;;  %v2690_v36 = vmul.f32 -1.702, %v4070_v20  ;;  %v1948_v39 = vadd.f32 %v1947_v34, %v1732_v23  ;;  %v1991_v37 = vadd.f32 %v1990_v35, %v1740_v13  ;;  %v1949_v40 = vpop.f32.mrb[35].mxu0  ;;  %v1992_v41 = vpop.f32.mrb[39].mxu1 }
 0xf69   :  { %v2689_v26 = vmul.f32 -1.702, %v4072_v30  ;;  %v2691_v48 = vmul.f32 -1.702, %v4074_v32  ;;  %v1950_v49 = vadd.f32 %v1949_v40, %v1736_v24  ;;  %v1993_v43 = vadd.f32 %v1992_v41, %v1744_v25 }
 0xf6a   :  { %v2011_v50 = vmul.f32 1.442695, %v2688_v33  ;;  %v2015_v56 = vmul.f32 1.442695, %v2690_v36  ;;  %v2692_v51 = vmul.f32 -1.702, %v1948_v39 }
 0xf6b   :  { %v2013_v52 = vmul.f32 1.442695, %v2689_v26  ;;  %v2017_v54 = vmul.f32 1.442695, %v2691_v48  ;;  %v2694_v55 = vmul.f32 -1.702, %v1991_v37 }
 0xf6c   :  { %3261 = vpow2.f32 %v2011_v50  ;;  %v2019_v57 = vmul.f32 1.442695, %v2692_v51  ;;  %v2693_v59 = vmul.f32 -1.702, %v1950_v49  ;;  %v2695_v60 = vmul.f32 -1.702, %v1993_v43 }
 0xf6d   :  { %3263 = vpow2.f32 %v2015_v56  ;;  %v2023_v61 = vmul.f32 1.442695, %v2694_v55 }
 0xf6e   :  { %3265 = vpow2.f32 %v2013_v52  ;;  %v2021_v62 = vmul.f32 1.442695, %v2693_v59  ;;  %v2025_v63 = vmul.f32 1.442695, %v2695_v60 }
 0xf6f   :  { %3267 = vpow2.f32 %v2017_v54 }
 0xf70   :  { %3269 = vpow2.f32 %v2019_v57 }
 0xf71   :  { %3271 = vpow2.f32 %v2023_v61 }
 0xf72   :  { %3273 = vpow2.f32 %v2021_v62  ;;  %v2345_v62 = vmul.u32 8, %v3551_v42 }
 0xf73   :  { %3275 = vpow2.f32 %v2025_v63 }
 0xf74   :  { %vm2346_vm5 = vcmp.eq.s32.totalorder %v3705_v14, %v2345_v62  ;;  %v3226_v14 = vld [vmem:[%s4147_s10 + $0x8] sm:$0xff]  }
 0xf76   :  { %v3262_v0 = vpop.eup %3261 }
 0xf77   :  { %v3264_v16 = vpop.eup %3263  ;;  %v2027_v1 = vadd.f32 1.0, %v3262_v0 }
 0xf78   :  { %v3266_v3 = vpop.eup %3265  ;;  %v2029_v4 = vadd.f32 1.0, %v3264_v16 }
 0xf79   :  { %v3268_v5 = vpop.eup %3267  ;;  %3277 = vrcp.f32 %v2027_v1  ;;  %v2028_v6 = vadd.f32 1.0, %v3266_v3  ;;  %v2728_v1 = vsel %vm2346_vm5, 1.0, %v3298_v58 }
 0xf7a   :  { %v3270_v8 = vpop.eup %3269  ;;  %3279 = vrcp.f32 %v2029_v4  ;;  %v2030_v9 = vadd.f32 1.0, %v3268_v5 }
 0xf7b   :  { %v3272_v10 = vpop.eup %3271  ;;  %3281 = vrcp.f32 %v2028_v6  ;;  %v2031_v11 = vadd.f32 1.0, %v3270_v8 }
 0xf7c   :  { %v3274_v12 = vpop.eup %3273  ;;  %3283 = vrcp.f32 %v2030_v9  ;;  %v2033_v2 = vadd.f32 1.0, %v3272_v10  ;;  %v3227_v10 = vld [vmem:[%s4147_s10 + $0x10] sm:$0xff]  }
 0xf7d   :  { %v3276_v45 = vpop.eup %3275  ;;  %3285 = vrcp.f32 %v2031_v11  ;;  %v2032_v53 = vadd.f32 1.0, %v3274_v12  ;;  %v3228_v11 = vld [vmem:[%s4147_s10 + $0x18] sm:$0xff]   ;;  %v3229_v12 = vld [vmem:[%s4147_s10 + $0x20] sm:$0xff]  }
 0xf7e   :  { %3287 = vrcp.f32 %v2033_v2  ;;  %v2034_v15 = vadd.f32 1.0, %v3276_v45  ;;  %v3230_v2 = vld [vmem:[%s4147_s10 + $0x28] sm:$0xff]   ;;  %v3231_v45 = vld [vmem:[%s4147_s10 + $0x30] sm:$0xff]  }
 0xf7f   :  { %3289 = vrcp.f32 %v2032_v53  ;;  %v3232_v53 = vld [vmem:[%s4147_s10 + $0x38] sm:$0xff]  }
 0xf80   :  { %3291 = vrcp.f32 %v2034_v15 }
 0xf83   :  { %v3278_v17 = vpop.eup %3277 }
 0xf84   :  { %v3280_v18 = vpop.eup %3279  ;;  %v2051_v24 = vmul.f32 %v3278_v17, %v4068_v28  ;;  %v3303_v28 = vmov 0.0|0.0  }
 0xf85   :  { %v3282_v22 = vpop.eup %3281  ;;  %v2053_v27 = vmul.f32 %v3280_v18, %v4070_v20  ;;  %3048 = vmatprep.subr.bf16.mxu0 %v3303_v28  ;;  %v2065_v20 = vsub.s32 7, %v3551_v42  ;;  %v3225_v42 = vld [vmem:[%s4147_s10] sm:$0xff]  }
 0xf86   :  { %v3284_v38 = vpop.eup %3283  ;;  %v2052_v34 = vmul.f32 %v3282_v22, %v4072_v30  ;;  %v40_v22 = vld [vmem:[%s4140_s2 + $0x8] sm:$0x3] }
 0xf87   :  { %v3286_v23 = vpop.eup %3285  ;;  %v2054_v36 = vmul.f32 %v3284_v38, %v4074_v32  ;;  %v2066_v32 = vrot.slane %v3958_v31, %v2065_v20  ;;  %v2440_v38 = vrot.slane %v40_v22, %v3554_v44 }
 0xf88   :  { %v3288_v13 = vpop.eup %3287  ;;  %v2055_v25 = vmul.f32 %v3286_v23, %v1948_v39 }
 0xf89   :  { %v3290_v19 = vpop.eup %3289  ;;  %v2057_v21 = vmul.f32 %v3288_v13, %v1991_v37 }
 0xf8a   :  { %v3292_v29 = vpop.eup %3291  ;;  %v2059_v35 = vpack.c.bf16 %v2055_v25, %v2051_v24  ;;  %v2056_v33 = vmul.f32 %v3290_v19, %v1950_v49  ;;  %v2445_v24 = vrot.slane %v40_v22, %v3562_v46 }
 0xf8b   :  { %v2061_v40 = vpack.c.bf16 %v2057_v21, %v2053_v27  ;;  %v2058_v41 = vmul.f32 %v3292_v29, %v1993_v43 }
 0xf8c   :  { %v2060_v26 = vpack.c.bf16 %v2056_v33, %v2052_v34 }
 0xf8d   :  { %v2062_v48 = vpack.c.bf16 %v2058_v41, %v2054_v36 }
 0xf8e   :  { %2291 = vmatprep.mubr.bf16.mxu0 %v2060_v26 }
 0xf8f   :  { %2332 = vmatprep.mubr.bf16.mxu1 %v2062_v48  ;;  %2292 = vmatmul.mubr.bf16.vlgmr.msra.gmra.mrb[36].mxu0 %v2059_v35 }
 0xf90   :  { %2333 = vmatmul.mubr.bf16.vlgmr.msra.gmra.mrb[40].mxu1 %v2061_v40  ;;  %3025 = vmatprep.mubr.msk.f32.mxu0 %vm3300_vm0, %v3298_v58 }
 0xf91   :  { %3044 = vmatprep.mubr.msk.bf16.mxu1 %vm3300_vm0, %v3298_v58  ;;  %3029 = vmatpush3.bf16.msra.mxu1 %v3225_v42 }
 0xf92   :  { %3030 = vmatprep.subr.bf16.mxu1 %v3298_v58 }
 0xf95   :  { %3031 = vmatpush3.bf16.msra.mxu1 %v3226_v14 }
 0xf96   :  { %3032 = vmatprep.subr.bf16.mxu1 %v3298_v58 }
 0xf99   :  { %3033 = vmatpush3.bf16.msra.mxu1 %v3227_v10 }
 0xf9a   :  { %3034 = vmatprep.subr.bf16.mxu1 %v3298_v58 }
 0xf9d   :  { %3035 = vmatpush3.bf16.msra.mxu1 %v3228_v11 }
 0xf9e   :  { %3036 = vmatprep.subr.bf16.mxu1 %v3298_v58 }
 0xfa1   :  { %3037 = vmatpush3.bf16.msra.mxu1 %v3229_v12 }
 0xfa2   :  { %3038 = vmatprep.subr.bf16.mxu1 %v3298_v58 }
 0xfa5   :  { %3039 = vmatpush3.bf16.msra.mxu1 %v3230_v2 }
 0xfa6   :  { %3040 = vmatprep.subr.bf16.mxu1 %v3298_v58 }
 0xfa9   :  { %3041 = vmatpush3.bf16.msra.mxu1 %v3231_v45 }
 0xfaa   :  { %3042 = vmatprep.subr.bf16.mxu1 %v3298_v58 }
 0xfad   :  { %3043 = vmatpush3.bf16.msra.mxu1 %v3232_v53 }
0x1062   :  { %v2865_v30 = vpop.f32.mrb[36].mxu0 }
0x1063   :  { %v2887_v39 = vpop.f32.mrb[40].mxu1  ;;  %v2866_v37 = vpop.f32.mrb[37].mxu0 }
0x1064   :  { %v2867_v49 = vadd.f32 %v2866_v37, %v2865_v30  ;;  %v2888_v43 = vpop.f32.mrb[41].mxu1  ;;  %v2868_v50 = vpop.f32.mrb[38].mxu0 }
0x1065   :  { %v2889_v56 = vadd.f32 %v2888_v43, %v2887_v39  ;;  %v2890_v51 = vpop.f32.mrb[42].mxu1  ;;  %v2869_v52 = vpop.f32.mrb[39].mxu0 }
0x1066   :  { %v2294_v54 = vadd.f32 %v2867_v49, %v2066_v32  ;;  %v2870_v55 = vadd.f32 %v2869_v52, %v2868_v50  ;;  %v2891_v57 = vpop.f32.mrb[43].mxu1 }
0x1067   :  { %v2892_v59 = vadd.f32 %v2891_v57, %v2890_v51 }
0x1068   :  { %v2335_v60 = vadd.f32 %v2889_v56, %v2294_v54  ;;  %v2297_v61 = vadd.f32 %v2870_v55, %v2066_v32 }
0x106a   :  { %v2338_v63 = vadd.f32 %v2892_v59, %v2297_v61  ;;  %v2341_v0 = vadd.f32 %v2335_v60, %v3825_v7 }
0x106c   :  { %v2342_v31 = vadd.f32 %v2338_v63, %v3851_v47 }
0x106e   :  { %v3049_v16 = vpack.c.bf16 %v2342_v31, %v2341_v0 }
0x1070   :  { %3050 = vmatpush3.bf16.msra.mxu0 %v3049_v16 }
0x1073   :  { %3026 = vmatmul.mubr.msk.f32.vlgmr.msra.gmra.mrb[40].mxu0 %vm2349_vm6, %v2728_v1 }
0x1146   :  { %v2419_v3 = vpop.f32.mrb[40].mxu0 }
0x1147   :  { %v2424_v4 = vsel %vm2423_vm7, %v2419_v3, 0.0  ;;  %v3027_v5 = vpop.f32.mrb[41].mxu0 }
0x1148   :  { %2425 = vadd.xlane.f32.xlu1 %v2424_v4 }
0x11d5   :  { %v2426_v7 = vpop.xlane.xlu1 %2425 }
0x11d6   :  { %v2427_v47 = vmul.f32 0.0078125, %v2426_v7 }
0x11d8   :  { %v2428_v6 = vsub.f32 %v2419_v3, %v2427_v47 }
0x11da   :  { %v2429_v8 = vmul.f32 %v2428_v6, %v2428_v6 }
0x11dc   :  { %v2430_v9 = vsel %vm2423_vm7, %v2429_v8, 0.0 }
0x11dd   :  { %2431 = vadd.xlane.f32.xlu0 %v2430_v9 }
0x126a   :  { %v2432_v15 = vpop.xlane.xlu0 %2431 }
0x126b   :  { %v2433_v17 = vmul.f32 0.0078125, %v2432_v15 }
0x126d   :  { %v2434_v18 = vadd.f32 1e-05, %v2433_v17 }
0x126f   :  { %3293 = vrsqrt.f32 %v2434_v18 }
0x1279   :  { %v3294_v23 = vpop.eup %3293 }
0x127a   :  { %v2436_v13 = vmul.f32 %v3294_v23, %v2428_v6 }
0x127c   :  { %v2441_v25 = vmul.f32 %v2440_v38, %v2436_v13 }
0x127e   :  { %v2446_v19 = vadd.f32 %v2445_v24, %v2441_v25 }
0x1280   :  { %v2447_v27 = vpack.c.bf16 %v2446_v19, %v2446_v19 }
0x1282   :  { %3045 = vmatmul.mubr.bf16.vlgmr.msra.gmra.mrb[44].mxu1 %v2447_v27 }
0x1355   :  { %v2546_v58 = vpop.f32.mrb[44].mxu1 }
0x1356   :  { %v2552_v21 = vmul.f32 %v2546_v58, %v2546_v58  ;;  %v3046_v29 = vpop.f32.mrb[45].mxu1 }
0x1357   :  { %v2549_v34 = vpop.f32.mrb[46].mxu1 }
0x1358   :  { %v3047_v35 = vpop.f32.mrb[47].mxu1  ;;  %v2553_v33 = vsel %vm2423_vm7, %v2552_v21, 0.0 }
0x1359   :  { %2554 = vadd.xlane.f32.xlu0 %v2553_v33 }
0x13e6   :  { %v2555_v36 = vpop.xlane.xlu0 %2554 }
0x13e7   :  { %v2556_v40 = vmax.f32 %v2555_v36, 1e-12 }
0x13e9   :  { %3295 = vrsqrt.f32 %v2556_v40 }
0x13f3   :  { %v3296_v44 = vpop.eup %3295 }
0x13f4   :  { %v2558_v41 = vmul.f32 %v3296_v44, %v2546_v58 }
0x13f6   :  { %2559 = vst [vmem:[%s4148_s11] sm:$0x3] %v2558_v41 }

// kernel: rgcl_clip_forward.3
= control target key start
LH: loop header
LB: loop body
LE: loop exit
PB: predicated region body
PF: predicated region fallthrough
CT: control target
= control target key end

     0   :  { %s7597_s0 = inlined_call_operand.vmem [shape: f32[16,128], index: 0, kind: input, shape index: {}]   ;;  %s7598_s1 = inlined_call_operand.vmem [shape: f32[2,8], index: 1, kind: input, shape index: {}]   ;;  %s7599_s2 = inlined_call_operand.vmem [shape: f32[2,16], index: 2, kind: input, shape index: {}]   ;;  %s7600_s3 = inlined_call_operand.vmem [shape: f32[2,128], index: 3, kind: input, shape index: {}]   ;;  %s7601_s4 = inlined_call_operand.vmem [shape: f32[8,128], index: 4, kind: input, shape index: {}]   ;;  %s7602_s5 = inlined_call_operand.vmem [shape: f32[1,384], index: 5, kind: input, shape index: {}]   ;;  %s7603_s6 = inlined_call_operand.vmem [shape: f32[1,512], index: 6, kind: input, shape index: {}]   ;;  %s7604_s7 = inlined_call_operand.vmem [shape: bf16[128,384], index: 7, kind: input, shape index: {}]   ;;  %s7605_s8 = inlined_call_operand.vmem [shape: bf16[128,128], index: 8, kind: input, shape index: {}]   ;;  %s7606_s9 = inlined_call_operand.vmem [shape: bf16[128,512], index: 9, kind: input, shape index: {}]   ;;  %s7607_s10 = inlined_call_operand.vmem [shape: bf16[512,128], index: 10, kind: input, shape index: {}]   ;;  %s7608_s11 = inlined_call_operand.vmem [shape: bf16[128,128], index: 11, kind: input, shape index: {}]   ;;  %s7609_s12 = inlined_call_operand.vmem [shape: bf16[128,768], index: 12, kind: input, shape index: {}]   ;;  %s7610_s13 = inlined_call_operand.vmem [shape: f32[3,768], index: 13, kind: input, shape index: {}]   ;;  %s7611_s14 = inlined_call_operand.vmem [shape: bf16[768,512], index: 14, kind: input, shape index: {}]   ;;  %s7612_s15 = inlined_call_operand.vmem [shape: f32[3,512], index: 15, kind: input, shape index: {}]   ;;  %s7613_s16 = inlined_call_operand.vmem [shape: bf16[512,128], index: 16, kind: input, shape index: {}]   ;;  %s7614_s17 = inlined_call_operand.vmem [shape: f32[1,128], index: 17, kind: input, shape index: {}]   ;;  %s7615_s18 = inlined_call_operand.hbm [shape: f32[2,128], index: 18, kind: output, shape index: {0}]   ;;  %s7616_s19 = inlined_call_operand.hbm [shape: f32[2,128], index: 19, kind: output, shape index: {1}]   ;;  %s7617_s20 = inlined_call_operand.hbm [shape: f32[2,128], index: 20, kind: output, shape index: {2}]  }
   0x1   :  { %7620 = sst [smem:[#allocation9_spill]] %s7597_s0 }
   0x2   :  { %7621 = sst [smem:[#allocation10_spill]] %s7598_s1 }
   0x3   :  { %7622 = sst [smem:[#allocation11_spill]] %s7599_s2 }
   0x4   :  { %7623 = sst [smem:[#allocation12_spill]] %s7600_s3 }
   0x5   :  { %7624 = sst [smem:[#allocation13_spill]] %s7601_s4 }
   0x6   :  { %26 = vsyncpa [#allocation3], 0  ;;  %s7625_s23 = sld [smem:[#allocation9_spill]]  ;;  %v5275_v2 = vld [vmem:[%s7604_s7 + $0x4] ss:$12 sps:$4 sm:$0xff]   ;;  %v5928_v4 = vmov 0.0  }
   0x7   :  { %v5277_v3 = vld [vmem:[%s7604_s7] ss:$12 sps:$4 sm:$0xff]   ;;  %5100 = vmatprep.subr.bf16.mxu1 %v5928_v4  ;;  %v5278_v5 = vld [vmem:[%s7604_s7 + $0x8] ss:$12 sps:$4 sm:$0xff]   ;;  %416 = vmatprep.subr.bf16.mxu0 %v5275_v2 }
   0x8   :  { %v5279_v6 = vld [vmem:[%s7604_s7 + $0x1c] ss:$12 sps:$4 sm:$0xff]   ;;  %417 = vmatpush1.bf16.msra.mxu0 %v5277_v3  ;;  %5101 = vmatpush3.bf16.msra.mxu1 %v5278_v5 }
   0x9   :  { %418 = vmatprep.subr.bf16.mxu0 %v5279_v6  ;;  %5102 = vmatprep.subr.bf16.mxu1 %v5928_v4 }
   0xc   :  { %v66_v0 = vld [vmem:[%s7625_s23] sm:$0xff]  ;;  %v67_v1 = vld [vmem:[%s7625_s23 + $0x8] sm:$0xff] }
   0xd   :  { %236 = vadd.xlane.f32.xlu0 %v66_v0 }
  0x11   :  { %238 = vadd.xlane.f32.xlu0 %v67_v1 }
  0x9a   :  { %v237_v7 = vpop.xlane.xlu0 %236 }
  0x9b   :  { %v241_v8 = vmul.f32 0.0078125, %v237_v7 }
  0x9d   :  { %v6062_v9 = vsub.f32 %v66_v0, %v241_v8 }
  0x9e   :  { %v239_v10 = vpop.xlane.xlu0 %238 }
  0x9f   :  { %v242_v11 = vmul.f32 0.0078125, %v239_v10  ;;  %v245_v12 = vmul.f32 %v6062_v9, %v6062_v9 }
  0xa1   :  { %v6066_v13 = vsub.f32 %v67_v1, %v242_v11  ;;  %247 = vadd.xlane.f32.xlu1 %v245_v12 }
  0xa3   :  { %v246_v14 = vmul.f32 %v6066_v13, %v6066_v13 }
  0xa5   :  { %249 = vadd.xlane.f32.xlu1 %v246_v14 }
  0xa6   :  { %27 = vsyncpa [#allocation5], 0  ;;  %v5281_v15 = vld [vmem:[%s7604_s7 + $0x18] ss:$12 sps:$4 sm:$0xff]   ;;  %v5282_v16 = vld [vmem:[%s7604_s7 + $0x20] ss:$12 sps:$4 sm:$0xff]   ;;  %v68_v40 = vlaneseq }
  0xa7   :  { %419 = vmatpush1.bf16.msra.mxu0 %v5281_v15  ;;  %5103 = vmatpush3.bf16.msra.mxu1 %v5282_v16  ;;  %v5283_v17 = vld [vmem:[%s7604_s7 + $0x34] ss:$12 sps:$4 sm:$0xff]   ;;  %v5285_v18 = vld [vmem:[%s7604_s7 + $0x30] ss:$12 sps:$4 sm:$0xff]   ;;  %v5286_v19 = vld [vmem:[%s7604_s7 + $0x38] ss:$12 sps:$4 sm:$0xff]  }
  0xa8   :  { %5104 = vmatprep.subr.bf16.mxu1 %v5928_v4  ;;  %420 = vmatprep.subr.bf16.mxu0 %v5283_v17  ;;  %v5287_v20 = vld [vmem:[%s7604_s7 + $0x4c] ss:$12 sps:$4 sm:$0xff]   ;;  %v5289_v21 = vld [vmem:[%s7604_s7 + $0x48] ss:$12 sps:$4 sm:$0xff]   ;;  %v5290_v22 = vld [vmem:[%s7604_s7 + $0x50] ss:$12 sps:$4 sm:$0xff]  }
  0xa9   :  { %v5291_v23 = vld [vmem:[%s7604_s7 + $0x64] ss:$12 sps:$4 sm:$0xff]   ;;  %v5293_v24 = vld [vmem:[%s7604_s7 + $0x60] ss:$12 sps:$4 sm:$0xff]   ;;  %v5294_v25 = vld [vmem:[%s7604_s7 + $0x68] ss:$12 sps:$4 sm:$0xff]  }
  0xaa   :  { %v5295_v26 = vld [vmem:[%s7604_s7 + $0x7c] ss:$12 sps:$4 sm:$0xff]   ;;  %v5297_v27 = vld [vmem:[%s7604_s7 + $0x78] ss:$12 sps:$4 sm:$0xff]   ;;  %v5298_v28 = vld [vmem:[%s7604_s7 + $0x80] ss:$12 sps:$4 sm:$0xff]  }
  0xab   :  { %421 = vmatpush1.bf16.msra.mxu0 %v5285_v18  ;;  %5105 = vmatpush3.bf16.msra.mxu1 %v5286_v19  ;;  %v5299_v29 = vld [vmem:[%s7604_s7 + $0x94] ss:$12 sps:$4 sm:$0xff]   ;;  %v5929_v30 = vmov 0   ;;  %vm5930_vm0 = vmmov 0   ;;  %v5301_v31 = vld [vmem:[%s7604_s7 + $0x90] ss:$12 sps:$4 sm:$0xff]  }
  0xac   :  { %5106 = vmatprep.subr.bf16.mxu1 %v5928_v4  ;;  %422 = vmatprep.subr.bf16.mxu0 %v5287_v20  ;;  %v5302_v32 = vld [vmem:[%s7604_s7 + $0x98] ss:$12 sps:$4 sm:$0xff]   ;;  %v5305_v34 = vld [vmem:[%s7604_s7 + $0xa8] ss:$12 sps:$4 sm:$0xff]   ;;  %v5306_v35 = vld [vmem:[%s7604_s7 + $0xb0] ss:$12 sps:$4 sm:$0xff]  }
  0xad   :  { %448 = vmatprep.mubr.bf16.mxu0 %v5929_v30  ;;  %5116 = vmatprep.mubr.msk.bf16.mxu1 %vm5930_vm0, %v5928_v4  ;;  %v5303_v33 = vld [vmem:[%s7604_s7 + $0xac] ss:$12 sps:$4 sm:$0xff]   ;;  %v6142_v43 = vshrl.u32 %v68_v40, 7  ;;  %s7626_s30 = sld [smem:[#allocation13_spill]]  ;;  %v122_v59 = vld [vmem:[%s7602_s5] sm:$0x7] }
  0xae   :  { %vm568_vm1 = vcmask 1043456   ;;  %vm505_vm2 = vcmask 523264   ;;  %s5931_s5 = smov 64   ;;  %s7627_s24 = sld [smem:[#allocation10_spill]]  ;;  %vm552_vm7 = vcmask 64512   ;;  %vm1828_vm10 = vcmask 130048  }
  0xaf   :  { %423 = vmatpush1.bf16.msra.mxu0 %v5289_v21  ;;  %5107 = vmatpush3.bf16.msra.mxu1 %v5290_v22  ;;  %v6145_v44 = vsub.s32 0, %v6142_v43  ;;  %v6153_v47 = vsub.s32 1, %v6142_v43  ;;  %v6166_v58 = vsub.s32 2, %v6142_v43  ;;  %s7628_s1 = sld [smem:[#allocation11_spill]]  ;;  %vm1902_vm11 = vcmask 1041408   ;;  %s7629_s21 = sld [smem:[#allocation12_spill]] }
  0xb0   :  { %5108 = vmatprep.subr.bf16.mxu1 %v5928_v4  ;;  %424 = vmatprep.subr.bf16.mxu0 %v5291_v23  ;;  %s5935_s7 = smov [#allocation2]  }
  0xb1   :  { %v276_v60 = vrot.slane %v122_v59, %v6145_v44  ;;  %v284_v61 = vrot.slane %v122_v59, %v6166_v58  ;;  %v280_v62 = vrot.slane %v122_v59, %v6153_v47  ;;  %s4522_s29 = sshll.u32 %s5935_s7, 4  ;;  %s4523_s29 = int_to_ptr.vmem [resolvable:$true] %s4522_s29 }
  0xb3   :  { %425 = vmatpush1.bf16.msra.mxu0 %v5293_v24  ;;  %5109 = vmatpush3.bf16.msra.mxu1 %v5294_v25  ;;  %v6150_v45 = vld [vmem:[%s7626_s30] sm:$0xff]  ;;  %v6199_v25 = vand.u32 127, %v68_v40 }
  0xb4   :  { %426 = vmatprep.subr.bf16.mxu0 %v5295_v26  ;;  %5110 = vmatprep.subr.bf16.mxu1 %v5928_v4  ;;  %v262_v49 = vrot.slane %v6150_v45, %v6145_v44  ;;  %v268_v53 = vrot.slane %v6150_v45, %v6153_v47  ;;  %v73_v23 = vld [vmem:[%s7627_s24] sm:$0x3] }
  0xb5   :  { %vm74_vm3 = vcmp.gt.f32.partialorder %v73_v23, 0.0  ;;  %vm72_vm4 = vcmp.le.s32.totalorder %v6199_v25, %v6142_v43 }
  0xb6   :  { %v6196_v24 = vsel %vm74_vm3, 1, %v5929_v30 }
  0xb7   :  { %427 = vmatpush1.bf16.msra.mxu0 %v5297_v27  ;;  %5111 = vmatpush3.bf16.msra.mxu1 %v5298_v28  ;;  %v79_v26 = vrot.slane %v6196_v24, %v6145_v44  ;;  %v5932_v27 = vmov -1e+09  }
  0xb8   :  { %428 = vmatprep.subr.bf16.mxu0 %v5299_v29  ;;  %5112 = vmatprep.subr.bf16.mxu1 %v5928_v4 }
  0xb9   :  { %vm80_vm5 = vcmp.eq.s32.totalorder %v79_v26, 1 }
  0xba   :  { %vm81_vm6 = vmand %vm72_vm4, %vm80_vm5 }
  0xbb   :  { %429 = vmatpush1.bf16.msra.mxu0 %v5301_v31  ;;  %5113 = vmatpush3.bf16.msra.mxu1 %v5302_v32  ;;  %v82_v28 = vsel %vm81_vm6, 0.0, %v5932_v27 }
  0xbc   :  { %430 = vmatprep.subr.bf16.mxu0 %v5303_v33  ;;  %5114 = vmatprep.subr.bf16.mxu1 %v5928_v4 }
  0xbf   :  { %431 = vmatpush1.bf16.msra.mxu0 %v5305_v34  ;;  %5115 = vmatpush3.bf16.msra.mxu1 %v5306_v35 }
  0xc0   :  { %5126 = vmatprep.subr.bf16.mxu1 %v5928_v4  ;;  %5120 = vmatprep.subr.bf16.mxu0 %v5928_v4 }
 0x12e   :  { %v248_v36 = vpop.xlane.xlu1 %247 }
 0x12f   :  { %v251_v37 = vmul.f32 0.0078125, %v248_v36 }
 0x131   :  { %v253_v38 = vadd.f32 1e-05, %v251_v37 }
 0x132   :  { %v250_v39 = vpop.xlane.xlu1 %249 }
 0x133   :  { %5795 = vrsqrt.f32 %v253_v38  ;;  %v252_v41 = vmul.f32 0.0078125, %v250_v39 }
 0x135   :  { %v254_v42 = vadd.f32 1e-05, %v252_v41 }
 0x137   :  { %5797 = vrsqrt.f32 %v254_v42 }
 0x13d   :  { %v5796_v46 = vpop.eup %5795 }
 0x13e   :  { %v257_v48 = vmul.f32 %v5796_v46, %v6062_v9 }
 0x140   :  { %v263_v52 = vmul.f32 %v262_v49, %v257_v48 }
 0x141   :  { %v5798_v50 = vpop.eup %5797 }
 0x142   :  { %v258_v51 = vmul.f32 %v5798_v50, %v6066_v13  ;;  %v269_v55 = vadd.f32 %v268_v53, %v263_v52 }
 0x144   :  { %v264_v54 = vmul.f32 %v262_v49, %v258_v51 }
 0x146   :  { %v270_v56 = vadd.f32 %v268_v53, %v264_v54 }
 0x148   :  { %v271_v57 = vpack.c.bf16 %v270_v56, %v269_v55 }
 0x14a   :  { %449 = vmatmul.mubr.bf16.vlgmr.msra.gmra.mrb[0].mxu0 %v271_v57  ;;  %5117 = vmatmul.mubr.bf16.vlgmr.msra.gmra.mrb[0].mxu1 %v271_v57 }
 0x14b   :  { %5122 = vmatprep.mubr.msk.bf16.mxu0 %vm5930_vm0, %v5928_v4  ;;  %5128 = vmatprep.mubr.msk.bf16.mxu1 %vm5930_vm0, %v5928_v4 }
 0x21d   :  { %v450_v63 = vpop.f32.mrb[0].mxu0  ;;  %v493_v0 = vpop.f32.mrb[0].mxu1 }
 0x21e   :  { %v451_v1 = vadd.f32 %v450_v63, %v276_v60  ;;  %v494_v2 = vadd.f32 %v493_v0, %v284_v61  ;;  %v452_v3 = vpop.f32.mrb[1].mxu0  ;;  %v5118_v5 = vpop.f32.mrb[1].mxu1 }
 0x21f   :  { %v453_v6 = vadd.f32 %v452_v3, %v280_v62  ;;  %v454_v7 = vpop.f32.mrb[2].mxu0  ;;  %v496_v8 = vpop.f32.mrb[2].mxu1  ;;  %v5312_v3 = vld [vmem:[%s7605_s8 + $0x28] sm:$0xff]   ;;  %v5313_v5 = vld [vmem:[%s7605_s8 + $0x30] sm:$0xff]  }
 0x220   :  { %v500_v9 = vmul.f32 0.125, %v451_v1  ;;  %v504_v10 = vpack.c.bf16 %v494_v2, %v494_v2  ;;  %v6174_v11 = vadd.f32 %v454_v7, %v276_v60  ;;  %v6176_v12 = vadd.f32 %v496_v8, %v284_v61  ;;  %v456_v13 = vpop.f32.mrb[3].mxu0  ;;  %v5119_v14 = vpop.f32.mrb[3].mxu1  ;;  %v5311_v2 = vld [vmem:[%s7605_s8 + $0x20] sm:$0xff]  }
 0x221   :  { %v503_v15 = vpack.c.bf16 %v453_v6, %v453_v6  ;;  %v457_v16 = vadd.f32 %v456_v13, %v280_v62  ;;  %v5314_v6 = vld [vmem:[%s7605_s8 + $0x38] sm:$0xff]   ;;  %v6251_v13 = vld [vmem:[%s7605_s8 + $0x8] sm:$0xff]   ;;  %v6260_v14 = vld [vmem:[%s7605_s8 + $0x10] sm:$0xff]  }
 0x222   :  { %v502_v17 = vpack.c.bf16 %v500_v9, %v500_v9  ;;  %v570_v18 = vsel %vm568_vm1, %v504_v10, 0  ;;  %v501_v56 = vmul.f32 0.125, %v6174_v11 }
 0x223   :  { %v510_v19 = vsel %vm505_vm2, %v503_v15, 0  ;;  %5127 = vmatpush3.bf16.msra.mxu1 %v570_v18  ;;  %617 = vrot.lane.b32.xlu0 %v503_v15, %s5931_s5  ;;  %v862_v57 = vpack.c.bf16 %v457_v16, %v457_v16  ;;  %v6267_v15 = vld [vmem:[%s7605_s8 + $0x18] sm:$0xff]   ;;  %v6274_v16 = vpack.c.bf16 %v6176_v12, %v6176_v12 }
 0x224   :  { %5121 = vmatpush3.bf16.xpose.msra.mxu0 %v510_v19  ;;  %614 = vrot.lane.b32.xlu1 %v502_v17, %s5931_s5  ;;  %v6216_v59 = vpack.c.bf16 %v501_v56, %v501_v56 }
 0x225   :  { %5132 = vmatprep.subr.bf16.mxu0 %v5928_v4  ;;  %5138 = vmatprep.subr.bf16.mxu1 %v5928_v4 }
 0x22b   :  { %5123 = vmatmul.mubr.msk.bf16.vlgmr.msra.gmra.mrb[4].mxu0 %vm505_vm2, %v502_v17 }
 0x22c   :  { %5134 = vmatprep.mubr.msk.bf16.mxu0 %vm5930_vm0, %v5928_v4 }
 0x295   :  { %v618_v20 = vpop.permute.xlu0 %617 }
 0x296   :  { %v623_v21 = vsel %vm505_vm2, %v618_v20, 0  ;;  %v615_v22 = vpop.permute.xlu1 %614 }
 0x297   :  { %5133 = vmatpush3.bf16.xpose.msra.mxu0 %v623_v21  ;;  %v926_v21 = vsel %vm568_vm1, %v6274_v16, 0 }
 0x298   :  { %5144 = vmatprep.subr.bf16.mxu0 %v5928_v4 }
 0x29e   :  { %5135 = vmatmul.mubr.msk.bf16.vlgmr.msra.gmra.mrb[8].mxu0 %vm505_vm2, %v615_v22 }
 0x29f   :  { %5152 = vmatprep.mubr.msk.bf16.mxu0 %vm5930_vm0, %v5928_v4  ;;  %5145 = vmatpush3.bf16.msra.mxu0 %v5311_v2 }
 0x2a0   :  { %5146 = vmatprep.subr.bf16.mxu0 %v5928_v4 }
 0x2a3   :  { %5147 = vmatpush3.bf16.msra.mxu0 %v5312_v3 }
 0x2a4   :  { %5148 = vmatprep.subr.bf16.mxu0 %v5928_v4 }
 0x2a7   :  { %5149 = vmatpush3.bf16.msra.mxu0 %v5313_v5 }
 0x2a8   :  { %5150 = vmatprep.subr.bf16.mxu0 %v5928_v4 }
 0x2ab   :  { %5151 = vmatpush3.bf16.msra.mxu0 %v5314_v6 }
 0x2ac   :  { %5168 = vmatprep.subr.bf16.mxu0 %v5928_v4 }
 0x2fe   :  { %v546_v29 = vpop.f32.mrb[4].mxu0 }
 0x2ff   :  { %v547_v31 = vadd.f32 %v546_v29, %v82_v28  ;;  %v5124_v32 = vpop.f32.mrb[5].mxu0  ;;  %v868_v29 = vsel %vm505_vm2, %v862_v57, 0 }
 0x300   :  { %v549_v33 = vpop.f32.mrb[6].mxu0 }
 0x301   :  { %v5125_v34 = vpop.f32.mrb[7].mxu0  ;;  %v553_v35 = vsel %vm552_vm7, %v547_v31, -inf }
 0x302   :  { %554 = vmax.xlane.f32.xlu1 %v553_v35 }
 0x371   :  { %v659_v36 = vpop.f32.mrb[8].mxu0 }
 0x372   :  { %v660_v37 = vadd.f32 %v659_v36, %v82_v28  ;;  %v5136_v38 = vpop.f32.mrb[9].mxu0 }
 0x373   :  { %v662_v39 = vpop.f32.mrb[10].mxu0 }
 0x374   :  { %v5137_v40 = vpop.f32.mrb[11].mxu0  ;;  %v665_v41 = vsel %vm552_vm7, %v660_v37, -inf  ;;  %v86_v39 = vrot.slane %v6196_v24, %v6153_v47 }
 0x375   :  { %666 = vmax.xlane.f32.xlu0 %v665_v41 }
 0x376   :  { %vm87_vm8 = vcmp.eq.s32.totalorder %v86_v39, 1 }
 0x377   :  { %vm88_vm9 = vmand %vm72_vm4, %vm87_vm8 }
 0x38f   :  { %v555_v42 = vpop.xlane.xlu1 %554 }
 0x390   :  { %v556_v46 = vsub.f32 %v547_v31, %v555_v42 }
 0x392   :  { %v557_v48 = vmul.f32 1.442695, %v556_v46 }
 0x394   :  { %5799 = vpow2.f32 %v557_v48 }
 0x39e   :  { %v5800_v49 = vpop.eup %5799 }
 0x39f   :  { %v559_v50 = vsel %vm552_vm7, %v5800_v49, 0.0 }
 0x3a0   :  { %560 = vadd.xlane.f32.xlu0 %v559_v50 }
 0x3b6   :  { %678 = vrot.lane.b32.xlu0 %v504_v10, %s5931_s5  ;;  %v6244_v10 = vld [vmem:[%s7605_s8] sm:$0xff]  }
 0x402   :  { %v667_v51 = vpop.xlane.xlu0 %666 }
 0x403   :  { %v668_v52 = vsub.f32 %v660_v37, %v667_v51 }
 0x405   :  { %v669_v53 = vmul.f32 1.442695, %v668_v52 }
 0x407   :  { %5801 = vpow2.f32 %v669_v53 }
 0x411   :  { %v5802_v54 = vpop.eup %5801 }
 0x412   :  { %v671_v55 = vsel %vm552_vm7, %v5802_v54, 0.0 }
 0x413   :  { %672 = vadd.xlane.f32.xlu1 %v671_v55 }
 0x424   :  { %973 = vrot.lane.b32.xlu1 %v862_v57, %s5931_s5 }
 0x428   :  { %970 = vrot.lane.b32.xlu1 %v6216_v59, %s5931_s5 }
 0x42d   :  { %v561_v60 = vpop.xlane.xlu0 %560 }
 0x42e   :  { %5803 = vrcp.f32 %v561_v60 }
 0x431   :  { %v679_v63 = vpop.permute.xlu0 %678 }
 0x432   :  { %v684_v1 = vsel %vm568_vm1, %v679_v63, 0 }
 0x438   :  { %v5804_v61 = vpop.eup %5803 }
 0x439   :  { %v563_v62 = vmul.f32 %v5804_v61, %v5800_v49  ;;  %v89_v49 = vsel %vm88_vm9, 0.0, %v5932_v27 }
 0x43b   :  { %v564_v0 = vpack.c.bf16 %v563_v62, %v563_v62 }
 0x43d   :  { %5129 = vmatmul.mubr.msk.bf16.vlgmr.msra.gmra.mrb[4].mxu1 %vm552_vm7, %v564_v0 }
 0x43e   :  { %5139 = vmatpush3.bf16.msra.mxu1 %v684_v1  ;;  %5140 = vmatprep.mubr.msk.bf16.mxu1 %vm5930_vm0, %v5928_v4 }
 0x43f   :  { %5156 = vmatprep.subr.bf16.mxu1 %v5928_v4 }
 0x4a0   :  { %v673_v7 = vpop.xlane.xlu1 %672 }
 0x4a1   :  { %5805 = vrcp.f32 %v673_v7 }
 0x4a4   :  { %v974_v32 = vpop.permute.xlu1 %973 }
 0x4a5   :  { %v979_v33 = vsel %vm505_vm2, %v974_v32, 0 }
 0x4a8   :  { %v971_v34 = vpop.permute.xlu1 %970 }
 0x4ab   :  { %v5806_v8 = vpop.eup %5805 }
 0x4ac   :  { %v675_v9 = vmul.f32 %v5806_v8, %v5802_v54 }
 0x4ae   :  { %v676_v11 = vpack.c.bf16 %v675_v9, %v675_v9 }
 0x4b0   :  { %5141 = vmatmul.mubr.msk.bf16.vlgmr.msra.gmra.mrb[8].mxu1 %vm552_vm7, %v676_v11  ;;  %v5855_v11 = vld [vmem:[%s7625_s23] sm:$0xff] }
 0x4b1   :  { %5157 = vmatpush3.bf16.msra.mxu1 %v6244_v10  ;;  %5164 = vmatprep.mubr.msk.bf16.mxu1 %vm5930_vm0, %v5928_v4 }
 0x4b2   :  { %5158 = vmatprep.subr.bf16.mxu1 %v5928_v4 }
 0x4b5   :  { %5159 = vmatpush3.bf16.msra.mxu1 %v6251_v13 }
 0x4b6   :  { %5160 = vmatprep.subr.bf16.mxu1 %v5928_v4 }
 0x4b9   :  { %5161 = vmatpush3.bf16.msra.mxu1 %v6260_v14 }
 0x4ba   :  { %5162 = vmatprep.subr.bf16.mxu1 %v5928_v4 }
 0x4bd   :  { %5163 = vmatpush3.bf16.msra.mxu1 %v6267_v15 }
 0x4be   :  { %5174 = vmatprep.subr.bf16.mxu1 %v5928_v4 }
 0x510   :  { %v606_v17 = vpop.f32.mrb[4].mxu1 }
 0x511   :  { %v612_v18 = vpack.c.bf16 %v606_v17, %v606_v17  ;;  %v5130_v19 = vpop.f32.mrb[5].mxu1 }
 0x512   :  { %v609_v20 = vpop.f32.mrb[6].mxu1 }
 0x513   :  { %v5131_v22 = vpop.f32.mrb[7].mxu1  ;;  %5165 = vmatmul.mubr.msk.bf16.vlgmr.msra.gmra.mrb[12].mxu1 %vm505_vm2, %v612_v18 }
 0x514   :  { %5175 = vmatpush3.bf16.msra.mxu1 %v926_v21  ;;  %5176 = vmatprep.mubr.msk.bf16.mxu1 %vm5930_vm0, %v5928_v4 }
 0x515   :  { %5186 = vmatprep.subr.bf16.mxu1 %v5928_v4 }
 0x583   :  { %v720_v23 = vpop.f32.mrb[8].mxu1 }
 0x584   :  { %v726_v26 = vpack.c.bf16 %v720_v23, %v720_v23  ;;  %v5142_v12 = vpop.f32.mrb[9].mxu1 }
 0x585   :  { %v723_v28 = vpop.f32.mrb[10].mxu1 }
 0x586   :  { %v5143_v31 = vpop.f32.mrb[11].mxu1  ;;  %5153 = vmatmul.mubr.msk.bf16.vlgmr.msra.gmra.mrb[12].mxu0 %vm505_vm2, %v726_v26 }
 0x587   :  { %5169 = vmatpush3.bf16.xpose.msra.mxu0 %v868_v29  ;;  %5170 = vmatprep.mubr.msk.bf16.mxu0 %vm5930_vm0, %v5928_v4 }
 0x588   :  { %5180 = vmatprep.subr.bf16.mxu0 %v5928_v4 }
 0x58e   :  { %5171 = vmatmul.mubr.msk.bf16.vlgmr.msra.gmra.mrb[16].mxu0 %vm505_vm2, %v6216_v59 }
 0x58f   :  { %5181 = vmatpush3.bf16.xpose.msra.mxu0 %v979_v33  ;;  %5182 = vmatprep.mubr.msk.bf16.mxu0 %vm5930_vm0, %v5928_v4 }
 0x590   :  { %5192 = vmatprep.subr.bf16.mxu0 %v5928_v4 }
 0x596   :  { %5183 = vmatmul.mubr.msk.bf16.vlgmr.msra.gmra.mrb[20].mxu0 %vm505_vm2, %v971_v34 }
 0x597   :  { %5193 = vmatpush3.bf16.msra.mxu0 %v5311_v2  ;;  %5200 = vmatprep.mubr.msk.bf16.mxu0 %vm5930_vm0, %v5928_v4 }
 0x598   :  { %5194 = vmatprep.subr.bf16.mxu0 %v5928_v4 }
 0x59b   :  { %5195 = vmatpush3.bf16.msra.mxu0 %v5312_v3  ;;  %v6310_v3 = vsub.s32 4, %v6142_v43 }
 0x59c   :  { %5196 = vmatprep.subr.bf16.mxu0 %v5928_v4 }
 0x59f   :  { %5197 = vmatpush3.bf16.msra.mxu0 %v5313_v5 }
 0x5a0   :  { %5198 = vmatprep.subr.bf16.mxu0 %v5928_v4 }
 0x5a3   :  { %5199 = vmatpush3.bf16.msra.mxu0 %v5314_v6  ;;  %v1172_v6 = vrot.slane %v6150_v45, %v6310_v3 }
 0x5e6   :  { %v855_v35 = vpop.f32.mrb[12].mxu1 }
 0x5e7   :  { %v5166_v36 = vpop.f32.mrb[13].mxu1 }
 0x5e8   :  { %v858_v37 = vpop.f32.mrb[14].mxu1 }
 0x5e9   :  { %v5167_v38 = vpop.f32.mrb[15].mxu1 }
 0x659   :  { %v788_v40 = vpop.f32.mrb[12].mxu0 }
 0x65a   :  { %v856_v41 = vadd.f32 %v855_v35, %v788_v40  ;;  %v5154_v42 = vpop.f32.mrb[13].mxu0 }
 0x65b   :  { %v791_v46 = vpop.f32.mrb[14].mxu0 }
 0x65c   :  { %v5155_v48 = vpop.f32.mrb[15].mxu0  ;;  %v1173_v8 = vadd.f32 %v1172_v6, %v856_v41 }
 0x661   :  { %v904_v50 = vpop.f32.mrb[16].mxu0 }
 0x662   :  { %v905_v51 = vadd.f32 %v904_v50, %v89_v49  ;;  %v5172_v52 = vpop.f32.mrb[17].mxu0 }
 0x663   :  { %v907_v53 = vpop.f32.mrb[18].mxu0 }
 0x664   :  { %v5173_v54 = vpop.f32.mrb[19].mxu0  ;;  %v910_v55 = vsel %vm552_vm7, %v905_v51, -inf  ;;  %v5856_v53 = vld [vmem:[%s7625_s23 + $0x8] sm:$0xff] }
 0x665   :  { %911 = vmax.xlane.f32.xlu1 %v910_v55 }
 0x669   :  { %v1015_v24 = vpop.f32.mrb[20].mxu0 }
 0x66a   :  { %v1016_v56 = vadd.f32 %v1015_v24, %v89_v49  ;;  %v5184_v57 = vpop.f32.mrb[21].mxu0  ;;  %v5315_v24 = vld [vmem:[%s7606_s9] ss:$16 sps:$4 sm:$0xff]  }
 0x66b   :  { %v1018_v59 = vpop.f32.mrb[22].mxu0  ;;  %v5318_v57 = vld [vmem:[%s7606_s9 + $0x8] ss:$16 sps:$4 sm:$0xff]  }
 0x66c   :  { %v5185_v60 = vpop.f32.mrb[23].mxu0  ;;  %v1021_v61 = vsel %vm552_vm7, %v1016_v56, -inf  ;;  %v5320_v59 = vld [vmem:[%s7606_s9 + $0xc] ss:$16 sps:$4 sm:$0xff]  }
 0x66d   :  { %1022 = vmax.xlane.f32.xlu0 %v1021_v61  ;;  %v5323_v60 = vld [vmem:[%s7606_s9 + $0x24] ss:$16 sps:$4 sm:$0xff]   ;;  %v5326_v61 = vld [vmem:[%s7606_s9 + $0x2c] ss:$16 sps:$4 sm:$0xff]  }
 0x676   :  { %1034 = vrot.lane.b32.xlu1 %v6274_v16, %s5931_s5  ;;  %v6319_v16 = vadd.f32 %v5855_v11, %v1173_v8  ;;  %v5335_v8 = vld [vmem:[%s7606_s9 + $0x64] ss:$16 sps:$4 sm:$0xff]   ;;  %v5333_v11 = vld [vmem:[%s7606_s9 + $0x60] ss:$16 sps:$4 sm:$0xff]  }
 0x6f2   :  { %v912_v25 = vpop.xlane.xlu1 %911 }
 0x6f3   :  { %v913_v27 = vsub.f32 %v905_v51, %v912_v25  ;;  %v5321_v25 = vld [vmem:[%s7606_s9 + $0x20] ss:$16 sps:$4 sm:$0xff]  }
 0x6f5   :  { %v914_v62 = vmul.f32 1.442695, %v913_v27  ;;  %v5324_v27 = vld [vmem:[%s7606_s9 + $0x28] ss:$16 sps:$4 sm:$0xff]  }
 0x6f6   :  { %v1035_v21 = vpop.permute.xlu1 %1034 }
 0x6f7   :  { %5807 = vpow2.f32 %v914_v62  ;;  %v1040_v23 = vsel %vm568_vm1, %v1035_v21, 0  ;;  %v5329_v62 = vld [vmem:[%s7606_s9 + $0x44] ss:$16 sps:$4 sm:$0xff]   ;;  %v5342_v21 = vld [vmem:[%s7606_s9 + $0x88] ss:$16 sps:$4 sm:$0xff]  }
 0x6fa   :  { %v1023_v63 = vpop.xlane.xlu0 %1022 }
 0x6fb   :  { %v1024_v0 = vsub.f32 %v1016_v56, %v1023_v63  ;;  %v5317_v56 = vld [vmem:[%s7606_s9 + $0x4] ss:$16 sps:$4 sm:$0xff]   ;;  %v5332_v63 = vld [vmem:[%s7606_s9 + $0x4c] ss:$16 sps:$4 sm:$0xff]  }
 0x6fc   :  { %1393 = vmatprep.subr.bf16.mxu0 %v5317_v56  ;;  %v5364_v56 = vld [vmem:[%s7607_s10 + $0xc0] sm:$0xff]  }
 0x6fd   :  { %v1025_v1 = vmul.f32 1.442695, %v1024_v0  ;;  %v5327_v0 = vld [vmem:[%s7606_s9 + $0x40] ss:$16 sps:$4 sm:$0xff]  }
 0x6ff   :  { %5809 = vpow2.f32 %v1025_v1  ;;  %v5330_v1 = vld [vmem:[%s7606_s9 + $0x48] ss:$16 sps:$4 sm:$0xff]  }
 0x701   :  { %v5808_v2 = vpop.eup %5807 }
 0x702   :  { %v916_v5 = vsel %vm552_vm7, %v5808_v2, 0.0 }
 0x703   :  { %917 = vadd.xlane.f32.xlu0 %v916_v5 }
 0x709   :  { %v5810_v7 = vpop.eup %5809 }
 0x70a   :  { %v1027_v9 = vsel %vm552_vm7, %v5810_v7, 0.0 }
 0x70b   :  { %1028 = vadd.xlane.f32.xlu0 %v1027_v9  ;;  %v5338_v9 = vld [vmem:[%s7606_s9 + $0x6c] ss:$16 sps:$4 sm:$0xff]  }
 0x70f   :  { %1177 = vadd.xlane.f32.xlu0 %v6319_v16 }
 0x790   :  { %v918_v17 = vpop.xlane.xlu0 %917 }
 0x791   :  { %5811 = vrcp.f32 %v918_v17  ;;  %v5336_v17 = vld [vmem:[%s7606_s9 + $0x68] ss:$16 sps:$4 sm:$0xff]  }
 0x798   :  { %v1029_v18 = vpop.xlane.xlu0 %1028 }
 0x799   :  { %5813 = vrcp.f32 %v1029_v18  ;;  %v5341_v18 = vld [vmem:[%s7606_s9 + $0x84] ss:$16 sps:$4 sm:$0xff]  }
 0x79b   :  { %v5812_v19 = vpop.eup %5811 }
 0x79c   :  { %v920_v20 = vmul.f32 %v5812_v19, %v5808_v2  ;;  %v1178_v40 = vpop.xlane.xlu0 %1177  ;;  %v5344_v19 = vld [vmem:[%s7606_s9 + $0x8c] ss:$16 sps:$4 sm:$0xff]  }
 0x79d   :  { %v1181_v42 = vmul.f32 0.0078125, %v1178_v40 }
 0x79e   :  { %v921_v22 = vpack.c.bf16 %v920_v20, %v920_v20  ;;  %v5339_v20 = vld [vmem:[%s7606_s9 + $0x80] ss:$16 sps:$4 sm:$0xff]  }
 0x79f   :  { %v6342_v52 = vsub.f32 %v6319_v16, %v1181_v42  ;;  %v1207_v42 = vsub.s32 3, %v6142_v43 }
 0x7a0   :  { %5177 = vmatmul.mubr.msk.bf16.vlgmr.msra.gmra.mrb[16].mxu1 %vm552_vm7, %v921_v22  ;;  %v5347_v22 = vld [vmem:[%s7606_s9 + $0xa4] ss:$16 sps:$4 sm:$0xff]  }
 0x7a1   :  { %5187 = vmatpush3.bf16.msra.mxu1 %v1040_v23  ;;  %5188 = vmatprep.mubr.msk.bf16.mxu1 %vm5930_vm0, %v5928_v4  ;;  %v1185_v55 = vmul.f32 %v6342_v52, %v6342_v52  ;;  %v5350_v23 = vld [vmem:[%s7606_s9 + $0xac] ss:$16 sps:$4 sm:$0xff]  }
 0x7a2   :  { %5204 = vmatprep.subr.bf16.mxu1 %v5928_v4 }
 0x7a3   :  { %v5814_v26 = vpop.eup %5813 }
 0x7a4   :  { %v1031_v12 = vmul.f32 %v5814_v26, %v5810_v7  ;;  %v5345_v26 = vld [vmem:[%s7606_s9 + $0xa0] ss:$16 sps:$4 sm:$0xff]  }
 0x7a6   :  { %v1032_v28 = vpack.c.bf16 %v1031_v12, %v1031_v12  ;;  %v5348_v12 = vld [vmem:[%s7606_s9 + $0xa8] ss:$16 sps:$4 sm:$0xff]  }
 0x7a8   :  { %5189 = vmatmul.mubr.msk.bf16.vlgmr.msra.gmra.mrb[20].mxu1 %vm552_vm7, %v1032_v28  ;;  %v5353_v28 = vld [vmem:[%s7606_s9 + $0xc4] ss:$16 sps:$4 sm:$0xff]  }
 0x7a9   :  { %5205 = vmatpush3.bf16.msra.mxu1 %v6244_v10  ;;  %5212 = vmatprep.mubr.msk.bf16.mxu1 %vm5930_vm0, %v5928_v4 }
 0x7aa   :  { %5206 = vmatprep.subr.bf16.mxu1 %v5928_v4 }
 0x7ad   :  { %5207 = vmatpush3.bf16.msra.mxu1 %v6251_v13 }
 0x7ae   :  { %5208 = vmatprep.subr.bf16.mxu1 %v5928_v4 }
 0x7b1   :  { %5209 = vmatpush3.bf16.msra.mxu1 %v6260_v14 }
 0x7b2   :  { %5210 = vmatprep.subr.bf16.mxu1 %v5928_v4 }
 0x7b5   :  { %5211 = vmatpush3.bf16.msra.mxu1 %v6267_v15 }
 0x7b6   :  { %1436 = vmatprep.subr.bf16.mxu1 %v5320_v59  ;;  %v5367_v59 = vld [vmem:[%s7607_s10 + $0x48] sm:$0xff]  }
 0x873   :  { %v962_v29 = vpop.f32.mrb[16].mxu1 }
 0x874   :  { %v968_v31 = vpack.c.bf16 %v962_v29, %v962_v29  ;;  %v5178_v32 = vpop.f32.mrb[17].mxu1  ;;  %v5356_v29 = vld [vmem:[%s7606_s9 + $0xcc] ss:$16 sps:$4 sm:$0xff]  }
 0x875   :  { %v965_v33 = vpop.f32.mrb[18].mxu1  ;;  %v5354_v32 = vld [vmem:[%s7606_s9 + $0xc8] ss:$16 sps:$4 sm:$0xff]  }
 0x876   :  { %v5179_v10 = vpop.f32.mrb[19].mxu1  ;;  %5213 = vmatmul.mubr.msk.bf16.vlgmr.msra.gmra.mrb[24].mxu1 %vm505_vm2, %v968_v31  ;;  %v5351_v31 = vld [vmem:[%s7606_s9 + $0xc0] ss:$16 sps:$4 sm:$0xff]   ;;  %v5359_v33 = vld [vmem:[%s7606_s9 + $0xe4] ss:$16 sps:$4 sm:$0xff]  }
 0x877   :  { %1468 = vmatprep.mubr.bf16.mxu1 %v5929_v30  ;;  %1437 = vmatpush1.bf16.msra.mxu1 %v5318_v57  ;;  %v5362_v10 = vld [vmem:[%s7606_s9 + $0xec] ss:$16 sps:$4 sm:$0xff]   ;;  %v5365_v57 = vld [vmem:[%s7607_s10] sm:$0xff]  }
 0x878   :  { %1438 = vmatprep.subr.bf16.mxu1 %v5326_v61  ;;  %v5369_v61 = vld [vmem:[%s7607_s10 + $0x8] sm:$0xff]  }
 0x87b   :  { %v1076_v34 = vpop.f32.mrb[20].mxu1  ;;  %1439 = vmatpush1.bf16.msra.mxu1 %v5324_v27  ;;  %v5371_v27 = vld [vmem:[%s7607_s10 + $0x50] sm:$0xff]  }
 0x87c   :  { %v1082_v35 = vpack.c.bf16 %v1076_v34, %v1076_v34  ;;  %v5190_v13 = vpop.f32.mrb[21].mxu1  ;;  %1440 = vmatprep.subr.bf16.mxu1 %v5332_v63  ;;  %v5357_v34 = vld [vmem:[%s7606_s9 + $0xe0] ss:$16 sps:$4 sm:$0xff]  }
 0x87d   :  { %v1079_v36 = vpop.f32.mrb[22].mxu1  ;;  %v5373_v63 = vld [vmem:[%s7607_s10 + $0x10] sm:$0xff]  }
 0x87e   :  { %v5191_v37 = vpop.f32.mrb[23].mxu1  ;;  %5201 = vmatmul.mubr.msk.bf16.vlgmr.msra.gmra.mrb[24].mxu0 %vm505_vm2, %v1082_v35  ;;  %v5360_v35 = vld [vmem:[%s7606_s9 + $0xe8] ss:$16 sps:$4 sm:$0xff]  }
 0x87f   :  { %1425 = vmatprep.mubr.bf16.mxu0 %v5929_v30  ;;  %1394 = vmatpush1.bf16.msra.mxu0 %v5315_v24 }
 0x880   :  { %1395 = vmatprep.subr.bf16.mxu0 %v5323_v60  ;;  %1441 = vmatpush1.bf16.msra.mxu1 %v5330_v1  ;;  %v5368_v60 = vld [vmem:[%s7607_s10 + $0xc8] sm:$0xff]   ;;  %v5375_v1 = vld [vmem:[%s7607_s10 + $0x58] sm:$0xff]  }
 0x881   :  { %1442 = vmatprep.subr.bf16.mxu1 %v5338_v9  ;;  %v5381_v9 = vld [vmem:[%s7607_s10 + $0x20] sm:$0xff]  }
 0x883   :  { %1396 = vmatpush1.bf16.msra.mxu0 %v5321_v25  ;;  %v5370_v25 = vld [vmem:[%s7607_s10 + $0x88] sm:$0xff]  }
 0x884   :  { %1397 = vmatprep.subr.bf16.mxu0 %v5329_v62  ;;  %1443 = vmatpush1.bf16.msra.mxu1 %v5336_v17  ;;  %v5372_v62 = vld [vmem:[%s7607_s10 + $0xd0] sm:$0xff]   ;;  %v5383_v17 = vld [vmem:[%s7607_s10 + $0x68] sm:$0xff]  }
 0x885   :  { %1444 = vmatprep.subr.bf16.mxu1 %v5344_v19  ;;  %v5385_v19 = vld [vmem:[%s7607_s10 + $0x28] sm:$0xff]  }
 0x887   :  { %1398 = vmatpush1.bf16.msra.mxu0 %v5327_v0  ;;  %v5374_v0 = vld [vmem:[%s7607_s10 + $0x90] sm:$0xff]  }
 0x888   :  { %1399 = vmatprep.subr.bf16.mxu0 %v5335_v8  ;;  %1445 = vmatpush1.bf16.msra.mxu1 %v5342_v21  ;;  %v5380_v8 = vld [vmem:[%s7607_s10 + $0xe0] sm:$0xff]   ;;  %v5387_v21 = vld [vmem:[%s7607_s10 + $0x70] sm:$0xff]  }
 0x889   :  { %1446 = vmatprep.subr.bf16.mxu1 %v5350_v23  ;;  %v5389_v23 = vld [vmem:[%s7607_s10 + $0x30] sm:$0xff]  }
 0x88b   :  { %1400 = vmatpush1.bf16.msra.mxu0 %v5333_v11  ;;  %v5382_v11 = vld [vmem:[%s7607_s10 + $0xa0] sm:$0xff]  }
 0x88c   :  { %1401 = vmatprep.subr.bf16.mxu0 %v5341_v18  ;;  %1447 = vmatpush1.bf16.msra.mxu1 %v5348_v12  ;;  %v5384_v18 = vld [vmem:[%s7607_s10 + $0xe8] sm:$0xff]   ;;  %v5391_v12 = vld [vmem:[%s7607_s10 + $0x78] sm:$0xff]  }
 0x88d   :  { %1448 = vmatprep.subr.bf16.mxu1 %v5356_v29  ;;  %v5393_v29 = vld [vmem:[%s7607_s10 + $0x38] sm:$0xff]  }
 0x88f   :  { %1402 = vmatpush1.bf16.msra.mxu0 %v5339_v20  ;;  %v5386_v20 = vld [vmem:[%s7607_s10 + $0xa8] sm:$0xff]  }
 0x890   :  { %1403 = vmatprep.subr.bf16.mxu0 %v5347_v22  ;;  %1449 = vmatpush1.bf16.msra.mxu1 %v5354_v32  ;;  %v5388_v22 = vld [vmem:[%s7607_s10 + $0xf0] sm:$0xff]   ;;  %v171_v32 = vld [vmem:[%s7603_s6] sm:$0xf] }
 0x891   :  { %1450 = vmatprep.subr.bf16.mxu1 %v5362_v10  ;;  %v1224_v10 = vrot.slane %v171_v32, %v6166_v58 }
 0x893   :  { %1404 = vmatpush1.bf16.msra.mxu0 %v5345_v26  ;;  %v5390_v26 = vld [vmem:[%s7607_s10 + $0xb0] sm:$0xff]  }
 0x894   :  { %1405 = vmatprep.subr.bf16.mxu0 %v5353_v28  ;;  %1451 = vmatpush1.bf16.msra.mxu1 %v5360_v35  ;;  %v5392_v28 = vld [vmem:[%s7607_s10 + $0xf8] sm:$0xff]   ;;  %v1228_v35 = vrot.slane %v171_v32, %v1207_v42 }
 0x895   :  { %5022 = vmatprep.subr.bf16.mxu1 %v5364_v56 }
 0x897   :  { %1406 = vmatpush1.bf16.msra.mxu0 %v5351_v31  ;;  %v5394_v31 = vld [vmem:[%s7607_s10 + $0xb8] sm:$0xff]  }
 0x898   :  { %1407 = vmatprep.subr.bf16.mxu0 %v5359_v33  ;;  %v1216_v33 = vrot.slane %v171_v32, %v6145_v44 }
 0x89b   :  { %1408 = vmatpush1.bf16.msra.mxu0 %v5357_v34  ;;  %v1220_v34 = vrot.slane %v171_v32, %v6153_v47 }
 0x949   :  { %v1163_v14 = vpop.f32.mrb[24].mxu1 }
 0x94a   :  { %v5214_v15 = vpop.f32.mrb[25].mxu1 }
 0x94b   :  { %v1166_v38 = vpop.f32.mrb[26].mxu1 }
 0x94c   :  { %v5215_v39 = vpop.f32.mrb[27].mxu1 }
 0x951   :  { %v1120_v41 = vpop.f32.mrb[24].mxu0 }
 0x952   :  { %v1164_v46 = vadd.f32 %v1163_v14, %v1120_v41  ;;  %v5202_v48 = vpop.f32.mrb[25].mxu0  ;;  %v1202_v41 = vrot.slane %v6150_v45, %v6166_v58 }
 0x953   :  { %v1123_v49 = vpop.f32.mrb[26].mxu0 }
 0x954   :  { %v1174_v50 = vadd.f32 %v1172_v6, %v1164_v46  ;;  %v5203_v51 = vpop.f32.mrb[27].mxu0 }
 0x956   :  { %v6347_v54 = vadd.f32 %v5856_v53, %v1174_v50  ;;  %v1208_v50 = vrot.slane %v6150_v45, %v1207_v42  ;;  %v5366_v45 = vld [vmem:[%s7607_s10 + $0x80] sm:$0xff]  }
 0x958   :  { %1179 = vadd.xlane.f32.xlu0 %v6347_v54 }
 0x95c   :  { %1187 = vadd.xlane.f32.xlu0 %v1185_v55 }
 0x9e5   :  { %v1180_v2 = vpop.xlane.xlu0 %1179 }
 0x9e6   :  { %v1182_v5 = vmul.f32 0.0078125, %v1180_v2  ;;  %v5376_v2 = vld [vmem:[%s7607_s10 + $0xd8] sm:$0xff]  }
 0x9e8   :  { %v1184_v6 = vsub.f32 %v6347_v54, %v1182_v5  ;;  %v5377_v5 = vld [vmem:[%s7607_s10 + $0x18] sm:$0xff]  }
 0x9e9   :  { %v1188_v13 = vpop.xlane.xlu0 %1187 }
 0x9ea   :  { %v1186_v7 = vmul.f32 %v1184_v6, %v1184_v6  ;;  %v1191_v36 = vmul.f32 0.0078125, %v1188_v13 }
 0x9ec   :  { %1189 = vadd.xlane.f32.xlu0 %v1186_v7  ;;  %v1193_v37 = vadd.f32 1e-05, %v1191_v36  ;;  %v5379_v7 = vld [vmem:[%s7607_s10 + $0x60] sm:$0xff]  }
 0x9ee   :  { %5815 = vrsqrt.f32 %v1193_v37 }
 0x9f8   :  { %v5816_v39 = vpop.eup %5815 }
 0x9f9   :  { %v1197_v40 = vmul.f32 %v5816_v39, %v6342_v52  ;;  %v5363_v52 = vld [vmem:[%s7607_s10 + $0x40] sm:$0xff]  }
 0x9fa   :  { %5000 = vmatprep.subr.bf16.mxu0 %v5363_v52 }
 0x9fb   :  { %v1203_v49 = vmul.f32 %v1202_v41, %v1197_v40 }
 0x9fd   :  { %v1209_v53 = vadd.f32 %v1208_v50, %v1203_v49 }
 0xa79   :  { %v1190_v14 = vpop.xlane.xlu0 %1189 }
 0xa7a   :  { %v1192_v15 = vmul.f32 0.0078125, %v1190_v14 }
 0xa7c   :  { %v1194_v38 = vadd.f32 1e-05, %v1192_v15 }
 0xa7e   :  { %5817 = vrsqrt.f32 %v1194_v38 }
 0xa88   :  { %v5818_v46 = vpop.eup %5817 }
 0xa89   :  { %v1198_v48 = vmul.f32 %v5818_v46, %v1184_v6  ;;  %v5378_v6 = vld [vmem:[%s7607_s10 + $0x98] sm:$0xff]  }
 0xa8b   :  { %v1204_v51 = vmul.f32 %v1202_v41, %v1198_v48 }
 0xa8d   :  { %v1210_v55 = vadd.f32 %v1208_v50, %v1204_v51 }
 0xa8f   :  { %v1211_v24 = vpack.c.bf16 %v1210_v55, %v1209_v53 }
 0xa91   :  { %1426 = vmatmul.mubr.bf16.vlgmr.msra.gmra.mrb[28].mxu0 %v1211_v24  ;;  %1469 = vmatmul.mubr.bf16.vlgmr.msra.gmra.mrb[28].mxu1 %v1211_v24 }
 0xa92   :  { %5001 = vmatpush3.bf16.msra.mxu0 %v5365_v57  ;;  %5023 = vmatpush3.bf16.msra.mxu1 %v5366_v45 }
 0xa93   :  { %5002 = vmatprep.subr.bf16.mxu0 %v5367_v59  ;;  %5024 = vmatprep.subr.bf16.mxu1 %v5368_v60 }
 0xa96   :  { %5003 = vmatpush3.bf16.msra.mxu0 %v5369_v61  ;;  %5025 = vmatpush3.bf16.msra.mxu1 %v5370_v25 }
 0xa97   :  { %5004 = vmatprep.subr.bf16.mxu0 %v5371_v27  ;;  %5026 = vmatprep.subr.bf16.mxu1 %v5372_v62 }
 0xa9a   :  { %5005 = vmatpush3.bf16.msra.mxu0 %v5373_v63  ;;  %5027 = vmatpush3.bf16.msra.mxu1 %v5374_v0 }
 0xa9b   :  { %5006 = vmatprep.subr.bf16.mxu0 %v5375_v1  ;;  %5028 = vmatprep.subr.bf16.mxu1 %v5376_v2 }
 0xa9e   :  { %5007 = vmatpush3.bf16.msra.mxu0 %v5377_v5  ;;  %5029 = vmatpush3.bf16.msra.mxu1 %v5378_v6 }
 0xa9f   :  { %5008 = vmatprep.subr.bf16.mxu0 %v5379_v7  ;;  %5030 = vmatprep.subr.bf16.mxu1 %v5380_v8 }
 0xaa2   :  { %5009 = vmatpush3.bf16.msra.mxu0 %v5381_v9  ;;  %5031 = vmatpush3.bf16.msra.mxu1 %v5382_v11 }
 0xaa3   :  { %5010 = vmatprep.subr.bf16.mxu0 %v5383_v17  ;;  %5032 = vmatprep.subr.bf16.mxu1 %v5384_v18 }
 0xaa6   :  { %5011 = vmatpush3.bf16.msra.mxu0 %v5385_v19  ;;  %5033 = vmatpush3.bf16.msra.mxu1 %v5386_v20 }
 0xaa7   :  { %5012 = vmatprep.subr.bf16.mxu0 %v5387_v21  ;;  %5034 = vmatprep.subr.bf16.mxu1 %v5388_v22 }
 0xaaa   :  { %5013 = vmatpush3.bf16.msra.mxu0 %v5389_v23  ;;  %5035 = vmatpush3.bf16.msra.mxu1 %v5390_v26 }
 0xaab   :  { %5014 = vmatprep.subr.bf16.mxu0 %v5391_v12  ;;  %5036 = vmatprep.subr.bf16.mxu1 %v5392_v28 }
 0xaae   :  { %5015 = vmatpush3.bf16.msra.mxu0 %v5393_v29  ;;  %5037 = vmatpush3.bf16.msra.mxu1 %v5394_v31 }
 0xaaf   :  { %5223 = vmatprep.subr.bf16.mxu1 %v5928_v4 }
 0xb64   :  { %v1427_v13 = vpop.f32.mrb[28].mxu0  ;;  %v1470_v36 = vpop.f32.mrb[28].mxu1 }
 0xb65   :  { %v6561_v37 = vadd.f32 %v1427_v13, %v1216_v33  ;;  %v6563_v14 = vadd.f32 %v1470_v36, %v1224_v10  ;;  %v1429_v15 = vpop.f32.mrb[29].mxu0  ;;  %v1472_v38 = vpop.f32.mrb[29].mxu1 }
 0xb66   :  { %v6565_v39 = vadd.f32 %v1429_v15, %v1220_v34  ;;  %v6567_v40 = vadd.f32 %v1472_v38, %v1228_v35  ;;  %v1431_v41 = vpop.f32.mrb[30].mxu0  ;;  %v1474_v46 = vpop.f32.mrb[30].mxu1 }
 0xb67   :  { %v4633_v48 = vmul.f32 -1.702, %v6561_v37  ;;  %v4635_v49 = vmul.f32 -1.702, %v6563_v14  ;;  %v1432_v50 = vadd.f32 %v1431_v41, %v1216_v33  ;;  %v1475_v42 = vadd.f32 %v1474_v46, %v1224_v10  ;;  %v1433_v51 = vpop.f32.mrb[31].mxu0  ;;  %v1476_v53 = vpop.f32.mrb[31].mxu1 }
 0xb68   :  { %v4634_v55 = vmul.f32 -1.702, %v6565_v39  ;;  %v4636_v24 = vmul.f32 -1.702, %v6567_v40  ;;  %v1434_v52 = vadd.f32 %v1433_v51, %v1220_v34  ;;  %v1477_v56 = vadd.f32 %v1476_v53, %v1228_v35 }
 0xb69   :  { %v1495_v57 = vmul.f32 1.442695, %v4633_v48  ;;  %v1499_v45 = vmul.f32 1.442695, %v4635_v49  ;;  %v4637_v59 = vmul.f32 -1.702, %v1432_v50 }
 0xb6a   :  { %v1497_v60 = vmul.f32 1.442695, %v4634_v55  ;;  %v1501_v61 = vmul.f32 1.442695, %v4636_v24  ;;  %v4639_v25 = vmul.f32 -1.702, %v1475_v42 }
 0xb6b   :  { %5819 = vpow2.f32 %v1495_v57  ;;  %v1503_v27 = vmul.f32 1.442695, %v4637_v59  ;;  %v4638_v62 = vmul.f32 -1.702, %v1434_v52  ;;  %v4640_v63 = vmul.f32 -1.702, %v1477_v56 }
 0xb6c   :  { %5821 = vpow2.f32 %v1499_v45  ;;  %v1507_v0 = vmul.f32 1.442695, %v4639_v25 }
 0xb6d   :  { %5823 = vpow2.f32 %v1497_v60  ;;  %v1505_v1 = vmul.f32 1.442695, %v4638_v62  ;;  %v1509_v2 = vmul.f32 1.442695, %v4640_v63 }
 0xb6e   :  { %5825 = vpow2.f32 %v1501_v61 }
 0xb6f   :  { %5827 = vpow2.f32 %v1503_v27 }
 0xb70   :  { %5829 = vpow2.f32 %v1507_v0 }
 0xb71   :  { %5831 = vpow2.f32 %v1505_v1 }
 0xb72   :  { %5833 = vpow2.f32 %v1509_v2 }
 0xb75   :  { %v5820_v5 = vpop.eup %5819 }
 0xb76   :  { %v5822_v6 = vpop.eup %5821  ;;  %v1511_v7 = vadd.f32 1.0, %v5820_v5 }
 0xb77   :  { %v5824_v8 = vpop.eup %5823  ;;  %v1513_v9 = vadd.f32 1.0, %v5822_v6 }
 0xb78   :  { %v5826_v11 = vpop.eup %5825  ;;  %5835 = vrcp.f32 %v1511_v7  ;;  %v1512_v17 = vadd.f32 1.0, %v5824_v8 }
 0xb79   :  { %v5828_v18 = vpop.eup %5827  ;;  %5837 = vrcp.f32 %v1513_v9  ;;  %v1514_v19 = vadd.f32 1.0, %v5826_v11  ;;  %v1827_v9 = vld [vmem:[%s7628_s1] sm:$0x3] }
 0xb7a   :  { %v5830_v20 = vpop.eup %5829  ;;  %5839 = vrcp.f32 %v1512_v17  ;;  %v1515_v21 = vadd.f32 1.0, %v5828_v18 }
 0xb7b   :  { %v5832_v22 = vpop.eup %5831  ;;  %5841 = vrcp.f32 %v1514_v19  ;;  %v1517_v23 = vadd.f32 1.0, %v5830_v20 }
 0xb7c   :  { %v5834_v26 = vpop.eup %5833  ;;  %5843 = vrcp.f32 %v1515_v21  ;;  %v1516_v12 = vadd.f32 1.0, %v5832_v22 }
 0xb7d   :  { %5845 = vrcp.f32 %v1517_v23  ;;  %v1518_v28 = vadd.f32 1.0, %v5834_v26  ;;  %v5397_v26 = vld [vmem:[%s7608_s11 + $0x10] sm:$0xff]  }
 0xb7e   :  { %5847 = vrcp.f32 %v1516_v12  ;;  %v5398_v12 = vld [vmem:[%s7608_s11 + $0x18] sm:$0xff]  }
 0xb7f   :  { %5849 = vrcp.f32 %v1518_v28  ;;  %v5399_v28 = vld [vmem:[%s7608_s11 + $0x20] sm:$0xff]  }
 0xb82   :  { %v5836_v29 = vpop.eup %5835 }
 0xb83   :  { %v5838_v31 = vpop.eup %5837  ;;  %v1535_v35 = vmul.f32 %v5836_v29, %v6561_v37  ;;  %v5933_v37 = vmov 0.0|0.0   ;;  %v5400_v29 = vld [vmem:[%s7608_s11 + $0x28] sm:$0xff]  }
 0xb84   :  { %v5840_v32 = vpop.eup %5839  ;;  %v1537_v15 = vmul.f32 %v5838_v31, %v6563_v14  ;;  %5243 = vmatprep.subr.bf16.mxu0 %v5933_v37  ;;  %v6582_v14 = vsub.s32 5, %v6142_v43  ;;  %v5401_v31 = vld [vmem:[%s7608_s11 + $0x30] sm:$0xff]  }
 0xb85   :  { %v5842_v33 = vpop.eup %5841  ;;  %v1536_v46 = vmul.f32 %v5840_v32, %v6565_v39  ;;  %v5402_v32 = vld [vmem:[%s7608_s11 + $0x38] sm:$0xff]  }
 0xb86   :  { %v5844_v10 = vpop.eup %5843  ;;  %v1538_v51 = vmul.f32 %v5842_v33, %v6567_v40  ;;  %v6587_v40 = vld [vmem:[%s7626_s30] sm:$0xff]  ;;  %v5412_v37 = vld [vmem:[%s7609_s12 + $0x38] ss:$24 sps:$4 sm:$0xff]  }
 0xb87   :  { %v5846_v34 = vpop.eup %5845  ;;  %v1539_v13 = vmul.f32 %v5844_v10, %v1432_v50  ;;  %v1550_v50 = vrot.slane %v6587_v40, %v6582_v14 }
 0xb88   :  { %v5848_v36 = vpop.eup %5847  ;;  %v1541_v38 = vmul.f32 %v5846_v34, %v1475_v42 }
 0xb89   :  { %v5850_v41 = vpop.eup %5849  ;;  %v1543_v48 = vpack.c.bf16 %v1539_v13, %v1535_v35  ;;  %v1540_v49 = vmul.f32 %v5848_v36, %v1434_v52  ;;  %v6631_v35 = vsub.s32 6, %v6142_v43  ;;  %v1923_v13 = vsub.s32 7, %v6142_v43  ;;  %v5405_v43 = vld [vmem:[%s7609_s12 + $0x4] ss:$24 sps:$4 sm:$0xff]  }
 0xb8a   :  { %v1545_v53 = vpack.c.bf16 %v1541_v38, %v1537_v15  ;;  %v1542_v55 = vmul.f32 %v5850_v41, %v1477_v56 }
 0xb8b   :  { %v1544_v24 = vpack.c.bf16 %v1540_v49, %v1536_v46  ;;  %v1919_v36 = vrot.slane %v6587_v40, %v6631_v35  ;;  %v1924_v41 = vrot.slane %v6587_v40, %v1923_v13  ;;  %v5403_v49 = vld [vmem:[%s7609_s12] ss:$24 sps:$4 sm:$0xff]   ;;  %v5420_v40 = vld [vmem:[%s7609_s12 + $0x6c] ss:$24 sps:$4 sm:$0xff]  }
 0xb8c   :  { %v1546_v57 = vpack.c.bf16 %v1542_v55, %v1538_v51  ;;  %v5406_v51 = vld [vmem:[%s7609_s12 + $0x8] ss:$24 sps:$4 sm:$0xff]   ;;  %v5411_v55 = vld [vmem:[%s7609_s12 + $0x34] ss:$24 sps:$4 sm:$0xff]  }
 0xb8d   :  { %1775 = vmatprep.mubr.bf16.mxu0 %v1544_v24  ;;  %v5414_v24 = vld [vmem:[%s7609_s12 + $0x3c] ss:$24 sps:$4 sm:$0xff]   ;;  %v5475_v13 = vld [vmem:[%s7611_s14] ss:$16 sps:$4 sm:$0xff]  }
 0xb8e   :  { %1816 = vmatprep.mubr.bf16.mxu1 %v1546_v57  ;;  %1776 = vmatmul.mubr.bf16.vlgmr.msra.gmra.mrb[32].mxu0 %v1543_v48  ;;  %v5409_v57 = vld [vmem:[%s7609_s12 + $0x30] ss:$24 sps:$4 sm:$0xff]  }
 0xb8f   :  { %1817 = vmatmul.mubr.bf16.vlgmr.msra.gmra.mrb[32].mxu1 %v1545_v53  ;;  %5220 = vmatprep.mubr.msk.f32.mxu0 %vm5930_vm0, %v5928_v4  ;;  %v5408_v53 = vld [vmem:[%s7609_s12 + $0xc] ss:$24 sps:$4 sm:$0xff]  }
 0xb90   :  { %5239 = vmatprep.mubr.msk.bf16.mxu1 %vm5930_vm0, %v5928_v4 }
 0xc61   :  { %v5016_v39 = vpop.f32.mrb[32].mxu0 }
 0xc62   :  { %v5038_v42 = vpop.f32.mrb[32].mxu1  ;;  %v5017_v52 = vpop.f32.mrb[33].mxu0 }
 0xc63   :  { %v5018_v56 = vadd.f32 %v5017_v52, %v5016_v39  ;;  %v5039_v45 = vpop.f32.mrb[33].mxu1  ;;  %v5019_v59 = vpop.f32.mrb[34].mxu0  ;;  %v5417_v39 = vld [vmem:[%s7609_s12 + $0x64] ss:$24 sps:$4 sm:$0xff]   ;;  %v5423_v52 = vld [vmem:[%s7609_s12 + $0x94] ss:$24 sps:$4 sm:$0xff]  }
 0xc64   :  { %v5040_v60 = vadd.f32 %v5039_v45, %v5038_v42  ;;  %v5041_v61 = vpop.f32.mrb[34].mxu1  ;;  %v5020_v25 = vpop.f32.mrb[35].mxu0  ;;  %v5418_v42 = vld [vmem:[%s7609_s12 + $0x68] ss:$24 sps:$4 sm:$0xff]  }
 0xc65   :  { %v1778_v27 = vadd.f32 %v5018_v56, %v1550_v50  ;;  %v5021_v62 = vadd.f32 %v5020_v25, %v5019_v59  ;;  %v5042_v63 = vpop.f32.mrb[35].mxu1  ;;  %v5426_v56 = vld [vmem:[%s7609_s12 + $0x9c] ss:$24 sps:$4 sm:$0xff]   ;;  %v5421_v45 = vld [vmem:[%s7609_s12 + $0x90] ss:$24 sps:$4 sm:$0xff]  }
 0xc66   :  { %v5043_v0 = vadd.f32 %v5042_v63, %v5041_v61  ;;  %v5424_v59 = vld [vmem:[%s7609_s12 + $0x98] ss:$24 sps:$4 sm:$0xff]  }
 0xc67   :  { %v1819_v1 = vadd.f32 %v5040_v60, %v1778_v27  ;;  %v1781_v2 = vadd.f32 %v5021_v62, %v1550_v50  ;;  %v5415_v50 = vld [vmem:[%s7609_s12 + $0x60] ss:$24 sps:$4 sm:$0xff]  }
 0xc69   :  { %v1822_v5 = vadd.f32 %v5043_v0, %v1781_v2  ;;  %v1825_v6 = vadd.f32 %v1819_v1, %v6319_v16  ;;  %v5395_v16 = vld [vmem:[%s7608_s11] sm:$0xff]  }
 0xc6a   :  { %5224 = vmatpush3.bf16.msra.mxu1 %v5395_v16  ;;  %v5429_v0 = vld [vmem:[%s7609_s12 + $0xc4] ss:$24 sps:$4 sm:$0xff]   ;;  %v5427_v1 = vld [vmem:[%s7609_s12 + $0xc0] ss:$24 sps:$4 sm:$0xff]  }
 0xc6b   :  { %v1826_v7 = vadd.f32 %v1822_v5, %v6347_v54  ;;  %v5396_v54 = vld [vmem:[%s7608_s11 + $0x8] sm:$0xff]   ;;  %5225 = vmatprep.subr.bf16.mxu1 %v5928_v4 }
 0xc6c   :  { %v5432_v2 = vld [vmem:[%s7609_s12 + $0xcc] ss:$24 sps:$4 sm:$0xff]   ;;  %v5430_v5 = vld [vmem:[%s7609_s12 + $0xc8] ss:$24 sps:$4 sm:$0xff]  }
 0xc6d   :  { %v5244_v8 = vpack.c.bf16 %v1826_v7, %v1825_v6  ;;  %v5435_v6 = vld [vmem:[%s7609_s12 + $0xf4] ss:$24 sps:$4 sm:$0xff]   ;;  %v5433_v7 = vld [vmem:[%s7609_s12 + $0xf0] ss:$24 sps:$4 sm:$0xff]  }
 0xc6e   :  { %5226 = vmatpush3.bf16.msra.mxu1 %v5396_v54  ;;  %v5442_v16 = vld [vmem:[%s7609_s12 + $0x128] ss:$24 sps:$4 sm:$0xff]   ;;  %v5447_v54 = vld [vmem:[%s7609_s12 + $0x154] ss:$24 sps:$4 sm:$0xff]  }
 0xc6f   :  { %5245 = vmatpush3.bf16.msra.mxu0 %v5244_v8  ;;  %5227 = vmatprep.subr.bf16.mxu1 %v5928_v4  ;;  %v5438_v8 = vld [vmem:[%s7609_s12 + $0xfc] ss:$24 sps:$4 sm:$0xff]  }
 0xc70   :  { %2393 = vmatprep.subr.bf16.mxu0 %v5405_v43  ;;  %v5460_v43 = vld [vmem:[%s7609_s12 + $0xa0] ss:$24 sps:$4 sm:$0xff]  }
 0xc72   :  { %5221 = vmatmul.mubr.msk.f32.vlgmr.msra.gmra.mrb[36].mxu0 %vm1828_vm10, %v1827_v9  ;;  %5228 = vmatpush3.bf16.msra.mxu1 %v5397_v26  ;;  %v5436_v9 = vld [vmem:[%s7609_s12 + $0xf8] ss:$24 sps:$4 sm:$0xff]  }
 0xc73   :  { %2425 = vmatprep.mubr.bf16.mxu0 %v5929_v30  ;;  %5229 = vmatprep.subr.bf16.mxu1 %v5928_v4 }
 0xc74   :  { %2394 = vmatpush1.bf16.msra.mxu0 %v5403_v49  ;;  %v5495_v49 = vld [vmem:[%s7611_s14 + $0x64] ss:$16 sps:$4 sm:$0xff]  }
 0xc75   :  { %2395 = vmatprep.subr.bf16.mxu0 %v5411_v55  ;;  %v5501_v55 = vld [vmem:[%s7611_s14 + $0x84] ss:$16 sps:$4 sm:$0xff]  }
 0xc76   :  { %5230 = vmatpush3.bf16.msra.mxu1 %v5398_v12 }
 0xc77   :  { %5231 = vmatprep.subr.bf16.mxu1 %v5928_v4 }
 0xc78   :  { %2396 = vmatpush1.bf16.msra.mxu0 %v5409_v57  ;;  %v5468_v57 = vld [vmem:[%s7609_s12 + $0x104] ss:$24 sps:$4 sm:$0xff]  }
 0xc79   :  { %2397 = vmatprep.subr.bf16.mxu0 %v5417_v39  ;;  %v5507_v39 = vld [vmem:[%s7611_s14 + $0xa4] ss:$16 sps:$4 sm:$0xff]  }
 0xc7a   :  { %5232 = vmatpush3.bf16.msra.mxu1 %v5399_v28 }
 0xc7b   :  { %5233 = vmatprep.subr.bf16.mxu1 %v5928_v4 }
 0xc7c   :  { %2398 = vmatpush1.bf16.msra.mxu0 %v5415_v50  ;;  %v5471_v50 = vld [vmem:[%s7609_s12 + $0x134] ss:$24 sps:$4 sm:$0xff]  }
 0xc7d   :  { %2399 = vmatprep.subr.bf16.mxu0 %v5423_v52  ;;  %v5513_v52 = vld [vmem:[%s7611_s14 + $0xc4] ss:$16 sps:$4 sm:$0xff]  }
 0xc7e   :  { %5234 = vmatpush3.bf16.msra.mxu1 %v5400_v29  ;;  %v2039_v29 = vld [vmem:[%s7629_s21] sm:$0x3] }
 0xc7f   :  { %5235 = vmatprep.subr.bf16.mxu1 %v5928_v4 }
 0xc80   :  { %2400 = vmatpush1.bf16.msra.mxu0 %v5421_v45  ;;  %v5474_v45 = vld [vmem:[%s7609_s12 + $0x164] ss:$24 sps:$4 sm:$0xff]  }
 0xc81   :  { %2401 = vmatprep.subr.bf16.mxu0 %v5429_v0  ;;  %v5486_v0 = vld [vmem:[%s7611_s14 + $0x2c] ss:$16 sps:$4 sm:$0xff]  }
 0xc82   :  { %5236 = vmatpush3.bf16.msra.mxu1 %v5401_v31 }
 0xc83   :  { %5237 = vmatprep.subr.bf16.mxu1 %v5928_v4 }
 0xc84   :  { %2402 = vmatpush1.bf16.msra.mxu0 %v5427_v1  ;;  %v5523_v1 = vld [vmem:[%s7611_s14 + $0x100] ss:$16 sps:$4 sm:$0xff]  }
 0xc85   :  { %2403 = vmatprep.subr.bf16.mxu0 %v5435_v6  ;;  %v5492_v6 = vld [vmem:[%s7611_s14 + $0x4c] ss:$16 sps:$4 sm:$0xff]  }
 0xc86   :  { %5238 = vmatpush3.bf16.msra.mxu1 %v5402_v32 }
 0xc87   :  { %2434 = vmatprep.subr.bf16.mxu1 %v5408_v53  ;;  %v5493_v53 = vld [vmem:[%s7611_s14 + $0x60] ss:$16 sps:$4 sm:$0xff]  }
 0xc88   :  { %2404 = vmatpush1.bf16.msra.mxu0 %v5433_v7  ;;  %v5529_v7 = vld [vmem:[%s7611_s14 + $0x120] ss:$16 sps:$4 sm:$0xff]  }
 0xd45   :  { %v1898_v11 = vpop.f32.mrb[36].mxu0 }
 0xd46   :  { %v1903_v17 = vsel %vm1902_vm11, %v1898_v11, 0.0  ;;  %v5222_v18 = vpop.f32.mrb[37].mxu0 }
 0xd47   :  { %1904 = vadd.xlane.f32.xlu1 %v1903_v17  ;;  %v5439_v17 = vld [vmem:[%s7609_s12 + $0x120] ss:$24 sps:$4 sm:$0xff]   ;;  %v5444_v18 = vld [vmem:[%s7609_s12 + $0x12c] ss:$24 sps:$4 sm:$0xff]  }
 0xdd4   :  { %v1905_v19 = vpop.xlane.xlu1 %1904 }
 0xdd5   :  { %v1906_v20 = vmul.f32 0.0078125, %v1905_v19  ;;  %v5445_v19 = vld [vmem:[%s7609_s12 + $0x150] ss:$24 sps:$4 sm:$0xff]  }
 0xdd7   :  { %v1907_v21 = vsub.f32 %v1898_v11, %v1906_v20  ;;  %v5441_v11 = vld [vmem:[%s7609_s12 + $0x124] ss:$24 sps:$4 sm:$0xff]  }
 0xdd8   :  { %2405 = vmatprep.subr.bf16.mxu0 %v5441_v11  ;;  %v5450_v20 = vld [vmem:[%s7609_s12 + $0x15c] ss:$24 sps:$4 sm:$0xff]  }
 0xdd9   :  { %v1908_v22 = vmul.f32 %v1907_v21, %v1907_v21  ;;  %2406 = vmatpush1.bf16.msra.mxu0 %v5439_v17  ;;  %v5498_v11 = vld [vmem:[%s7611_s14 + $0x6c] ss:$16 sps:$4 sm:$0xff]   ;;  %v5535_v17 = vld [vmem:[%s7611_s14 + $0x140] ss:$16 sps:$4 sm:$0xff]  }
 0xdda   :  { %2407 = vmatprep.subr.bf16.mxu0 %v5447_v54  ;;  %v5504_v54 = vld [vmem:[%s7611_s14 + $0x8c] ss:$16 sps:$4 sm:$0xff]  }
 0xddb   :  { %v1909_v23 = vsel %vm1902_vm11, %v1908_v22, 0.0  ;;  %v5453_v22 = vld [vmem:[%s7609_s12 + $0x14] ss:$24 sps:$4 sm:$0xff]  }
 0xddc   :  { %1910 = vadd.xlane.f32.xlu0 %v1909_v23  ;;  %v5477_v23 = vld [vmem:[%s7611_s14 + $0x4] ss:$16 sps:$4 sm:$0xff]  }
 0xddd   :  { %2408 = vmatpush1.bf16.msra.mxu0 %v5445_v19  ;;  %v5541_v19 = vld [vmem:[%s7611_s14 + $0x160] ss:$16 sps:$4 sm:$0xff]  }
 0xdde   :  { %2475 = vmatprep.subr.bf16.mxu0 %v5453_v22  ;;  %v5510_v22 = vld [vmem:[%s7611_s14 + $0xac] ss:$16 sps:$4 sm:$0xff]  }
 0xe69   :  { %v1911_v33 = vpop.xlane.xlu0 %1910 }
 0xe6a   :  { %v1912_v10 = vmul.f32 0.0078125, %v1911_v33  ;;  %v5451_v33 = vld [vmem:[%s7609_s12 + $0x10] ss:$24 sps:$4 sm:$0xff]  }
 0xe6c   :  { %v1913_v34 = vadd.f32 1e-05, %v1912_v10 }
 0xe6e   :  { %5851 = vrsqrt.f32 %v1913_v34  ;;  %v5456_v34 = vld [vmem:[%s7609_s12 + $0x44] ss:$24 sps:$4 sm:$0xff]  }
 0xe78   :  { %v5852_v15 = vpop.eup %5851 }
 0xe79   :  { %v1915_v38 = vmul.f32 %v5852_v15, %v1907_v21  ;;  %v5448_v21 = vld [vmem:[%s7609_s12 + $0x158] ss:$24 sps:$4 sm:$0xff]  }
 0xe7a   :  { %v5454_v15 = vld [vmem:[%s7609_s12 + $0x40] ss:$24 sps:$4 sm:$0xff]  }
 0xe7b   :  { %v1920_v46 = vmul.f32 %v1919_v36, %v1915_v38  ;;  %v5483_v36 = vld [vmem:[%s7611_s14 + $0x24] ss:$16 sps:$4 sm:$0xff]  }
 0xe7c   :  { %v5459_v38 = vld [vmem:[%s7609_s12 + $0x74] ss:$24 sps:$4 sm:$0xff]  }
 0xe7d   :  { %v1925_v48 = vadd.f32 %v1924_v41, %v1920_v46  ;;  %v5481_v41 = vld [vmem:[%s7611_s14 + $0x20] ss:$16 sps:$4 sm:$0xff]   ;;  %v5489_v46 = vld [vmem:[%s7611_s14 + $0x44] ss:$16 sps:$4 sm:$0xff]  }
 0xe7f   :  { %v1926_v4 = vpack.c.bf16 %v1925_v48, %v1925_v48  ;;  %v5462_v48 = vld [vmem:[%s7609_s12 + $0xa4] ss:$24 sps:$4 sm:$0xff]  }
 0xe81   :  { %5240 = vmatmul.mubr.bf16.vlgmr.msra.gmra.mrb[36].mxu1 %v1926_v4  ;;  %v5487_v4 = vld [vmem:[%s7611_s14 + $0x40] ss:$16 sps:$4 sm:$0xff]  }
 0xe82   :  { %2466 = vmatprep.mubr.bf16.mxu1 %v5929_v30  ;;  %2435 = vmatpush1.bf16.msra.mxu1 %v5406_v51  ;;  %v5465_v51 = vld [vmem:[%s7609_s12 + $0xd4] ss:$24 sps:$4 sm:$0xff]  }
 0xe83   :  { %2436 = vmatprep.subr.bf16.mxu1 %v5414_v24  ;;  %v5463_v24 = vld [vmem:[%s7609_s12 + $0xd0] ss:$24 sps:$4 sm:$0xff]  }
 0xe86   :  { %2437 = vmatpush1.bf16.msra.mxu1 %v5412_v37  ;;  %v5499_v37 = vld [vmem:[%s7611_s14 + $0x80] ss:$16 sps:$4 sm:$0xff]  }
 0xe87   :  { %2438 = vmatprep.subr.bf16.mxu1 %v5420_v40  ;;  %v5466_v40 = vld [vmem:[%s7609_s12 + $0x100] ss:$24 sps:$4 sm:$0xff]  }
 0xe8a   :  { %2439 = vmatpush1.bf16.msra.mxu1 %v5418_v42  ;;  %v5505_v42 = vld [vmem:[%s7611_s14 + $0xa0] ss:$16 sps:$4 sm:$0xff]  }
 0xe8b   :  { %2440 = vmatprep.subr.bf16.mxu1 %v5426_v56  ;;  %v5469_v56 = vld [vmem:[%s7609_s12 + $0x130] ss:$24 sps:$4 sm:$0xff]  }
 0xe8e   :  { %2441 = vmatpush1.bf16.msra.mxu1 %v5424_v59  ;;  %v5511_v59 = vld [vmem:[%s7611_s14 + $0xc0] ss:$16 sps:$4 sm:$0xff]  }
 0xe8f   :  { %2442 = vmatprep.subr.bf16.mxu1 %v5432_v2  ;;  %v5531_v2 = vld [vmem:[%s7611_s14 + $0x124] ss:$16 sps:$4 sm:$0xff]  }
 0xe92   :  { %2443 = vmatpush1.bf16.msra.mxu1 %v5430_v5  ;;  %v5484_v5 = vld [vmem:[%s7611_s14 + $0x28] ss:$16 sps:$4 sm:$0xff]  }
 0xe93   :  { %2444 = vmatprep.subr.bf16.mxu1 %v5438_v8  ;;  %v5537_v8 = vld [vmem:[%s7611_s14 + $0x144] ss:$16 sps:$4 sm:$0xff]  }
 0xe96   :  { %2445 = vmatpush1.bf16.msra.mxu1 %v5436_v9  ;;  %v5490_v9 = vld [vmem:[%s7611_s14 + $0x48] ss:$16 sps:$4 sm:$0xff]  }
 0xe97   :  { %2446 = vmatprep.subr.bf16.mxu1 %v5444_v18  ;;  %v5543_v18 = vld [vmem:[%s7611_s14 + $0x164] ss:$16 sps:$4 sm:$0xff]  }
 0xe9a   :  { %2447 = vmatpush1.bf16.msra.mxu1 %v5442_v16  ;;  %v5496_v16 = vld [vmem:[%s7611_s14 + $0x68] ss:$16 sps:$4 sm:$0xff]  }
 0xe9b   :  { %2448 = vmatprep.subr.bf16.mxu1 %v5450_v20  ;;  %v5549_v20 = vld [vmem:[%s7611_s14 + $0x184] ss:$16 sps:$4 sm:$0xff]  }
 0xe9e   :  { %2449 = vmatpush1.bf16.msra.mxu1 %v5448_v21  ;;  %v5502_v21 = vld [vmem:[%s7611_s14 + $0x88] ss:$16 sps:$4 sm:$0xff]  }
 0xe9f   :  { %3838 = vmatprep.subr.bf16.mxu1 %v5477_v23  ;;  %v5547_v23 = vld [vmem:[%s7611_s14 + $0x180] ss:$16 sps:$4 sm:$0xff]  }
 0xf54   :  { %v2025_v60 = vpop.f32.mrb[36].mxu1 }
 0xf55   :  { %v2031_v61 = vmul.f32 %v2025_v60, %v2025_v60  ;;  %v5241_v25 = vpop.f32.mrb[37].mxu1 }
 0xf56   :  { %v2028_v27 = vpop.f32.mrb[38].mxu1  ;;  %v5480_v25 = vld [vmem:[%s7611_s14 + $0xc] ss:$16 sps:$4 sm:$0xff]  }
 0xf57   :  { %v5242_v62 = vpop.f32.mrb[39].mxu1  ;;  %v2032_v63 = vsel %vm1902_vm11, %v2031_v61, 0.0  ;;  %v5472_v61 = vld [vmem:[%s7609_s12 + $0x160] ss:$24 sps:$4 sm:$0xff]  }
 0xf58   :  { %2033 = vadd.xlane.f32.xlu0 %v2032_v63  ;;  %v5517_v27 = vld [vmem:[%s7611_s14 + $0xe0] ss:$16 sps:$4 sm:$0xff]   ;;  %v5525_v62 = vld [vmem:[%s7611_s14 + $0x104] ss:$16 sps:$4 sm:$0xff]   ;;  %v5478_v63 = vld [vmem:[%s7611_s14 + $0x8] ss:$16 sps:$4 sm:$0xff]  }
 0xfe5   :  { %v2034_v26 = vpop.xlane.xlu0 %2033 }
 0xfe6   :  { %v2035_v12 = vmax.f32 %v2034_v26, 1e-12  ;;  %v5508_v26 = vld [vmem:[%s7611_s14 + $0xa8] ss:$16 sps:$4 sm:$0xff]  }
 0xfe8   :  { %5853 = vrsqrt.f32 %v2035_v12  ;;  %v5516_v12 = vld [vmem:[%s7611_s14 + $0xcc] ss:$16 sps:$4 sm:$0xff]  }
 0xff2   :  { %v5854_v28 = vpop.eup %5853 }
 0xff3   :  { %v2037_v31 = vmul.f32 %v5854_v28, %v2025_v60  ;;  %v5519_v60 = vld [vmem:[%s7611_s14 + $0xe4] ss:$16 sps:$4 sm:$0xff]   ;;  %v5514_v28 = vld [vmem:[%s7611_s14 + $0xc8] ss:$16 sps:$4 sm:$0xff]  }
 0xff5   :  { %2038 = vst [vmem:[#allocation2] sm:$0x3] %v2037_v31  ;;  %v2040_v32 = vmul.f32 %v2039_v29, %v2037_v31  ;;  %v5522_v29 = vld [vmem:[%s7611_s14 + $0xec] ss:$16 sps:$4 sm:$0xff]   ;;  %v5520_v31 = vld [vmem:[%s7611_s14 + $0xe8] ss:$16 sps:$4 sm:$0xff]  }
 0xff7   :  { %v6747_v10 = vpack.c.bf16 %v2040_v32, %v2040_v32  ;;  %2041 = vst [vmem:[#allocation4] sm:$0x3] %v2040_v32  ;;  %v5528_v32 = vld [vmem:[%s7611_s14 + $0x10c] ss:$16 sps:$4 sm:$0xff]  }
 0xff9   :  { %2426 = vmatmul.mubr.bf16.vlgmr.msra.gmra.mrb[40].mxu0 %v6747_v10  ;;  %2467 = vmatmul.mubr.bf16.vlgmr.msra.gmra.mrb[40].mxu1 %v6747_v10 }
 0xffa   :  { %2476 = vmatpush1.bf16.msra.mxu0 %v5451_v33  ;;  %2507 = vmatprep.mubr.bf16.mxu0 %v5929_v30  ;;  %v5457_v30 = vld [vmem:[%s7609_s12 + $0x70] ss:$24 sps:$4 sm:$0xff]  }
 0xffb   :  { %2477 = vmatprep.subr.bf16.mxu0 %v5456_v34  ;;  %3839 = vmatpush1.bf16.msra.mxu1 %v5475_v13  ;;  %v5526_v33 = vld [vmem:[%s7611_s14 + $0x108] ss:$16 sps:$4 sm:$0xff]   ;;  %v5540_v13 = vld [vmem:[%s7611_s14 + $0x14c] ss:$16 sps:$4 sm:$0xff]  }
 0xffc   :  { %3840 = vmatprep.subr.bf16.mxu1 %v5483_v36  ;;  %v5532_v34 = vld [vmem:[%s7611_s14 + $0x128] ss:$16 sps:$4 sm:$0xff]  }
 0xffd   :  { %v5538_v36 = vld [vmem:[%s7611_s14 + $0x148] ss:$16 sps:$4 sm:$0xff]  }
 0xffe   :  { %2478 = vmatpush1.bf16.msra.mxu0 %v5454_v15  ;;  %v5546_v15 = vld [vmem:[%s7611_s14 + $0x16c] ss:$16 sps:$4 sm:$0xff]  }
 0xfff   :  { %2479 = vmatprep.subr.bf16.mxu0 %v5459_v38  ;;  %3841 = vmatpush1.bf16.msra.mxu1 %v5481_v41  ;;  %v5544_v38 = vld [vmem:[%s7611_s14 + $0x168] ss:$16 sps:$4 sm:$0xff]   ;;  %v5552_v41 = vld [vmem:[%s7611_s14 + $0x18c] ss:$16 sps:$4 sm:$0xff]  }
0x1000   :  { %3842 = vmatprep.subr.bf16.mxu1 %v5489_v46  ;;  %v5550_v46 = vld [vmem:[%s7611_s14 + $0x188] ss:$16 sps:$4 sm:$0xff]  }
0x1002   :  { %2480 = vmatpush1.bf16.msra.mxu0 %v5457_v30  ;;  %v5555_v30 = vld [vmem:[%s7611_s14 + $0x1a4] ss:$16 sps:$4 sm:$0xff]  }
0x1003   :  { %2481 = vmatprep.subr.bf16.mxu0 %v5462_v48  ;;  %3843 = vmatpush1.bf16.msra.mxu1 %v5487_v4  ;;  %v5558_v48 = vld [vmem:[%s7611_s14 + $0x1ac] ss:$16 sps:$4 sm:$0xff]   ;;  %v5553_v4 = vld [vmem:[%s7611_s14 + $0x1a0] ss:$16 sps:$4 sm:$0xff]  }
0x1004   :  { %3844 = vmatprep.subr.bf16.mxu1 %v5495_v49  ;;  %v5556_v49 = vld [vmem:[%s7611_s14 + $0x1a8] ss:$16 sps:$4 sm:$0xff]  }
0x1006   :  { %2482 = vmatpush1.bf16.msra.mxu0 %v5460_v43  ;;  %v5561_v43 = vld [vmem:[%s7611_s14 + $0x1c4] ss:$16 sps:$4 sm:$0xff]  }
0x1007   :  { %2483 = vmatprep.subr.bf16.mxu0 %v5465_v51  ;;  %3845 = vmatpush1.bf16.msra.mxu1 %v5493_v53  ;;  %v5564_v51 = vld [vmem:[%s7611_s14 + $0x1cc] ss:$16 sps:$4 sm:$0xff]   ;;  %v5559_v53 = vld [vmem:[%s7611_s14 + $0x1c0] ss:$16 sps:$4 sm:$0xff]  }
0x1008   :  { %3846 = vmatprep.subr.bf16.mxu1 %v5501_v55  ;;  %v5562_v55 = vld [vmem:[%s7611_s14 + $0x1c8] ss:$16 sps:$4 sm:$0xff]  }
0x100a   :  { %2484 = vmatpush1.bf16.msra.mxu0 %v5463_v24  ;;  %v5567_v24 = vld [vmem:[%s7611_s14 + $0x1e4] ss:$16 sps:$4 sm:$0xff]  }
0x100b   :  { %2485 = vmatprep.subr.bf16.mxu0 %v5468_v57  ;;  %3847 = vmatpush1.bf16.msra.mxu1 %v5499_v37  ;;  %v5570_v57 = vld [vmem:[%s7611_s14 + $0x1ec] ss:$16 sps:$4 sm:$0xff]   ;;  %v5565_v37 = vld [vmem:[%s7611_s14 + $0x1e0] ss:$16 sps:$4 sm:$0xff]  }
0x100c   :  { %3848 = vmatprep.subr.bf16.mxu1 %v5507_v39  ;;  %v5568_v39 = vld [vmem:[%s7611_s14 + $0x1e8] ss:$16 sps:$4 sm:$0xff]  }
0x100e   :  { %2486 = vmatpush1.bf16.msra.mxu0 %v5466_v40  ;;  %v5573_v40 = vld [vmem:[%s7611_s14 + $0x204] ss:$16 sps:$4 sm:$0xff]  }
0x100f   :  { %2487 = vmatprep.subr.bf16.mxu0 %v5471_v50  ;;  %3849 = vmatpush1.bf16.msra.mxu1 %v5505_v42  ;;  %v5576_v50 = vld [vmem:[%s7611_s14 + $0x20c] ss:$16 sps:$4 sm:$0xff]   ;;  %v2042_v42 = vld [vmem:[%s7610_s13] sm:$0x77] }
0x1010   :  { %3850 = vmatprep.subr.bf16.mxu1 %v5513_v52  ;;  %v2043_v52 = vld [vmem:[%s7610_s13 + $0x8] sm:$0x77] }
0x1012   :  { %2488 = vmatpush1.bf16.msra.mxu0 %v5469_v56  ;;  %v2102_v56 = vrot.slane %v2042_v42, %v6145_v44 }
0x1013   :  { %2489 = vmatprep.subr.bf16.mxu0 %v5474_v45  ;;  %3851 = vmatpush1.bf16.msra.mxu1 %v5511_v59  ;;  %v2110_v45 = vrot.slane %v2043_v52, %v6145_v44  ;;  %v2106_v59 = vrot.slane %v2042_v42, %v6310_v3 }
0x1014   :  { %3852 = vmatprep.subr.bf16.mxu1 %v5519_v60  ;;  %v2114_v60 = vrot.slane %v2043_v52, %v6310_v3 }
0x1016   :  { %2490 = vmatpush1.bf16.msra.mxu0 %v5472_v61  ;;  %v2525_v61 = vrot.slane %v2042_v42, %v6153_v47 }
0x1017   :  { %3961 = vmatprep.subr.bf16.mxu0 %v5480_v25  ;;  %3853 = vmatpush1.bf16.msra.mxu1 %v5517_v27  ;;  %v2132_v25 = vrot.slane %v2102_v56, %v6145_v44  ;;  %v2140_v27 = vrot.slane %v2110_v45, %v6145_v44  ;;  %v5588_v56 = vld [vmem:[%s7611_s14 + $0x24c] ss:$16 sps:$4 sm:$0xff]   ;;  %v5583_v45 = vld [vmem:[%s7611_s14 + $0x240] ss:$16 sps:$4 sm:$0xff]  }
0x1018   :  { %3854 = vmatprep.subr.bf16.mxu1 %v5525_v62  ;;  %v2533_v62 = vrot.slane %v2043_v52, %v6153_v47 }
0x1019   :  { %2508 = vmatmul.mubr.bf16.vlgmr.msra.gmra.mrb[44].mxu0 %v6747_v10  ;;  %v5534_v10 = vld [vmem:[%s7611_s14 + $0x12c] ss:$16 sps:$4 sm:$0xff]  }
0x101a   :  { %3962 = vmatpush1.bf16.msra.mxu0 %v5478_v63  ;;  %v2136_v63 = vrot.slane %v2106_v59, %v6145_v44  ;;  %v5586_v59 = vld [vmem:[%s7611_s14 + $0x248] ss:$16 sps:$4 sm:$0xff]  }
0x101b   :  { %3963 = vmatprep.subr.bf16.mxu0 %v5486_v0  ;;  %3855 = vmatpush1.bf16.msra.mxu1 %v5523_v1  ;;  %v2529_v0 = vrot.slane %v2042_v42, %v6582_v14  ;;  %v2144_v1 = vrot.slane %v2114_v60, %v6145_v44  ;;  %v5591_v60 = vld [vmem:[%s7611_s14 + $0x264] ss:$16 sps:$4 sm:$0xff]  }
0x101c   :  { %3856 = vmatprep.subr.bf16.mxu1 %v5531_v2  ;;  %v2537_v2 = vrot.slane %v2043_v52, %v6582_v14 }
0x101e   :  { %3964 = vmatpush1.bf16.msra.mxu0 %v5484_v5  ;;  %v2585_v5 = vrot.slane %v2042_v42, %v6166_v58 }
0x101f   :  { %3965 = vmatprep.subr.bf16.mxu0 %v5492_v6  ;;  %3857 = vmatpush1.bf16.msra.mxu1 %v5529_v7  ;;  %v2593_v6 = vrot.slane %v2043_v52, %v6166_v58 }
0x1020   :  { %3858 = vmatprep.subr.bf16.mxu1 %v5537_v8  ;;  %v2555_v8 = vrot.slane %v2525_v61, %v6153_v47  ;;  %v5594_v61 = vld [vmem:[%s7611_s14 + $0x26c] ss:$16 sps:$4 sm:$0xff]  }
0x1022   :  { %3966 = vmatpush1.bf16.msra.mxu0 %v5490_v9 }
0x1023   :  { %3967 = vmatprep.subr.bf16.mxu0 %v5498_v11  ;;  %3859 = vmatpush1.bf16.msra.mxu1 %v5535_v17  ;;  %v2589_v11 = vrot.slane %v2042_v42, %v6631_v35  ;;  %v5580_v42 = vld [vmem:[%s7611_s14 + $0x228] ss:$16 sps:$4 sm:$0xff]  }
0x1024   :  { %3860 = vmatprep.subr.bf16.mxu1 %v5543_v18 }
0x1026   :  { %3968 = vmatpush1.bf16.msra.mxu0 %v5496_v16  ;;  %v2563_v16 = vrot.slane %v2533_v62, %v6153_v47  ;;  %v7067_v62 = vld [vmem:[%s7610_s13 + $0x10] sm:$0x77] }
0x1027   :  { %3969 = vmatprep.subr.bf16.mxu0 %v5504_v54  ;;  %3861 = vmatpush1.bf16.msra.mxu1 %v5541_v19 }
0x1028   :  { %3862 = vmatprep.subr.bf16.mxu1 %v5549_v20  ;;  %v2597_v20 = vrot.slane %v2043_v52, %v6631_v35  ;;  %v5585_v52 = vld [vmem:[%s7611_s14 + $0x244] ss:$16 sps:$4 sm:$0xff]  }
0x102a   :  { %3970 = vmatpush1.bf16.msra.mxu0 %v5502_v21 }
0x102b   :  { %3971 = vmatprep.subr.bf16.mxu0 %v5510_v22  ;;  %3863 = vmatpush1.bf16.msra.mxu1 %v5547_v23  ;;  %v2559_v22 = vrot.slane %v2529_v0, %v6153_v47  ;;  %v5600_v0 = vld [vmem:[%s7611_s14 + $0x28c] ss:$16 sps:$4 sm:$0xff]  }
0x102c   :  { %3864 = vmatprep.subr.bf16.mxu1 %v5555_v30 }
0x102e   :  { %3972 = vmatpush1.bf16.msra.mxu0 %v5508_v26  ;;  %v2567_v26 = vrot.slane %v2537_v2, %v6153_v47  ;;  %v5595_v2 = vld [vmem:[%s7611_s14 + $0x280] ss:$16 sps:$4 sm:$0xff]  }
0x102f   :  { %3973 = vmatprep.subr.bf16.mxu0 %v5516_v12  ;;  %3865 = vmatpush1.bf16.msra.mxu1 %v5553_v4 }
0x1030   :  { %3866 = vmatprep.subr.bf16.mxu1 %v5561_v43 }
0x1032   :  { %3974 = vmatpush1.bf16.msra.mxu0 %v5514_v28 }
0x1033   :  { %3975 = vmatprep.subr.bf16.mxu0 %v5522_v29  ;;  %3867 = vmatpush1.bf16.msra.mxu1 %v5559_v53 }
0x1034   :  { %3868 = vmatprep.subr.bf16.mxu1 %v5567_v24  ;;  %v5574_v24 = vld [vmem:[%s7611_s14 + $0x208] ss:$16 sps:$4 sm:$0xff]  }
0x1036   :  { %3976 = vmatpush1.bf16.msra.mxu0 %v5520_v31  ;;  %v2615_v31 = vrot.slane %v2585_v5, %v6166_v58  ;;  %v5598_v5 = vld [vmem:[%s7611_s14 + $0x288] ss:$16 sps:$4 sm:$0xff]  }
0x1037   :  { %3977 = vmatprep.subr.bf16.mxu0 %v5528_v32  ;;  %3869 = vmatpush1.bf16.msra.mxu1 %v5565_v37  ;;  %v5579_v37 = vld [vmem:[%s7611_s14 + $0x224] ss:$16 sps:$4 sm:$0xff]  }
0x1038   :  { %3879 = vmatprep.subr.bf16.mxu1 %v5573_v40 }
0x103a   :  { %3978 = vmatpush1.bf16.msra.mxu0 %v5526_v33  ;;  %v2623_v33 = vrot.slane %v2593_v6, %v6166_v58  ;;  %v5603_v6 = vld [vmem:[%s7611_s14 + $0x2a4] ss:$16 sps:$4 sm:$0xff]  }
0x103b   :  { %3979 = vmatprep.subr.bf16.mxu0 %v5534_v10 }
0x103e   :  { %3980 = vmatpush1.bf16.msra.mxu0 %v5532_v34 }
0x103f   :  { %3981 = vmatprep.subr.bf16.mxu0 %v5540_v13 }
0x1042   :  { %3982 = vmatpush1.bf16.msra.mxu0 %v5538_v36 }
0x1043   :  { %3983 = vmatprep.subr.bf16.mxu0 %v5546_v15  ;;  %v2619_v15 = vrot.slane %v2589_v11, %v6166_v58  ;;  %v5601_v11 = vld [vmem:[%s7611_s14 + $0x2a0] ss:$16 sps:$4 sm:$0xff]  }
0x1046   :  { %3984 = vmatpush1.bf16.msra.mxu0 %v5544_v38 }
0x1047   :  { %3985 = vmatprep.subr.bf16.mxu0 %v5552_v41 }
0x104a   :  { %3986 = vmatpush1.bf16.msra.mxu0 %v5550_v46  ;;  %v2627_v46 = vrot.slane %v2597_v20, %v6166_v58 }
0x104b   :  { %3987 = vmatprep.subr.bf16.mxu0 %v5558_v48 }
0x104e   :  { %3988 = vmatpush1.bf16.msra.mxu0 %v5556_v49 }
0x104f   :  { %3989 = vmatprep.subr.bf16.mxu0 %v5564_v51 }
0x1052   :  { %3990 = vmatpush1.bf16.msra.mxu0 %v5562_v55  ;;  %v5571_v55 = vld [vmem:[%s7611_s14 + $0x200] ss:$16 sps:$4 sm:$0xff]  }
0x1053   :  { %3991 = vmatprep.subr.bf16.mxu0 %v5570_v57 }
0x1056   :  { %3992 = vmatpush1.bf16.msra.mxu0 %v5568_v39  ;;  %v5582_v39 = vld [vmem:[%s7611_s14 + $0x22c] ss:$16 sps:$4 sm:$0xff]  }
0x1057   :  { %4002 = vmatprep.subr.bf16.mxu0 %v5576_v50  ;;  %v5577_v50 = vld [vmem:[%s7611_s14 + $0x220] ss:$16 sps:$4 sm:$0xff]  }
0x10cc   :  { %v2427_v7 = vpop.f32.mrb[40].mxu0  ;;  %v2468_v9 = vpop.f32.mrb[40].mxu1 }
0x10cd   :  { %v2428_v17 = vadd.f32 %v2427_v7, %v2132_v25  ;;  %v2469_v18 = vadd.f32 %v2468_v9, %v2140_v27  ;;  %v2429_v54 = vpop.f32.mrb[41].mxu0  ;;  %v2470_v19 = vpop.f32.mrb[41].mxu1  ;;  %v5589_v25 = vld [vmem:[%s7611_s14 + $0x260] ss:$16 sps:$4 sm:$0xff]   ;;  %v5592_v27 = vld [vmem:[%s7611_s14 + $0x268] ss:$16 sps:$4 sm:$0xff]   ;;  %v2541_v9 = vrot.slane %v7067_v62, %v6153_v47 }
0x10ce   :  { %v2430_v21 = vadd.f32 %v2429_v54, %v2136_v63  ;;  %v2471_v23 = vadd.f32 %v2470_v19, %v2144_v1  ;;  %v2431_v12 = vpop.f32.mrb[42].mxu0  ;;  %v2472_v28 = vpop.f32.mrb[42].mxu1  ;;  %v5597_v63 = vld [vmem:[%s7611_s14 + $0x284] ss:$16 sps:$4 sm:$0xff]   ;;  %v2118_v1 = vrot.slane %v7067_v62, %v6145_v44  ;;  %v5606_v7 = vld [vmem:[%s7611_s14 + $0x2ac] ss:$16 sps:$4 sm:$0xff]  }
0x10cf   :  { %v2516_v29 = vmax.f32 %v2428_v17, 0.0  ;;  %v2518_v32 = vmax.f32 %v2469_v18, 0.0  ;;  %v2432_v10 = vpop.f32.mrb[43].mxu0  ;;  %v2473_v34 = vpop.f32.mrb[43].mxu1  ;;  %v5604_v17 = vld [vmem:[%s7611_s14 + $0x2a8] ss:$16 sps:$4 sm:$0xff]   ;;  %v2601_v18 = vrot.slane %v7067_v62, %v6166_v58 }
0x10d0   :  { %v2517_v13 = vmax.f32 %v2430_v21, 0.0  ;;  %v2519_v36 = vmax.f32 %v2471_v23, 0.0  ;;  %v5612_v54 = vld [vmem:[%s7611_s14 + $0x2cc] ss:$16 sps:$4 sm:$0xff]   ;;  %v2571_v21 = vrot.slane %v2541_v9, %v6153_v47  ;;  %v5610_v12 = vld [vmem:[%s7611_s14 + $0x2c8] ss:$16 sps:$4 sm:$0xff]  }
0x10d1   :  { %v2576_v38 = vmul.f32 %v2555_v8, %v2516_v29  ;;  %v2578_v41 = vmul.f32 %v2563_v16, %v2518_v32  ;;  %v2148_v8 = vrot.slane %v2118_v1, %v6145_v44  ;;  %v5609_v16 = vld [vmem:[%s7611_s14 + $0x2c4] ss:$16 sps:$4 sm:$0xff]   ;;  %v2631_v29 = vrot.slane %v2601_v18, %v6166_v58  ;;  %v5613_v34 = vld [vmem:[%s7611_s14 + $0x2e0] ss:$16 sps:$4 sm:$0xff]   ;;  %v5658_v9 = vld [vmem:[%s7611_s14 + $0x3c8] ss:$16 sps:$4 sm:$0xff]  }
0x10d2   :  { %v2577_v30 = vmul.f32 %v2559_v22, %v2517_v13  ;;  %v2579_v48 = vmul.f32 %v2567_v26, %v2519_v36  ;;  %v5607_v26 = vld [vmem:[%s7611_s14 + $0x2c0] ss:$16 sps:$4 sm:$0xff]   ;;  %v5615_v32 = vld [vmem:[%s7611_s14 + $0x2e4] ss:$16 sps:$4 sm:$0xff]   ;;  %v5616_v13 = vld [vmem:[%s7611_s14 + $0x2e8] ss:$16 sps:$4 sm:$0xff]  }
0x10d3   :  { %v2636_v4 = vadd.f32 %v2615_v31, %v2576_v38  ;;  %v7020_v49 = vadd.f32 %v2623_v33, %v2578_v41  ;;  %v5618_v33 = vld [vmem:[%s7611_s14 + $0x2ec] ss:$16 sps:$4 sm:$0xff]   ;;  %v5619_v41 = vld [vmem:[%s7611_s14 + $0x300] ss:$16 sps:$4 sm:$0xff]   ;;  %v5657_v1 = vld [vmem:[%s7611_s14 + $0x3c4] ss:$16 sps:$4 sm:$0xff]  }
0x10d4   :  { %v2637_v43 = vadd.f32 %v2619_v15, %v2577_v30  ;;  %v2639_v51 = vadd.f32 %v2627_v46, %v2579_v48  ;;  %v5621_v15 = vld [vmem:[%s7611_s14 + $0x304] ss:$16 sps:$4 sm:$0xff]   ;;  %v5624_v38 = vld [vmem:[%s7611_s14 + $0x30c] ss:$16 sps:$4 sm:$0xff]   ;;  %v5622_v46 = vld [vmem:[%s7611_s14 + $0x308] ss:$16 sps:$4 sm:$0xff]  }
0x10d5   :  { %v2642_v57 = vpack.c.bf16 %v2636_v4, %v2636_v4  ;;  %v5627_v30 = vld [vmem:[%s7611_s14 + $0x324] ss:$16 sps:$4 sm:$0xff]   ;;  %v5630_v48 = vld [vmem:[%s7611_s14 + $0x32c] ss:$16 sps:$4 sm:$0xff]   ;;  %v5625_v4 = vld [vmem:[%s7611_s14 + $0x320] ss:$16 sps:$4 sm:$0xff]  }
0x10d6   :  { %v2643_v53 = vpack.c.bf16 %v2637_v43, %v2637_v43  ;;  %v2645_v40 = vpack.c.bf16 %v2639_v51, %v2639_v51  ;;  %v5628_v43 = vld [vmem:[%s7611_s14 + $0x328] ss:$16 sps:$4 sm:$0xff]   ;;  %v5633_v51 = vld [vmem:[%s7611_s14 + $0x344] ss:$16 sps:$4 sm:$0xff]  }
0x10d8   :  { %3870 = vmatprep.mubr.bf16.mxu1 %v2643_v53  ;;  %3993 = vmatprep.mubr.bf16.mxu0 %v2643_v53  ;;  %v5636_v53 = vld [vmem:[%s7611_s14 + $0x34c] ss:$16 sps:$4 sm:$0xff]  }
0x10d9   :  { %3871 = vmatmul.mubr.bf16.vlgmr.msra.gmra.mrb[44].mxu1 %v2642_v57  ;;  %3994 = vmatmul.mubr.bf16.vlgmr.msra.gmra.mrb[48].mxu0 %v2642_v57  ;;  %v5639_v57 = vld [vmem:[%s7611_s14 + $0x364] ss:$16 sps:$4 sm:$0xff]  }
0x10da   :  { %3880 = vmatpush1.bf16.msra.mxu1 %v5571_v55  ;;  %4003 = vmatpush1.bf16.msra.mxu0 %v5574_v24  ;;  %v5631_v55 = vld [vmem:[%s7611_s14 + $0x340] ss:$16 sps:$4 sm:$0xff]   ;;  %v5634_v24 = vld [vmem:[%s7611_s14 + $0x348] ss:$16 sps:$4 sm:$0xff]  }
0x10db   :  { %3911 = vmatprep.mubr.bf16.mxu1 %v2645_v40  ;;  %4034 = vmatprep.mubr.bf16.mxu0 %v2645_v40  ;;  %v5637_v40 = vld [vmem:[%s7611_s14 + $0x360] ss:$16 sps:$4 sm:$0xff]  }
0x10dc   :  { %3881 = vmatprep.subr.bf16.mxu1 %v5579_v37  ;;  %4004 = vmatprep.subr.bf16.mxu0 %v5582_v39  ;;  %v5642_v37 = vld [vmem:[%s7611_s14 + $0x36c] ss:$16 sps:$4 sm:$0xff]   ;;  %v2122_v39 = vrot.slane %v7067_v62, %v6310_v3 }
0x10de   :  { %3882 = vmatpush1.bf16.msra.mxu1 %v5577_v50  ;;  %4005 = vmatpush1.bf16.msra.mxu0 %v5580_v42  ;;  %v5640_v50 = vld [vmem:[%s7611_s14 + $0x368] ss:$16 sps:$4 sm:$0xff]   ;;  %v5645_v42 = vld [vmem:[%s7611_s14 + $0x384] ss:$16 sps:$4 sm:$0xff]  }
0x10df   :  { %3883 = vmatprep.subr.bf16.mxu1 %v5585_v52  ;;  %4006 = vmatprep.subr.bf16.mxu0 %v5588_v56  ;;  %v5648_v52 = vld [vmem:[%s7611_s14 + $0x38c] ss:$16 sps:$4 sm:$0xff]   ;;  %v2152_v56 = vrot.slane %v2122_v39, %v6145_v44  ;;  %v5706_v39 = vld [vmem:[%s7611_s14 + $0x4c8] ss:$16 sps:$4 sm:$0xff]  }
0x10e2   :  { %3884 = vmatpush1.bf16.msra.mxu1 %v5583_v45  ;;  %4007 = vmatpush1.bf16.msra.mxu0 %v5586_v59  ;;  %v5643_v45 = vld [vmem:[%s7611_s14 + $0x380] ss:$16 sps:$4 sm:$0xff]   ;;  %v5646_v59 = vld [vmem:[%s7611_s14 + $0x388] ss:$16 sps:$4 sm:$0xff]  }
0x10e3   :  { %3885 = vmatprep.subr.bf16.mxu1 %v5591_v60  ;;  %4008 = vmatprep.subr.bf16.mxu0 %v5594_v61  ;;  %v5651_v60 = vld [vmem:[%s7611_s14 + $0x3a4] ss:$16 sps:$4 sm:$0xff]   ;;  %v5654_v61 = vld [vmem:[%s7611_s14 + $0x3ac] ss:$16 sps:$4 sm:$0xff]  }
0x10e6   :  { %3886 = vmatpush1.bf16.msra.mxu1 %v5589_v25  ;;  %4009 = vmatpush1.bf16.msra.mxu0 %v5592_v27  ;;  %v2545_v27 = vrot.slane %v7067_v62, %v6582_v14 }
0x10e7   :  { %3887 = vmatprep.subr.bf16.mxu1 %v5597_v63  ;;  %4010 = vmatprep.subr.bf16.mxu0 %v5600_v0  ;;  %v5649_v63 = vld [vmem:[%s7611_s14 + $0x3a0] ss:$16 sps:$4 sm:$0xff]   ;;  %v5652_v0 = vld [vmem:[%s7611_s14 + $0x3a8] ss:$16 sps:$4 sm:$0xff]  }
0x10ea   :  { %3888 = vmatpush1.bf16.msra.mxu1 %v5595_v2  ;;  %4011 = vmatpush1.bf16.msra.mxu0 %v5598_v5  ;;  %v5660_v2 = vld [vmem:[%s7611_s14 + $0x3cc] ss:$16 sps:$4 sm:$0xff]  }
0x10eb   :  { %3889 = vmatprep.subr.bf16.mxu1 %v5603_v6  ;;  %4012 = vmatprep.subr.bf16.mxu0 %v5606_v7  ;;  %v2575_v6 = vrot.slane %v2545_v27, %v6153_v47  ;;  %v2605_v7 = vrot.slane %v7067_v62, %v6631_v35  ;;  %v5666_v62 = vld [vmem:[%s7611_s14 + $0x3ec] ss:$16 sps:$4 sm:$0xff]   ;;  %v5721_v27 = vld [vmem:[%s7611_s14 + $0x520] ss:$16 sps:$4 sm:$0xff]  }
0x10ec   :  { %v2509_v19 = vpop.f32.mrb[44].mxu0 }
0x10ed   :  { %v2510_v20 = vadd.f32 %v2509_v19, %v2148_v8  ;;  %v7107_v22 = vpop.f32.mrb[45].mxu0  ;;  %v5655_v8 = vld [vmem:[%s7611_s14 + $0x3c0] ss:$16 sps:$4 sm:$0xff]   ;;  %v2635_v18 = vrot.slane %v2605_v7, %v6166_v58  ;;  %v5669_v19 = vld [vmem:[%s7611_s14 + $0x404] ss:$16 sps:$4 sm:$0xff]  }
0x10ee   :  { %v2513_v23 = vpop.f32.mrb[46].mxu0  ;;  %3890 = vmatpush1.bf16.msra.mxu1 %v5601_v11  ;;  %4013 = vmatpush1.bf16.msra.mxu0 %v5604_v17  ;;  %v2512_v25 = vadd.f32 %v7107_v22, %v2152_v56  ;;  %v5663_v11 = vld [vmem:[%s7611_s14 + $0x3e4] ss:$16 sps:$4 sm:$0xff]   ;;  %v5667_v22 = vld [vmem:[%s7611_s14 + $0x400] ss:$16 sps:$4 sm:$0xff]  }
0x10ef   :  { %v2520_v28 = vmax.f32 %v2510_v20, 0.0  ;;  %v2514_v31 = vpop.f32.mrb[47].mxu0  ;;  %3891 = vmatprep.subr.bf16.mxu1 %v5609_v16  ;;  %4014 = vmatprep.subr.bf16.mxu0 %v5612_v54  ;;  %v5661_v16 = vld [vmem:[%s7611_s14 + $0x3e0] ss:$16 sps:$4 sm:$0xff]   ;;  %v5664_v54 = vld [vmem:[%s7611_s14 + $0x3e8] ss:$16 sps:$4 sm:$0xff]   ;;  %v2644_v23 = vpack.c.bf16 %v7020_v49, %v7020_v49 }
0x10f0   :  { %v2521_v5 = vmax.f32 %v2512_v25, 0.0  ;;  %v5672_v20 = vld [vmem:[%s7611_s14 + $0x40c] ss:$16 sps:$4 sm:$0xff]   ;;  %v5673_v49 = vld [vmem:[%s7611_s14 + $0x420] ss:$16 sps:$4 sm:$0xff]  }
0x10f1   :  { %v2580_v10 = vmul.f32 %v2571_v21, %v2520_v28  ;;  %v5675_v28 = vld [vmem:[%s7611_s14 + $0x424] ss:$16 sps:$4 sm:$0xff]   ;;  %v5676_v31 = vld [vmem:[%s7611_s14 + $0x428] ss:$16 sps:$4 sm:$0xff]   ;;  %v5726_v25 = vld [vmem:[%s7611_s14 + $0x52c] ss:$16 sps:$4 sm:$0xff]  }
0x10f2   :  { %3892 = vmatpush1.bf16.msra.mxu1 %v5607_v26  ;;  %4015 = vmatpush1.bf16.msra.mxu0 %v5610_v12  ;;  %v2581_v17 = vmul.f32 %v2575_v6, %v2521_v5  ;;  %v5670_v26 = vld [vmem:[%s7611_s14 + $0x408] ss:$16 sps:$4 sm:$0xff]   ;;  %v5717_v56 = vld [vmem:[%s7611_s14 + $0x504] ss:$16 sps:$4 sm:$0xff]   ;;  %v5738_v7 = vld [vmem:[%s7611_s14 + $0x56c] ss:$16 sps:$4 sm:$0xff]  }
0x10f3   :  { %v7128_v36 = vadd.f32 %v2631_v29, %v2580_v10  ;;  %3893 = vmatprep.subr.bf16.mxu1 %v5615_v32  ;;  %4016 = vmatprep.subr.bf16.mxu0 %v5618_v33  ;;  %v5678_v29 = vld [vmem:[%s7611_s14 + $0x42c] ss:$16 sps:$4 sm:$0xff]   ;;  %v5681_v32 = vld [vmem:[%s7611_s14 + $0x444] ss:$16 sps:$4 sm:$0xff]   ;;  %v5679_v10 = vld [vmem:[%s7611_s14 + $0x440] ss:$16 sps:$4 sm:$0xff]  }
0x10f4   :  { %v2641_v21 = vadd.f32 %v2635_v18, %v2581_v17  ;;  %v5684_v33 = vld [vmem:[%s7611_s14 + $0x44c] ss:$16 sps:$4 sm:$0xff]   ;;  %v5730_v5 = vld [vmem:[%s7611_s14 + $0x548] ss:$16 sps:$4 sm:$0xff]   ;;  %v5735_v6 = vld [vmem:[%s7611_s14 + $0x564] ss:$16 sps:$4 sm:$0xff]  }
0x10f5   :  { %v5739_v17 = vld [vmem:[%s7611_s14 + $0x580] ss:$16 sps:$4 sm:$0xff]   ;;  %v5742_v18 = vld [vmem:[%s7611_s14 + $0x588] ss:$16 sps:$4 sm:$0xff]  }
0x10f6   :  { %3894 = vmatpush1.bf16.msra.mxu1 %v5613_v34  ;;  %4017 = vmatpush1.bf16.msra.mxu0 %v5616_v13  ;;  %v2647_v12 = vpack.c.bf16 %v2641_v21, %v2641_v21  ;;  %v5682_v34 = vld [vmem:[%s7611_s14 + $0x448] ss:$16 sps:$4 sm:$0xff]   ;;  %v5687_v13 = vld [vmem:[%s7611_s14 + $0x464] ss:$16 sps:$4 sm:$0xff]  }
0x10f7   :  { %3895 = vmatprep.subr.bf16.mxu1 %v5621_v15  ;;  %4018 = vmatprep.subr.bf16.mxu0 %v5624_v38  ;;  %v5690_v15 = vld [vmem:[%s7611_s14 + $0x46c] ss:$16 sps:$4 sm:$0xff]   ;;  %v5685_v38 = vld [vmem:[%s7611_s14 + $0x460] ss:$16 sps:$4 sm:$0xff]   ;;  %v5753_v21 = vld [vmem:[%s7611_s14 + $0x5c4] ss:$16 sps:$4 sm:$0xff]  }
0x10fa   :  { %3896 = vmatpush1.bf16.msra.mxu1 %v5619_v41  ;;  %4019 = vmatpush1.bf16.msra.mxu0 %v5622_v46  ;;  %v5688_v41 = vld [vmem:[%s7611_s14 + $0x468] ss:$16 sps:$4 sm:$0xff]   ;;  %v5693_v46 = vld [vmem:[%s7611_s14 + $0x484] ss:$16 sps:$4 sm:$0xff]  }
0x10fb   :  { %3897 = vmatprep.subr.bf16.mxu1 %v5627_v30  ;;  %4020 = vmatprep.subr.bf16.mxu0 %v5630_v48  ;;  %v5696_v30 = vld [vmem:[%s7611_s14 + $0x48c] ss:$16 sps:$4 sm:$0xff]   ;;  %v5691_v48 = vld [vmem:[%s7611_s14 + $0x480] ss:$16 sps:$4 sm:$0xff]  }
0x10fe   :  { %3898 = vmatpush1.bf16.msra.mxu1 %v5625_v4  ;;  %4021 = vmatpush1.bf16.msra.mxu0 %v5628_v43  ;;  %v5694_v4 = vld [vmem:[%s7611_s14 + $0x488] ss:$16 sps:$4 sm:$0xff]   ;;  %v5699_v43 = vld [vmem:[%s7611_s14 + $0x4a4] ss:$16 sps:$4 sm:$0xff]  }
0x10ff   :  { %3899 = vmatprep.subr.bf16.mxu1 %v5633_v51  ;;  %4022 = vmatprep.subr.bf16.mxu0 %v5636_v53  ;;  %v5702_v51 = vld [vmem:[%s7611_s14 + $0x4ac] ss:$16 sps:$4 sm:$0xff]   ;;  %v5697_v53 = vld [vmem:[%s7611_s14 + $0x4a0] ss:$16 sps:$4 sm:$0xff]  }
0x1102   :  { %3900 = vmatpush1.bf16.msra.mxu1 %v5631_v55  ;;  %4023 = vmatpush1.bf16.msra.mxu0 %v5634_v24  ;;  %v5700_v55 = vld [vmem:[%s7611_s14 + $0x4a8] ss:$16 sps:$4 sm:$0xff]   ;;  %v5705_v24 = vld [vmem:[%s7611_s14 + $0x4c4] ss:$16 sps:$4 sm:$0xff]  }
0x1103   :  { %3901 = vmatprep.subr.bf16.mxu1 %v5639_v57  ;;  %4024 = vmatprep.subr.bf16.mxu0 %v5642_v37  ;;  %v5708_v57 = vld [vmem:[%s7611_s14 + $0x4cc] ss:$16 sps:$4 sm:$0xff]   ;;  %v5703_v37 = vld [vmem:[%s7611_s14 + $0x4c0] ss:$16 sps:$4 sm:$0xff]  }
0x1106   :  { %3902 = vmatpush1.bf16.msra.mxu1 %v5637_v40  ;;  %4025 = vmatpush1.bf16.msra.mxu0 %v5640_v50  ;;  %v5711_v40 = vld [vmem:[%s7611_s14 + $0x4e4] ss:$16 sps:$4 sm:$0xff]   ;;  %v5714_v50 = vld [vmem:[%s7611_s14 + $0x4ec] ss:$16 sps:$4 sm:$0xff]  }
0x1107   :  { %3903 = vmatprep.subr.bf16.mxu1 %v5645_v42  ;;  %4026 = vmatprep.subr.bf16.mxu0 %v5648_v52  ;;  %v5709_v42 = vld [vmem:[%s7611_s14 + $0x4e0] ss:$16 sps:$4 sm:$0xff]   ;;  %v5712_v52 = vld [vmem:[%s7611_s14 + $0x4e8] ss:$16 sps:$4 sm:$0xff]  }
0x110a   :  { %3904 = vmatpush1.bf16.msra.mxu1 %v5643_v45  ;;  %4027 = vmatpush1.bf16.msra.mxu0 %v5646_v59  ;;  %v5720_v45 = vld [vmem:[%s7611_s14 + $0x50c] ss:$16 sps:$4 sm:$0xff]   ;;  %v5715_v59 = vld [vmem:[%s7611_s14 + $0x500] ss:$16 sps:$4 sm:$0xff]  }
0x110b   :  { %3905 = vmatprep.subr.bf16.mxu1 %v5651_v60  ;;  %4028 = vmatprep.subr.bf16.mxu0 %v5654_v61  ;;  %v5718_v60 = vld [vmem:[%s7611_s14 + $0x508] ss:$16 sps:$4 sm:$0xff]   ;;  %v5723_v61 = vld [vmem:[%s7611_s14 + $0x524] ss:$16 sps:$4 sm:$0xff]  }
0x110e   :  { %3906 = vmatpush1.bf16.msra.mxu1 %v5649_v63  ;;  %4029 = vmatpush1.bf16.msra.mxu0 %v5652_v0  ;;  %v5724_v63 = vld [vmem:[%s7611_s14 + $0x528] ss:$16 sps:$4 sm:$0xff]   ;;  %v5729_v0 = vld [vmem:[%s7611_s14 + $0x544] ss:$16 sps:$4 sm:$0xff]  }
0x110f   :  { %3907 = vmatprep.subr.bf16.mxu1 %v5657_v1  ;;  %4030 = vmatprep.subr.bf16.mxu0 %v5660_v2  ;;  %v5732_v1 = vld [vmem:[%s7611_s14 + $0x54c] ss:$16 sps:$4 sm:$0xff]   ;;  %v5727_v2 = vld [vmem:[%s7611_s14 + $0x540] ss:$16 sps:$4 sm:$0xff]  }
0x1112   :  { %3908 = vmatpush1.bf16.msra.mxu1 %v5655_v8  ;;  %4031 = vmatpush1.bf16.msra.mxu0 %v5658_v9  ;;  %v5733_v8 = vld [vmem:[%s7611_s14 + $0x560] ss:$16 sps:$4 sm:$0xff]   ;;  %v5736_v9 = vld [vmem:[%s7611_s14 + $0x568] ss:$16 sps:$4 sm:$0xff]  }
0x1113   :  { %3909 = vmatprep.subr.bf16.mxu1 %v5663_v11  ;;  %4032 = vmatprep.subr.bf16.mxu0 %v5666_v62  ;;  %v5741_v11 = vld [vmem:[%s7611_s14 + $0x584] ss:$16 sps:$4 sm:$0xff]   ;;  %v5744_v62 = vld [vmem:[%s7611_s14 + $0x58c] ss:$16 sps:$4 sm:$0xff]  }
0x1116   :  { %3910 = vmatpush1.bf16.msra.mxu1 %v5661_v16  ;;  %4033 = vmatpush1.bf16.msra.mxu0 %v5664_v54  ;;  %v5747_v16 = vld [vmem:[%s7611_s14 + $0x5a4] ss:$16 sps:$4 sm:$0xff]   ;;  %v5750_v54 = vld [vmem:[%s7611_s14 + $0x5ac] ss:$16 sps:$4 sm:$0xff]  }
0x1117   :  { %3920 = vmatprep.subr.bf16.mxu1 %v5669_v19  ;;  %4043 = vmatprep.subr.bf16.mxu0 %v5672_v20  ;;  %v5745_v19 = vld [vmem:[%s7611_s14 + $0x5a0] ss:$16 sps:$4 sm:$0xff]   ;;  %v5748_v20 = vld [vmem:[%s7611_s14 + $0x5a8] ss:$16 sps:$4 sm:$0xff]  }
0x1119   :  { %3912 = vmatmul.mubr.bf16.vlgmr.msra.gmra.mrb[44].mxu1 %v2644_v23  ;;  %4035 = vmatmul.mubr.bf16.vlgmr.msra.gmra.mrb[48].mxu0 %v2644_v23  ;;  %v5751_v23 = vld [vmem:[%s7611_s14 + $0x5c0] ss:$16 sps:$4 sm:$0xff]  }
0x111a   :  { %3921 = vmatpush1.bf16.msra.mxu1 %v5667_v22  ;;  %3952 = vmatprep.mubr.bf16.mxu1 %v2647_v12  ;;  %v5756_v22 = vld [vmem:[%s7611_s14 + $0x5cc] ss:$16 sps:$4 sm:$0xff]  }
0x111b   :  { %4044 = vmatpush1.bf16.msra.mxu0 %v5670_v26  ;;  %4075 = vmatprep.mubr.bf16.mxu0 %v2647_v12  ;;  %v5754_v26 = vld [vmem:[%s7611_s14 + $0x5c8] ss:$16 sps:$4 sm:$0xff]   ;;  %v5759_v12 = vld [vmem:[%s7611_s14 + $0x5e4] ss:$16 sps:$4 sm:$0xff]  }
0x111c   :  { %3922 = vmatprep.subr.bf16.mxu1 %v5675_v28  ;;  %4045 = vmatprep.subr.bf16.mxu0 %v5678_v29  ;;  %v5762_v28 = vld [vmem:[%s7611_s14 + $0x5ec] ss:$16 sps:$4 sm:$0xff]   ;;  %v5757_v29 = vld [vmem:[%s7611_s14 + $0x5e0] ss:$16 sps:$4 sm:$0xff]  }
0x111e   :  { %3923 = vmatpush1.bf16.msra.mxu1 %v5673_v49  ;;  %v5760_v49 = vld [vmem:[%s7611_s14 + $0x5e8] ss:$16 sps:$4 sm:$0xff]  }
0x111f   :  { %4046 = vmatpush1.bf16.msra.mxu0 %v5676_v31  ;;  %3924 = vmatprep.subr.bf16.mxu1 %v5681_v32  ;;  %v5763_v31 = vld [vmem:[%s7613_s16 + $0x40] sm:$0xff]  }
0x1120   :  { %4047 = vmatprep.subr.bf16.mxu0 %v5684_v33  ;;  %v5764_v32 = vld [vmem:[%s7613_s16 + $0xc0] sm:$0xff]  }
0x1121   :  { %v5765_v33 = vld [vmem:[%s7613_s16] sm:$0xff]  }
0x1122   :  { %3925 = vmatpush1.bf16.msra.mxu1 %v5679_v10  ;;  %v2646_v10 = vpack.c.bf16 %v7128_v36, %v7128_v36  ;;  %v5769_v36 = vld [vmem:[%s7613_s16 + $0x8] sm:$0xff]  }
0x1123   :  { %4048 = vmatpush1.bf16.msra.mxu0 %v5682_v34  ;;  %3926 = vmatprep.subr.bf16.mxu1 %v5687_v13  ;;  %v5766_v34 = vld [vmem:[%s7613_s16 + $0x80] sm:$0xff]   ;;  %v5767_v13 = vld [vmem:[%s7613_s16 + $0x48] sm:$0xff]  }
0x1124   :  { %4049 = vmatprep.subr.bf16.mxu0 %v5690_v15  ;;  %v5768_v15 = vld [vmem:[%s7613_s16 + $0xc8] sm:$0xff]  }
0x1126   :  { %3927 = vmatpush1.bf16.msra.mxu1 %v5685_v38  ;;  %v5770_v38 = vld [vmem:[%s7613_s16 + $0x88] sm:$0xff]  }
0x1127   :  { %4050 = vmatpush1.bf16.msra.mxu0 %v5688_v41  ;;  %3928 = vmatprep.subr.bf16.mxu1 %v5693_v46  ;;  %v5771_v41 = vld [vmem:[%s7613_s16 + $0x50] sm:$0xff]  }
0x1128   :  { %4051 = vmatprep.subr.bf16.mxu0 %v5696_v30  ;;  %v5772_v46 = vld [vmem:[%s7613_s16 + $0xd0] sm:$0xff]  }
0x1129   :  { %v5773_v30 = vld [vmem:[%s7613_s16 + $0x10] sm:$0xff]  }
0x112a   :  { %3929 = vmatpush1.bf16.msra.mxu1 %v5691_v48  ;;  %v5774_v48 = vld [vmem:[%s7613_s16 + $0x90] sm:$0xff]  }
0x112b   :  { %4052 = vmatpush1.bf16.msra.mxu0 %v5694_v4  ;;  %3930 = vmatprep.subr.bf16.mxu1 %v5699_v43  ;;  %v5775_v4 = vld [vmem:[%s7613_s16 + $0x58] sm:$0xff]  }
0x112c   :  { %4053 = vmatprep.subr.bf16.mxu0 %v5702_v51  ;;  %v5776_v43 = vld [vmem:[%s7613_s16 + $0xd8] sm:$0xff]  }
0x112d   :  { %v5777_v51 = vld [vmem:[%s7613_s16 + $0x18] sm:$0xff]  }
0x112e   :  { %3931 = vmatpush1.bf16.msra.mxu1 %v5697_v53  ;;  %v5778_v53 = vld [vmem:[%s7613_s16 + $0x98] sm:$0xff]  }
0x112f   :  { %4054 = vmatpush1.bf16.msra.mxu0 %v5700_v55  ;;  %3932 = vmatprep.subr.bf16.mxu1 %v5705_v24  ;;  %v5779_v55 = vld [vmem:[%s7613_s16 + $0x60] sm:$0xff]  }
0x1130   :  { %4055 = vmatprep.subr.bf16.mxu0 %v5708_v57  ;;  %v5780_v24 = vld [vmem:[%s7613_s16 + $0xe0] sm:$0xff]  }
0x1131   :  { %v5781_v57 = vld [vmem:[%s7613_s16 + $0x20] sm:$0xff]  }
0x1132   :  { %3933 = vmatpush1.bf16.msra.mxu1 %v5703_v37  ;;  %v5782_v37 = vld [vmem:[%s7613_s16 + $0xa0] sm:$0xff]  }
0x1133   :  { %4056 = vmatpush1.bf16.msra.mxu0 %v5706_v39  ;;  %3934 = vmatprep.subr.bf16.mxu1 %v5711_v40  ;;  %v5783_v39 = vld [vmem:[%s7613_s16 + $0x68] sm:$0xff]  }
0x1134   :  { %4057 = vmatprep.subr.bf16.mxu0 %v5714_v50  ;;  %v5784_v40 = vld [vmem:[%s7613_s16 + $0xe8] sm:$0xff]  }
0x1135   :  { %v5785_v50 = vld [vmem:[%s7613_s16 + $0x28] sm:$0xff]  }
0x1136   :  { %3935 = vmatpush1.bf16.msra.mxu1 %v5709_v42  ;;  %v5786_v42 = vld [vmem:[%s7613_s16 + $0xa8] sm:$0xff]  }
0x1137   :  { %4058 = vmatpush1.bf16.msra.mxu0 %v5712_v52  ;;  %3936 = vmatprep.subr.bf16.mxu1 %v5717_v56  ;;  %v5787_v52 = vld [vmem:[%s7613_s16 + $0x70] sm:$0xff]  }
0x1138   :  { %4059 = vmatprep.subr.bf16.mxu0 %v5720_v45  ;;  %v5788_v56 = vld [vmem:[%s7613_s16 + $0xf0] sm:$0xff]  }
0x1139   :  { %v5789_v45 = vld [vmem:[%s7613_s16 + $0x30] sm:$0xff]  }
0x113a   :  { %3937 = vmatpush1.bf16.msra.mxu1 %v5715_v59  ;;  %v5790_v59 = vld [vmem:[%s7613_s16 + $0xb0] sm:$0xff]  }
0x113b   :  { %4060 = vmatpush1.bf16.msra.mxu0 %v5718_v60  ;;  %3938 = vmatprep.subr.bf16.mxu1 %v5723_v61  ;;  %v5791_v60 = vld [vmem:[%s7613_s16 + $0x78] sm:$0xff]  }
0x113c   :  { %4061 = vmatprep.subr.bf16.mxu0 %v5726_v25  ;;  %v5792_v61 = vld [vmem:[%s7613_s16 + $0xf8] sm:$0xff]  }
0x113d   :  { %v5793_v25 = vld [vmem:[%s7613_s16 + $0x38] sm:$0xff]  }
0x113e   :  { %3939 = vmatpush1.bf16.msra.mxu1 %v5721_v27  ;;  %v5794_v27 = vld [vmem:[%s7613_s16 + $0xb8] sm:$0xff]  }
0x113f   :  { %4062 = vmatpush1.bf16.msra.mxu0 %v5724_v63  ;;  %3940 = vmatprep.subr.bf16.mxu1 %v5729_v0  ;;  %v2045_v63 = vld [vmem:[%s7612_s15] sm:$0x77]  ;;  %v2046_v0 = vld [vmem:[%s7612_s15 + $0x8] sm:$0x77]  ;;  %s5934_s15 = smov [#allocation4]  }
0x1140   :  { %4063 = vmatprep.subr.bf16.mxu0 %v5732_v1  ;;  %v2845_v1 = vrot.slane %v2045_v63, %v6145_v44  ;;  %s4532_s16 = sshll.u32 %s5934_s15, 4  ;;  %s4533_s16 = int_to_ptr.vmem [resolvable:$true] %s4532_s16 }
0x1141   :  { %s5858_s0 = scalar_lea.vmem %s4533_s16, 32  ;;  %p5863_p1 = scmp.lt.s32.totalorder %s4533_s16, %s4533_s16 }
0x1142   :  { %3941 = vmatpush1.bf16.msra.mxu1 %v5727_v2  ;;  %v2853_v2 = vrot.slane %v2046_v0, %v6145_v44  ;;  %p5859_p0 = scmp.ne.s32.totalorder %s4533_s16, %s5858_s0  ;;  %p5864_p2 = scmp.lt.s32.totalorder %s5858_s0, %s5858_s0 }
0x1143   :  { %4064 = vmatpush1.bf16.msra.mxu0 %v5730_v5  ;;  %3942 = vmatprep.subr.bf16.mxu1 %v5735_v6  ;;  %v2849_v5 = vrot.slane %v2045_v63, %v6310_v3  ;;  %v2857_v6 = vrot.slane %v2046_v0, %v6310_v3  ;;  %v4139_v3 = vrot.slane %v2046_v0, %v6166_v58 }
0x1144   :  { %4065 = vmatprep.subr.bf16.mxu0 %v5738_v7  ;;  %v2865_v7 = vrot.slane %v2845_v1, %v6145_v44  ;;  %p5865_p3 = por %p5864_p2, %p5863_p1 }
0x1146   :  { %3943 = vmatpush1.bf16.msra.mxu1 %v5733_v8  ;;  %v4091_v8 = vrot.slane %v2045_v63, %v6153_v47  ;;  %p5866_p4 = pnand %p5865_p3, %p5859_p0 }
0x1147   :  { %4066 = vmatpush1.bf16.msra.mxu0 %v5736_v9  ;;  %3944 = vmatprep.subr.bf16.mxu1 %v5741_v11  ;;  %v2873_v9 = vrot.slane %v2853_v2, %v6145_v44  ;;  %v4099_v11 = vrot.slane %v2046_v0, %v6153_v47 }
0x1148   :  { %4067 = vmatprep.subr.bf16.mxu0 %v5744_v62  ;;  %v2869_v62 = vrot.slane %v2849_v5, %v6145_v44 }
0x114a   :  { %3945 = vmatpush1.bf16.msra.mxu1 %v5739_v17  ;;  %v4095_v17 = vrot.slane %v2045_v63, %v6582_v14 }
0x114b   :  { %4068 = vmatpush1.bf16.msra.mxu0 %v5742_v18  ;;  %3946 = vmatprep.subr.bf16.mxu1 %v5747_v16  ;;  %v4131_v18 = vrot.slane %v2045_v63, %v6166_v58  ;;  %v2877_v16 = vrot.slane %v2857_v6, %v6145_v44 }
0x114c   :  { %4069 = vmatprep.subr.bf16.mxu0 %v5750_v54  ;;  %v4103_v54 = vrot.slane %v2046_v0, %v6582_v14  ;;  %v4115_v44 = vrot.slane %v4095_v17, %v6153_v47 }
0x114e   :  { %3947 = vmatpush1.bf16.msra.mxu1 %v5745_v19 }
0x114f   :  { %4070 = vmatpush1.bf16.msra.mxu0 %v5748_v20  ;;  %3948 = vmatprep.subr.bf16.mxu1 %v5753_v21  ;;  %v4135_v20 = vrot.slane %v2045_v63, %v6631_v35 }
0x1150   :  { %4071 = vmatprep.subr.bf16.mxu0 %v5756_v22  ;;  %v4111_v22 = vrot.slane %v4091_v8, %v6153_v47 }
0x1152   :  { %3949 = vmatpush1.bf16.msra.mxu1 %v5751_v23 }
0x1153   :  { %4072 = vmatpush1.bf16.msra.mxu0 %v5754_v26  ;;  %3950 = vmatprep.subr.bf16.mxu1 %v5759_v12  ;;  %v4143_v12 = vrot.slane %v2046_v0, %v6631_v35 }
0x1154   :  { %4073 = vmatprep.subr.bf16.mxu0 %v5762_v28 }
0x1156   :  { %3951 = vmatpush1.bf16.msra.mxu1 %v5757_v29  ;;  %v4119_v29 = vrot.slane %v4099_v11, %v6153_v47 }
0x1157   :  { %4074 = vmatpush1.bf16.msra.mxu0 %v5760_v49  ;;  %5056 = vmatprep.subr.bf16.mxu1 %v5763_v31 }
0x1158   :  { %5078 = vmatprep.subr.bf16.mxu0 %v5764_v32 }
0x1159   :  { %3953 = vmatmul.mubr.bf16.vlgmr.msra.gmra.mrb[44].mxu1 %v2646_v10 }
0x115a   :  { %4076 = vmatmul.mubr.bf16.vlgmr.msra.gmra.mrb[48].mxu0 %v2646_v10  ;;  %5057 = vmatpush3.bf16.msra.mxu1 %v5765_v33  ;;  %v4151_v33 = vrot.slane %v4131_v18, %v6166_v58 }
0x115b   :  { %5079 = vmatpush3.bf16.msra.mxu0 %v5766_v34  ;;  %5058 = vmatprep.subr.bf16.mxu1 %v5767_v13  ;;  %v4123_v34 = vrot.slane %v4103_v54, %v6153_v47 }
0x115c   :  { %5080 = vmatprep.subr.bf16.mxu0 %v5768_v15 }
0x115e   :  { %5059 = vmatpush3.bf16.msra.mxu1 %v5769_v36 }
0x115f   :  { %5081 = vmatpush3.bf16.msra.mxu0 %v5770_v38  ;;  %5060 = vmatprep.subr.bf16.mxu1 %v5771_v41  ;;  %v4159_v38 = vrot.slane %v4139_v3, %v6166_v58 }
0x1160   :  { %5082 = vmatprep.subr.bf16.mxu0 %v5772_v46  ;;  %v4155_v46 = vrot.slane %v4135_v20, %v6166_v58 }
0x1162   :  { %5061 = vmatpush3.bf16.msra.mxu1 %v5773_v30 }
0x1163   :  { %5083 = vmatpush3.bf16.msra.mxu0 %v5774_v48  ;;  %5062 = vmatprep.subr.bf16.mxu1 %v5775_v4  ;;  %v4163_v4 = vrot.slane %v4143_v12, %v6166_v58 }
0x1164   :  { %5084 = vmatprep.subr.bf16.mxu0 %v5776_v43 }
0x1166   :  { %5063 = vmatpush3.bf16.msra.mxu1 %v5777_v51 }
0x1167   :  { %5085 = vmatpush3.bf16.msra.mxu0 %v5778_v53  ;;  %5064 = vmatprep.subr.bf16.mxu1 %v5779_v55 }
0x1168   :  { %5086 = vmatprep.subr.bf16.mxu0 %v5780_v24 }
0x116a   :  { %5065 = vmatpush3.bf16.msra.mxu1 %v5781_v57 }
0x116b   :  { %5087 = vmatpush3.bf16.msra.mxu0 %v5782_v37  ;;  %5066 = vmatprep.subr.bf16.mxu1 %v5783_v39 }
0x116c   :  { %5088 = vmatprep.subr.bf16.mxu0 %v5784_v40 }
0x116e   :  { %5067 = vmatpush3.bf16.msra.mxu1 %v5785_v50 }
0x116f   :  { %5089 = vmatpush3.bf16.msra.mxu0 %v5786_v42  ;;  %5068 = vmatprep.subr.bf16.mxu1 %v5787_v52 }
0x1170   :  { %5090 = vmatprep.subr.bf16.mxu0 %v5788_v56 }
0x1172   :  { %5069 = vmatpush3.bf16.msra.mxu1 %v5789_v45 }
0x1173   :  { %5091 = vmatpush3.bf16.msra.mxu0 %v5790_v59  ;;  %5070 = vmatprep.subr.bf16.mxu1 %v5791_v60 }
0x1174   :  { %5092 = vmatprep.subr.bf16.mxu0 %v5792_v61 }
0x1176   :  { %5071 = vmatpush3.bf16.msra.mxu1 %v5793_v25 }
0x1177   :  { %5093 = vmatpush3.bf16.msra.mxu0 %v5794_v27 }
0x122c   :  { %v3954_v19 = vpop.f32.mrb[44].mxu1 }
0x122d   :  { %v5246_v21 = vadd.f32 %v3954_v19, %v2865_v7  ;;  %v4077_v23 = vpop.f32.mrb[48].mxu0  ;;  %v3956_v26 = vpop.f32.mrb[45].mxu1 }
0x122e   :  { %v5248_v28 = vadd.f32 %v4077_v23, %v2873_v9  ;;  %v5247_v49 = vadd.f32 %v3956_v26, %v2869_v62  ;;  %v4079_v31 = vpop.f32.mrb[49].mxu0  ;;  %v3958_v14 = vpop.f32.mrb[46].mxu1 }
0x122f   :  { %v4084_v32 = vmax.f32 %v5246_v21, 0.0  ;;  %v5249_v10 = vadd.f32 %v4079_v31, %v2877_v16  ;;  %v4081_v13 = vpop.f32.mrb[50].mxu0  ;;  %v3959_v15 = vpop.f32.mrb[47].mxu1 }
0x1230   :  { %v4086_v36 = vmax.f32 %v5248_v28, 0.0  ;;  %v4085_v35 = vmax.f32 %v5247_v49, 0.0  ;;  %v4082_v41 = vpop.f32.mrb[51].mxu0 }
0x1231   :  { %v4124_v30 = vmul.f32 %v4111_v22, %v4084_v32  ;;  %v4087_v48 = vmax.f32 %v5249_v10, 0.0 }
0x1232   :  { %v4126_v43 = vmul.f32 %v4119_v29, %v4086_v36  ;;  %v4125_v51 = vmul.f32 %v4115_v44, %v4085_v35 }
0x1233   :  { %v4164_v53 = vadd.f32 %v4151_v33, %v4124_v30  ;;  %v4127_v55 = vmul.f32 %v4123_v34, %v4087_v48 }
0x1234   :  { %v4166_v24 = vadd.f32 %v4159_v38, %v4126_v43  ;;  %v4165_v57 = vadd.f32 %v4155_v46, %v4125_v51 }
0x1235   :  { %v4167_v47 = vadd.f32 %v4163_v4, %v4127_v55  ;;  %v4168_v39 = vpack.c.bf16 %v4164_v53, %v4164_v53 }
0x1236   :  { %v4169_v37 = vpack.c.bf16 %v4165_v57, %v4165_v57  ;;  %v4170_v50 = vpack.c.bf16 %v4166_v24, %v4166_v24 }
0x1237   :  { %v4171_v40 = vpack.c.bf16 %v4167_v47, %v4167_v47 }
0x1238   :  { %4467 = vmatprep.mubr.bf16.mxu1 %v4169_v37 }
0x1239   :  { %4507 = vmatprep.mubr.bf16.mxu0 %v4171_v40  ;;  %4468 = vmatmul.mubr.bf16.vlgmr.msra.gmra.mrb[48].mxu1 %v4168_v39 }
0x123a   :  { %4508 = vmatmul.mubr.bf16.vlgmr.msra.gmra.mrb[52].mxu0 %v4170_v50 }
0x123b   :  { %5869 = shalt.err (!%p5866_p4)
}
0x123c   :  { %s5870_s13 = scalar_lea.hbm %s7616_s19, 32 }
0x123d   :  { %p5871_p5 = scmp.ne.s32.totalorder %s7616_s19, %s5870_s13  ;;  %p5874_p6 = scmp.lt.u32.totalorder %s5870_s13, %s7616_s19 }
0x123f   :  { %p5876_p7 = pnand %p5874_p6, %p5871_p5 }
0x1241   :  { %5879 = shalt.err (!%p5876_p7)
}
0x1242   :  { %4535 = dma.vmem_to_hbm [thread:$0]  %s4533_s16, 32, %s7616_s19, [#allocation5]  }
0x1243   :  { %s5880_s22 = scalar_lea.vmem %s4523_s29, 32  ;;  %p5885_p9 = scmp.lt.s32.totalorder %s4523_s29, %s4523_s29 }
0x1244   :  { %p5881_p8 = scmp.ne.s32.totalorder %s4523_s29, %s5880_s22  ;;  %p5886_p10 = scmp.lt.s32.totalorder %s5880_s22, %s5880_s22 }
0x1246   :  { %p5887_p11 = por %p5886_p10, %p5885_p9 }
0x1248   :  { %p5888_p12 = pnand %p5887_p11, %p5881_p8 }
0x124a   :  { %5891 = shalt.err (!%p5888_p12)
}
0x124b   :  { %s5892_s2 = scalar_lea.hbm %s7615_s18, 32 }
0x124c   :  { %p5893_p13 = scmp.ne.s32.totalorder %s7615_s18, %s5892_s2  ;;  %p5896_p0 = scmp.lt.u32.totalorder %s5892_s2, %s7615_s18 }
0x124e   :  { %p5898_p1 = pnand %p5896_p0, %p5893_p13 }
0x1250   :  { %5901 = shalt.err (!%p5898_p1)
}
0x1251   :  { %4525 = dma.vmem_to_hbm [thread:$0]  %s4523_s29, 32, %s7615_s18, [#allocation3]   ;;  %v4922_v52 = vld [vmem:[%s7614_s17] ss:$0 sm:$0xff] }
0x1252   :  { %s5936_s28 = smov [#allocation6]  }
0x1253   :  { %s4542_s4 = sshll.u32 %s5936_s28, 4  ;;  %s4543_s4 = int_to_ptr.vmem [resolvable:$true] %s4542_s4 }
0x1254   :  { %s5902_s18 = scalar_lea.vmem %s4543_s4, 32  ;;  %p5907_p3 = scmp.lt.s32.totalorder %s4543_s4, %s4543_s4 }
0x1255   :  { %p5903_p2 = scmp.ne.s32.totalorder %s4543_s4, %s5902_s18  ;;  %p5908_p4 = scmp.lt.s32.totalorder %s5902_s18, %s5902_s18 }
0x1257   :  { %p5909_p5 = por %p5908_p4, %p5907_p3 }
0x1259   :  { %p5910_p6 = pnand %p5909_p5, %p5903_p2 }
0x130c   :  { %v5072_v58 = vpop.f32.mrb[48].mxu1 }
0x130d   :  { %v5094_v42 = vpop.f32.mrb[52].mxu0  ;;  %v5073_v56 = vpop.f32.mrb[49].mxu1 }
0x130e   :  { %v5074_v45 = vadd.f32 %v5073_v56, %v5072_v58  ;;  %v5095_v59 = vpop.f32.mrb[53].mxu0  ;;  %v5075_v60 = vpop.f32.mrb[50].mxu1 }
0x130f   :  { %v5096_v61 = vadd.f32 %v5095_v59, %v5094_v42  ;;  %v5097_v25 = vpop.f32.mrb[54].mxu0  ;;  %v5076_v27 = vpop.f32.mrb[51].mxu1 }
0x1310   :  { %v4470_v63 = vadd.f32 %v5074_v45, %v4922_v52  ;;  %v5098_v0 = vpop.f32.mrb[55].mxu0 }
0x1312   :  { %v4510_v1 = vadd.f32 %v5096_v61, %v4470_v63 }
0x1314   :  { %4515 = vst [vmem:[#allocation6] sm:$0x3] %v4510_v1 }
0x1315   :  { %5913 = shalt.err (!%p5910_p6)
}
0x1316   :  { %s5914_s16 = scalar_lea.hbm %s7617_s20, 32 }
0x1317   :  { %p5915_p7 = scmp.ne.s32.totalorder %s7617_s20, %s5914_s16  ;;  %p5918_p8 = scmp.lt.u32.totalorder %s5914_s16, %s7617_s20 }
0x1319   :  { %p5920_p9 = pnand %p5918_p8, %p5915_p7 }
0x131b   :  { %5923 = shalt.err (!%p5920_p9)
}
0x131c   :  { %4545 = dma.vmem_to_hbm [thread:$0]  %s4543_s4, 32, %s7617_s20, [#allocation5]  }
0x131d   :  { %5924 = dma.done.wait [#allocation3], 32  }
0x131e   :  { %5925 = vsyncadd [#allocation3], 4294967264 }
0x131f   :  { %5926 = dma.done.wait [#allocation5], 64  }
0x1320   :  { %5927 = vsyncadd [#allocation5], 4294967232 }
0x1321   :  { %4555 = vsyncpa [#allocation3], 1 }
0x1322   :  { %4556 = vsyncpa [#allocation5], 1 }

</bundles_post_ra>
